<compile_context>
chip_gen: v7x
topology: tpu7x:2x2x1
jax: 0.10.0
libtpu: 0.0.40
codegen_flags: <defaults>
</compile_context>

<pallas_src>
import functools
import math

import jax
import jax.numpy as jnp
from jax.experimental import pallas as pl
from jax.experimental.pallas import tpu as pltpu


# h/c are fori_loop carries (live in vregs); cap Bb*H so each carry stays at
# ~8-16 vregs and the unrolled time loop does not spill the carry to VMEM.
_MAX_CARRY_ELEMS = 16 * 1024
# Budget for the hoisted time-chunked f32 gates scratch; bounds VMEM use
# independent of sequence length (matters most on v7x's 64 MiB VMEM).
_GATES_BUDGET_BYTES = 4 << 20


def _choose_batch_block(batch, hidden_dim):
    # Prefer 2 parallel batch blocks so the "parallel" grid axis can use both
    # TensorCores on v7x; on 1-TC chips one extra grid step is cheap.  Split
    # further only if the vreg-carry cap requires it.
    n_blocks = 2 if (batch % 2 == 0 and batch >= 16) else 1
    bb = batch // n_blocks
    while bb * hidden_dim > _MAX_CARRY_ELEMS and bb % 2 == 0:
        bb //= 2
        n_blocks *= 2
    return bb, n_blocks


def _choose_time_chunk(seq_len, bb, hidden_dim):
    bytes_per_step = bb * 4 * hidden_dim * 4      # f32 gate rows per timestep
    max_t = max(1, _GATES_BUDGET_BYTES // bytes_per_step)
    if seq_len <= max_t:
        return seq_len
    for t in range(min(max_t, seq_len), 0, -1):   # largest divisor of seq_len
        if seq_len % t == 0:
            return t
    return 1


def _reorder_gates_ifog(w, hidden_dim):
    """PyTorch gate order [i|f|g|o] -> [i|f|o|g] along the last axis so the
    three sigmoid gates form one contiguous 3H lane range (single sigmoid call
    per step); done once wrapper-side, free layout plumbing."""
    H = hidden_dim
    return jnp.concatenate(
        [w[..., :2 * H], w[..., 3 * H:4 * H], w[..., 2 * H:3 * H]], axis=-1)


# ----------------------------------------------------------------------------
# Pallas kernel: fused n_layer LSTM recurrence + final linear head.
# ----------------------------------------------------------------------------
def make_lstm_classifier_kernel(n_layers, seq_len, hidden_dim, batch_block,
                                t_chunk):
    H = hidden_dim
    Bb = batch_block
    n_chunks = seq_len // t_chunk
    unroll = True if t_chunk <= 32 else 8

    def kernel(*refs):
        # ref order: x, (wih, whh, b) * n_layers, wfc, bfc, out, gates_buf, seq_bufs...
        x_ref = refs[0]                          # (T*Bb, E)           bf16
        layer_refs = refs[1:1 + 3 * n_layers]
        wfc_ref = refs[1 + 3 * n_layers]         # (H, out_pad)        bf16
        bfc_ref = refs[2 + 3 * n_layers]         # (1, out_pad)        f32
        out_ref = refs[3 + 3 * n_layers]         # (Bb, out_pad)       f32
        gates_buf = refs[4 + 3 * n_layers]       # (t_chunk*Bb, 4H)    f32
        seq_bufs = refs[5 + 3 * n_layers:]       # each (T*Bb, H)      bf16

        cur_in = x_ref
        h = jnp.zeros((Bb, H), jnp.float32)
        for layer in range(n_layers):
            wih_ref = layer_refs[3 * layer + 0]  # (in_dim, 4H) bf16, [i|f|o|g]
            whh_ref = layer_refs[3 * layer + 1]  # (H, 4H)      bf16, [i|f|o|g]
            b_ref = layer_refs[3 * layer + 2]    # (1, 4H)      f32 == b_ih+b_hh

            # Only non-final layers need their full output sequence.
            write_seq = layer < n_layers - 1
            out_buf = seq_bufs[layer % 2] if write_seq else None

            h = jnp.zeros((Bb, H), jnp.float32)
            c = jnp.zeros((Bb, H), jnp.float32)

            # TODO(synk): for very long sequences switch this static chunk loop
            # to lax.fori_loop over chunks to bound trace size.
            for chunk in range(n_chunks):
                row0 = chunk * t_chunk * Bb

                # (1) Hoisted input projection + bias for this time chunk: one
                #     big bf16 MXU matmul, off the serial critical path; small
                #     rotating f32 scratch keeps VMEM bounded regardless of T.
                gates_buf[...] = (
                    jnp.dot(cur_in[pl.ds(row0, t_chunk * Bb), :], wih_ref[...],
                            preferred_element_type=jnp.float32)
                    + b_ref[...]
                )

                # (2) Serial recurrence over the chunk; h/c stay in vregs (f32).
                # TODO(synk): interleave two independent Bb/2 sub-blocks per
                # step (or hold W_hh in MXU staging regs via matmul_push_rhs)
                # to fill recurrence latency bubbles for large configs.
                def step(t, carry, out_buf=out_buf, whh_ref=whh_ref,
                         write_seq=write_seq, row0=row0):
                    h, c = carry                                    # f32 vregs
                    grow = pl.multiple_of(t * Bb, Bb)
                    gates = gates_buf[pl.ds(grow, Bb), :] + jnp.dot(
                        h.astype(jnp.bfloat16), whh_ref[...],
                        preferred_element_type=jnp.float32)         # (Bb,4H) f32
                    # Gate order after wrapper reorder: [i | f | o | g].
                    sig = jax.nn.sigmoid(gates[:, :3 * H])          # one EUP call
                    i_g = sig[:, 0 * H:1 * H]
                    f_g = sig[:, 1 * H:2 * H]
                    o_g = sig[:, 2 * H:3 * H]
                    g_g = jnp.tanh(gates[:, 3 * H:4 * H])
                    c_new = f_g * c + i_g * g_g                     # c stays f32
                    h_new = o_g * jnp.tanh(c_new)
                    if write_seq:
                        out_buf[pl.ds(pl.multiple_of(row0 + t * Bb, Bb), Bb), :] = (
                            h_new.astype(jnp.bfloat16))
                    return h_new, c_new

                h, c = jax.lax.fori_loop(0, t_chunk, step, (h, c),
                                         unroll=unroll)

            # TODO(synk): nn.LSTM inter-layer dropout (p=0.2) is a no-op in
            # eval mode; training-mode dropout is not applied here.
            if write_seq:
                cur_in = out_buf

        # fc(hidden[-1]) with lane-dense (128-padded) output.
        out_ref[...] = (
            jnp.dot(h.astype(jnp.bfloat16), wfc_ref[...],
                    preferred_element_type=jnp.float32)
            + bfc_ref[...]
        )

    return kernel


# ----------------------------------------------------------------------------
# Wrapper: fused time-major embedding gather (glue) + pallas_call.
# ----------------------------------------------------------------------------
@functools.partial(jax.jit, static_argnames=("hidden_dim",))
def lstm_classifier_forward(x_tokens, emb_matrix, layer_params, wfc, bfc,
                            *, hidden_dim):
    batch, seq_len = x_tokens.shape
    n_layers = len(layer_params)
    out_dim = bfc.shape[0]
    H = hidden_dim
    assert H % 128 == 0, "hidden_dim must be a multiple of 128 (lane-aligned gate slices)"

    Bb, n_bb = _choose_batch_block(batch, H)
    t_chunk = _choose_time_chunk(seq_len, Bb, H)

    # Embedding table pre-cast to bf16 by the caller (no-op cast here); gather
    # directly into the per-block time-major (T*Bb, E) layout by reordering the
    # tiny int token ids instead of transposing the gathered activation.
    emb_bf16 = emb_matrix.astype(jnp.bfloat16)
    E = emb_bf16.shape[-1]
    tok_blk = (x_tokens.reshape(n_bb, Bb, seq_len)
                       .transpose(0, 2, 1)
                       .reshape(n_bb, seq_len * Bb))
    x_blk = jnp.take(emb_bf16, tok_blk, axis=0)          # (n_bb, T*Bb, E) bf16

    # Pad the FC head to a lane-dense 128-multiple output.
    out_pad = ((out_dim + 127) // 128) * 128
    wfc_p = jnp.pad(jnp.transpose(wfc),
                    ((0, 0), (0, out_pad - out_dim))).astype(jnp.bfloat16)   # (H, out_pad)
    bfc_p = jnp.pad(bfc, (0, out_pad - out_dim)).astype(jnp.float32)[None, :]  # (1, out_pad)

    inputs = [x_blk]
    in_specs = [pl.BlockSpec((None, seq_len * Bb, E), lambda b: (b, 0, 0))]
    for (w_ih, w_hh, b_ih, b_hh) in layer_params:
        inputs.append(_reorder_gates_ifog(jnp.transpose(w_ih), H)
                      .astype(jnp.bfloat16))                        # (in, 4H)
        inputs.append(_reorder_gates_ifog(jnp.transpose(w_hh), H)
                      .astype(jnp.bfloat16))                        # (H, 4H)
        inputs.append(_reorder_gates_ifog((b_ih + b_hh).astype(jnp.float32),
                                          H)[None, :])              # (1, 4H)
    inputs.append(wfc_p)
    inputs.append(bfc_p)
    # TODO(synk): single-buffer these constant-index weight specs
    # (pipeline_mode=pl.Buffered(1)) to halve their VMEM footprint at scale.
    for arr in inputs[1:]:
        in_specs.append(pl.BlockSpec(arr.shape, lambda b: (0, 0)))

    n_seq_bufs = min(n_layers - 1, 2)   # last layer never writes its sequence
    scratch_shapes = (
        [pltpu.VMEM((t_chunk * Bb, 4 * H), jnp.float32)]              # gates chunk
        + [pltpu.VMEM((seq_len * Bb, H), jnp.bfloat16)] * n_seq_bufs  # layer outs
    )

    # Explicit VMEM budget: pipelined blocks are double-buffered; add scratch
    # and headroom.  Clamped to [default 32 MiB, 128 MiB].
    blk_in_bytes = seq_len * Bb * E * 2
    weight_bytes = sum(math.prod(a.shape) * a.dtype.itemsize for a in inputs[1:])
    out_blk_bytes = Bb * out_pad * 4
    scratch_bytes = (t_chunk * Bb * 4 * H * 4
                     + n_seq_bufs * seq_len * Bb * H * 2)
    vmem_limit = int(1.25 * (2 * (blk_in_bytes + weight_bytes)
                             + 2 * out_blk_bytes + scratch_bytes)) + (2 << 20)
    vmem_limit = max(32 << 20, min(vmem_limit, 128 << 20))

    kernel = make_lstm_classifier_kernel(n_layers, seq_len, H, Bb, t_chunk)

    out = pl.pallas_call(
        kernel,
        out_shape=jax.ShapeDtypeStruct((batch, out_pad), jnp.float32),
        grid_spec=pltpu.PrefetchScalarGridSpec(
            num_scalar_prefetch=0,
            grid=(n_bb,),
            in_specs=in_specs,
            out_specs=pl.BlockSpec((Bb, out_pad), lambda b: (b, 0)),
            scratch_shapes=scratch_shapes,
        ),
        compiler_params=pltpu.CompilerParams(
            dimension_semantics=("parallel",),
            vmem_limit_bytes=vmem_limit),
    )(*inputs)

    return out[:, :out_dim]


# ----------------------------------------------------------------------------
# Pure-JAX f32 reference (mirrors the PyTorch forward in eval mode).
# ----------------------------------------------------------------------------
def reference_forward(x_tokens, emb_matrix, layer_params, wfc, bfc):
    x = jnp.take(emb_matrix, x_tokens, axis=0)  # (B, T, E)
    for (w_ih, w_hh, b_ih, b_hh) in layer_params:
        B = x.shape[0]
        H = w_hh.shape[1]

        def step(carry, x_t, w_ih=w_ih, w_hh=w_hh, b_ih=b_ih, b_hh=b_hh):
            h, c = carry
            gates = x_t @ w_ih.T + h @ w_hh.T + b_ih + b_hh
            i, f, g, o = jnp.split(gates, 4, axis=-1)
            i = jax.nn.sigmoid(i)
            f = jax.nn.sigmoid(f)
            g = jnp.tanh(g)
            o = jax.nn.sigmoid(o)
            c = f * c + i * g
            h = o * jnp.tanh(c)
            return (h, c), h

        init = (jnp.zeros((B, H), jnp.float32), jnp.zeros((B, H), jnp.float32))
        (_, _), ys = jax.lax.scan(step, init, jnp.transpose(x, (1, 0, 2)))
        x = jnp.transpose(ys, (1, 0, 2))
    h_last = x[:, -1, :]  # == hidden[-1] of nn.LSTM
    return h_last @ wfc.T + bfc


# ----------------------------------------------------------------------------
# Deterministic parameter construction + smoke test.
# ----------------------------------------------------------------------------
def init_params(key, vocab_size, embedding_dim, hidden_dim, output_dim, n_layers):
    keys = iter(jax.random.split(key, 4 + 8 * n_layers))
    k = 1.0 / jnp.sqrt(hidden_dim)

    emb_matrix = jax.random.normal(next(keys), (vocab_size, embedding_dim),
                                   dtype=jnp.float32)
    layer_params = []
    for layer in range(n_layers):
        in_dim = embedding_dim if layer == 0 else hidden_dim
        w_ih = jax.random.uniform(next(keys), (4 * hidden_dim, in_dim),
                                  minval=-k, maxval=k, dtype=jnp.float32)
        w_hh = jax.random.uniform(next(keys), (4 * hidden_dim, hidden_dim),
                                  minval=-k, maxval=k, dtype=jnp.float32)
        b_ih = jax.random.uniform(next(keys), (4 * hidden_dim,),
                                  minval=-k, maxval=k, dtype=jnp.float32)
        b_hh = jax.random.uniform(next(keys), (4 * hidden_dim,),
                                  minval=-k, maxval=k, dtype=jnp.float32)
        layer_params.append((w_ih, w_hh, b_ih, b_hh))

    wfc = jax.random.uniform(next(keys), (output_dim, hidden_dim),
                             minval=-k, maxval=k, dtype=jnp.float32)
    bfc = jax.random.uniform(next(keys), (output_dim,),
                             minval=-k, maxval=k, dtype=jnp.float32)
    return emb_matrix, tuple(layer_params), wfc, bfc


if __name__ == "__main__":
    VOCAB = 50
    EMB = 64
    HIDDEN = 128   # multiple of 128 keeps per-gate lane slices aligned on TPU
    OUT = 4
    N_LAYERS = 2
    BATCH = 32     # -> 2 parallel batch blocks of 16 rows each
    SEQ = 8

    key = jax.random.PRNGKey(0)
    k_params, k_tokens = jax.random.split(key)

    emb_matrix, layer_params, wfc, bfc = init_params(
        k_params, VOCAB, EMB, HIDDEN, OUT, N_LAYERS)
    x_tokens = jax.random.randint(k_tokens, (BATCH, SEQ), 0, VOCAB,
                                  dtype=jnp.int32)

    # Pre-cast the frozen embedding table to bf16 once, outside the call path.
    emb_bf16 = emb_matrix.astype(jnp.bfloat16)

    logits = lstm_classifier_forward(x_tokens, emb_bf16, layer_params,
                                     wfc, bfc, hidden_dim=HIDDEN)
    logits = jax.block_until_ready(logits)

    ref = reference_forward(x_tokens, emb_matrix, layer_params, wfc, bfc)
    assert logits.shape == (BATCH, OUT)
    # bf16 weights/activations in the kernel vs. full-f32 reference -> loosened
    # tolerance (cell state and all accumulation remain f32).
    assert jnp.allclose(logits, ref, atol=3e-2, rtol=3e-2), (
        jnp.max(jnp.abs(logits - ref)), logits, ref)

    print("KERNEL_OK")
</pallas_src>

<mosaic_0001>
module attributes {stable_mosaic.version = 11 : i64} {
  func.func @kernel(%arg0: i32, %arg1: memref<1x128x64xbf16, #tpu.memory_space<vmem>>, %arg2: memref<64x512xbf16, #tpu.memory_space<vmem>>, %arg3: memref<128x512xbf16, #tpu.memory_space<vmem>>, %arg4: memref<1x512xf32, #tpu.memory_space<vmem>>, %arg5: memref<128x512xbf16, #tpu.memory_space<vmem>>, %arg6: memref<128x512xbf16, #tpu.memory_space<vmem>>, %arg7: memref<1x512xf32, #tpu.memory_space<vmem>>, %arg8: memref<128x128xbf16, #tpu.memory_space<vmem>>, %arg9: memref<1x128xf32, #tpu.memory_space<vmem>>, %arg10: memref<16x128xf32, #tpu.memory_space<vmem>>, %arg11: memref<128x512xf32, #tpu.memory_space<vmem>>, %arg12: memref<128x128xbf16, #tpu.memory_space<vmem>>) attributes {dimension_semantics = [#tpu.dimension_semantics<parallel>], iteration_bounds = array<i64: 2>, scalar_prefetch = 0 : i64, scratch_operands = 2 : i64, tpu.core_type = #tpu.core_type<tc>, window_params = [{transform_indices = @transform_0, window_bounds = array<i64: 1, 128, 64>}, {pipeline_mode = #tpu.pipeline_mode<synchronous>, transform_indices = @transform_1, window_bounds = array<i64: 64, 512>}, {pipeline_mode = #tpu.pipeline_mode<synchronous>, transform_indices = @transform_2, window_bounds = array<i64: 128, 512>}, {pipeline_mode = #tpu.pipeline_mode<synchronous>, transform_indices = @transform_3, window_bounds = array<i64: 1, 512>}, {pipeline_mode = #tpu.pipeline_mode<synchronous>, transform_indices = @transform_4, window_bounds = array<i64: 128, 512>}, {pipeline_mode = #tpu.pipeline_mode<synchronous>, transform_indices = @transform_5, window_bounds = array<i64: 128, 512>}, {pipeline_mode = #tpu.pipeline_mode<synchronous>, transform_indices = @transform_6, window_bounds = array<i64: 1, 512>}, {pipeline_mode = #tpu.pipeline_mode<synchronous>, transform_indices = @transform_7, window_bounds = array<i64: 128, 128>}, {pipeline_mode = #tpu.pipeline_mode<synchronous>, transform_indices = @transform_8, window_bounds = array<i64: 1, 128>}, {transform_indices = @transform_9, window_bounds = array<i64: 16, 128>}]} {
    %cst = arith.constant 0.000000e+00 : f32
    %0 = vector.broadcast %cst : f32 to vector<16x128xf32>
    %cst_0 = arith.constant 0.000000e+00 : f32
    %1 = vector.broadcast %cst_0 : f32 to vector<16x128xf32>
    %c0 = arith.constant 0 : index
    %c0_1 = arith.constant 0 : index
    %c0_2 = arith.constant 0 : index
    %2 = vector.load %arg1[%c0, %c0_1, %c0_2] : memref<1x128x64xbf16, #tpu.memory_space<vmem>>, vector<1x128x64xbf16>
    %3 = vector.shape_cast %2 : vector<1x128x64xbf16> to vector<128x64xbf16>
    %c0_3 = arith.constant 0 : index
    %c0_4 = arith.constant 0 : index
    %4 = vector.load %arg2[%c0_3, %c0_4] : memref<64x512xbf16, #tpu.memory_space<vmem>>, vector<64x512xbf16>
    %cst_5 = arith.constant dense<0.000000e+00> : vector<128x512xf32>
    %5 = tpu.matmul %3, %4, %cst_5 {dimension_numbers = #tpu.dot_dimension_numbers<[1], [0], [0], [1], [0, 0, 1, 1], [], []>} : vector<128x64xbf16>, vector<64x512xbf16>, vector<128x512xf32> -> vector<128x512xf32>
    %c0_6 = arith.constant 0 : index
    %c0_7 = arith.constant 0 : index
    %6 = vector.load %arg4[%c0_6, %c0_7] : memref<1x512xf32, #tpu.memory_space<vmem>>, vector<1x512xf32>
    %7 = vector.broadcast %6 : vector<1x512xf32> to vector<128x512xf32>
    %8 = arith.addf %5, %7 : vector<128x512xf32>
    %c0_8 = arith.constant 0 : index
    %c0_9 = arith.constant 0 : index
    %9 = vector.load %arg11[%c0_8, %c0_9] : memref<128x512xf32, #tpu.memory_space<vmem>>, vector<128x512xf32>
    tpu.vector_store %arg11[%c0_8, %c0_9], %8 {strides = array<i32>} : memref<128x512xf32, #tpu.memory_space<vmem>>, vector<128x512xf32>,
    %c0_i32 = arith.constant 0 : i32
    %c16_i32 = arith.constant 16 : i32
    %10 = arith.muli %c0_i32, %c16_i32 : i32
    %11 = tpu.assume_multiple %10, 16 : i32
    %12 = arith.index_cast %11 : i32 to index
    %c0_10 = arith.constant 0 : index
    %13 = vector.load %arg11[%12, %c0_10] : memref<128x512xf32, #tpu.memory_space<vmem>>, vector<16x512xf32>
    %14 = arith.truncf %0 : vector<16x128xf32> to vector<16x128xbf16>
    %c0_11 = arith.constant 0 : index
    %c0_12 = arith.constant 0 : index
    %15 = vector.load %arg3[%c0_11, %c0_12] : memref<128x512xbf16, #tpu.memory_space<vmem>>, vector<128x512xbf16>
    %cst_13 = arith.constant dense<0.000000e+00> : vector<16x512xf32>
    %16 = tpu.matmul %14, %15, %cst_13 {dimension_numbers = #tpu.dot_dimension_numbers<[1], [0], [0], [1], [0, 0, 1, 1], [], []>} : vector<16x128xbf16>, vector<128x512xbf16>, vector<16x512xf32> -> vector<16x512xf32>
    %17 = arith.addf %13, %16 : vector<16x512xf32>
    %18 = vector.extract_strided_slice %17 {offsets = [0, 0], sizes = [16, 384], strides = [1, 1]} : vector<16x512xf32> to vector<16x384xf32>
    %19 = arith.negf %18 : vector<16x384xf32>
    %20 = math.exp %19 : vector<16x384xf32>
    %cst_14 = arith.constant 1.000000e+00 : f32
    %21 = vector.broadcast %cst_14 : f32 to vector<16x384xf32>
    %22 = arith.addf %21, %20 : vector<16x384xf32>
    %23 = arith.divf %21, %22 : vector<16x384xf32>
    %24 = vector.extract_strided_slice %23 {offsets = [0, 0], sizes = [16, 128], strides = [1, 1]} : vector<16x384xf32> to vector<16x128xf32>
    %25 = vector.extract_strided_slice %23 {offsets = [0, 128], sizes = [16, 128], strides = [1, 1]} : vector<16x384xf32> to vector<16x128xf32>
    %26 = vector.extract_strided_slice %23 {offsets = [0, 256], sizes = [16, 128], strides = [1, 1]} : vector<16x384xf32> to vector<16x128xf32>
    %27 = vector.extract_strided_slice %17 {offsets = [0, 384], sizes = [16, 128], strides = [1, 1]} : vector<16x512xf32> to vector<16x128xf32>
    %28 = math.tanh %27 : vector<16x128xf32>
    %29 = arith.mulf %25, %1 : vector<16x128xf32>
    %30 = arith.mulf %24, %28 : vector<16x128xf32>
    %31 = arith.addf %29, %30 : vector<16x128xf32>
    %32 = math.tanh %31 : vector<16x128xf32>
    %33 = arith.mulf %26, %32 : vector<16x128xf32>
    %34 = arith.truncf %33 : vector<16x128xf32> to vector<16x128xbf16>
    %c16_i32_15 = arith.constant 16 : i32
    %35 = arith.muli %c0_i32, %c16_i32_15 : i32
    %c0_i32_16 = arith.constant 0 : i32
    %36 = arith.addi %c0_i32_16, %35 : i32
    %37 = tpu.assume_multiple %36, 16 : i32
    %38 = arith.index_cast %37 : i32 to index
    %c0_17 = arith.constant 0 : index
    %39 = vector.load %arg12[%38, %c0_17] : memref<128x128xbf16, #tpu.memory_space<vmem>>, vector<16x128xbf16>
    tpu.vector_store %arg12[%38, %c0_17], %34 {strides = array<i32>} : memref<128x128xbf16, #tpu.memory_space<vmem>>, vector<16x128xbf16>,
    %c1_i32 = arith.constant 1 : i32
    %c16_i32_18 = arith.constant 16 : i32
    %40 = arith.muli %c1_i32, %c16_i32_18 : i32
    %41 = tpu.assume_multiple %40, 16 : i32
    %42 = arith.index_cast %41 : i32 to index
    %c0_19 = arith.constant 0 : index
    %43 = vector.load %arg11[%42, %c0_19] : memref<128x512xf32, #tpu.memory_space<vmem>>, vector<16x512xf32>
    %44 = arith.truncf %33 : vector<16x128xf32> to vector<16x128xbf16>
    %c0_20 = arith.constant 0 : index
    %c0_21 = arith.constant 0 : index
    %45 = vector.load %arg3[%c0_20, %c0_21] : memref<128x512xbf16, #tpu.memory_space<vmem>>, vector<128x512xbf16>
    %cst_22 = arith.constant dense<0.000000e+00> : vector<16x512xf32>
    %46 = tpu.matmul %44, %45, %cst_22 {dimension_numbers = #tpu.dot_dimension_numbers<[1], [0], [0], [1], [0, 0, 1, 1], [], []>} : vector<16x128xbf16>, vector<128x512xbf16>, vector<16x512xf32> -> vector<16x512xf32>
    %47 = arith.addf %43, %46 : vector<16x512xf32>
    %48 = vector.extract_strided_slice %47 {offsets = [0, 0], sizes = [16, 384], strides = [1, 1]} : vector<16x512xf32> to vector<16x384xf32>
    %49 = arith.negf %48 : vector<16x384xf32>
    %50 = math.exp %49 : vector<16x384xf32>
    %cst_23 = arith.constant 1.000000e+00 : f32
    %51 = vector.broadcast %cst_23 : f32 to vector<16x384xf32>
    %52 = arith.addf %51, %50 : vector<16x384xf32>
    %53 = arith.divf %51, %52 : vector<16x384xf32>
    %54 = vector.extract_strided_slice %53 {offsets = [0, 0], sizes = [16, 128], strides = [1, 1]} : vector<16x384xf32> to vector<16x128xf32>
    %55 = vector.extract_strided_slice %53 {offsets = [0, 128], sizes = [16, 128], strides = [1, 1]} : vector<16x384xf32> to vector<16x128xf32>
    %56 = vector.extract_strided_slice %53 {offsets = [0, 256], sizes = [16, 128], strides = [1, 1]} : vector<16x384xf32> to vector<16x128xf32>
    %57 = vector.extract_strided_slice %47 {offsets = [0, 384], sizes = [16, 128], strides = [1, 1]} : vector<16x512xf32> to vector<16x128xf32>
    %58 = math.tanh %57 : vector<16x128xf32>
    %59 = arith.mulf %55, %31 : vector<16x128xf32>
    %60 = arith.mulf %54, %58 : vector<16x128xf32>
    %61 = arith.addf %59, %60 : vector<16x128xf32>
    %62 = math.tanh %61 : vector<16x128xf32>
    %63 = arith.mulf %56, %62 : vector<16x128xf32>
    %64 = arith.truncf %63 : vector<16x128xf32> to vector<16x128xbf16>
    %c16_i32_24 = arith.constant 16 : i32
    %65 = arith.muli %c1_i32, %c16_i32_24 : i32
    %c0_i32_25 = arith.constant 0 : i32
    %66 = arith.addi %c0_i32_25, %65 : i32
    %67 = tpu.assume_multiple %66, 16 : i32
    %68 = arith.index_cast %67 : i32 to index
    %c0_26 = arith.constant 0 : index
    %69 = vector.load %arg12[%68, %c0_26] : memref<128x128xbf16, #tpu.memory_space<vmem>>, vector<16x128xbf16>
    tpu.vector_store %arg12[%68, %c0_26], %64 {strides = array<i32>} : memref<128x128xbf16, #tpu.memory_space<vmem>>, vector<16x128xbf16>,
    %c2_i32 = arith.constant 2 : i32
    %c16_i32_27 = arith.constant 16 : i32
    %70 = arith.muli %c2_i32, %c16_i32_27 : i32
    %71 = tpu.assume_multiple %70, 16 : i32
    %72 = arith.index_cast %71 : i32 to index
    %c0_28 = arith.constant 0 : index
    %73 = vector.load %arg11[%72, %c0_28] : memref<128x512xf32, #tpu.memory_space<vmem>>, vector<16x512xf32>
    %74 = arith.truncf %63 : vector<16x128xf32> to vector<16x128xbf16>
    %c0_29 = arith.constant 0 : index
    %c0_30 = arith.constant 0 : index
    %75 = vector.load %arg3[%c0_29, %c0_30] : memref<128x512xbf16, #tpu.memory_space<vmem>>, vector<128x512xbf16>
    %cst_31 = arith.constant dense<0.000000e+00> : vector<16x512xf32>
    %76 = tpu.matmul %74, %75, %cst_31 {dimension_numbers = #tpu.dot_dimension_numbers<[1], [0], [0], [1], [0, 0, 1, 1], [], []>} : vector<16x128xbf16>, vector<128x512xbf16>, vector<16x512xf32> -> vector<16x512xf32>
    %77 = arith.addf %73, %76 : vector<16x512xf32>
    %78 = vector.extract_strided_slice %77 {offsets = [0, 0], sizes = [16, 384], strides = [1, 1]} : vector<16x512xf32> to vector<16x384xf32>
    %79 = arith.negf %78 : vector<16x384xf32>
    %80 = math.exp %79 : vector<16x384xf32>
    %cst_32 = arith.constant 1.000000e+00 : f32
    %81 = vector.broadcast %cst_32 : f32 to vector<16x384xf32>
    %82 = arith.addf %81, %80 : vector<16x384xf32>
    %83 = arith.divf %81, %82 : vector<16x384xf32>
    %84 = vector.extract_strided_slice %83 {offsets = [0, 0], sizes = [16, 128], strides = [1, 1]} : vector<16x384xf32> to vector<16x128xf32>
    %85 = vector.extract_strided_slice %83 {offsets = [0, 128], sizes = [16, 128], strides = [1, 1]} : vector<16x384xf32> to vector<16x128xf32>
    %86 = vector.extract_strided_slice %83 {offsets = [0, 256], sizes = [16, 128], strides = [1, 1]} : vector<16x384xf32> to vector<16x128xf32>
    %87 = vector.extract_strided_slice %77 {offsets = [0, 384], sizes = [16, 128], strides = [1, 1]} : vector<16x512xf32> to vector<16x128xf32>
    %88 = math.tanh %87 : vector<16x128xf32>
    %89 = arith.mulf %85, %61 : vector<16x128xf32>
    %90 = arith.mulf %84, %88 : vector<16x128xf32>
    %91 = arith.addf %89, %90 : vector<16x128xf32>
    %92 = math.tanh %91 : vector<16x128xf32>
    %93 = arith.mulf %86, %92 : vector<16x128xf32>
    %94 = arith.truncf %93 : vector<16x128xf32> to vector<16x128xbf16>
    %c16_i32_33 = arith.constant 16 : i32
    %95 = arith.muli %c2_i32, %c16_i32_33 : i32
    %c0_i32_34 = arith.constant 0 : i32
    %96 = arith.addi %c0_i32_34, %95 : i32
    %97 = tpu.assume_multiple %96, 16 : i32
    %98 = arith.index_cast %97 : i32 to index
    %c0_35 = arith.constant 0 : index
    %99 = vector.load %arg12[%98, %c0_35] : memref<128x128xbf16, #tpu.memory_space<vmem>>, vector<16x128xbf16>
    tpu.vector_store %arg12[%98, %c0_35], %94 {strides = array<i32>} : memref<128x128xbf16, #tpu.memory_space<vmem>>, vector<16x128xbf16>,
    %c3_i32 = arith.constant 3 : i32
    %c16_i32_36 = arith.constant 16 : i32
    %100 = arith.muli %c3_i32, %c16_i32_36 : i32
    %101 = tpu.assume_multiple %100, 16 : i32
    %102 = arith.index_cast %101 : i32 to index
    %c0_37 = arith.constant 0 : index
    %103 = vector.load %arg11[%102, %c0_37] : memref<128x512xf32, #tpu.memory_space<vmem>>, vector<16x512xf32>
    %104 = arith.truncf %93 : vector<16x128xf32> to vector<16x128xbf16>
    %c0_38 = arith.constant 0 : index
    %c0_39 = arith.constant 0 : index
    %105 = vector.load %arg3[%c0_38, %c0_39] : memref<128x512xbf16, #tpu.memory_space<vmem>>, vector<128x512xbf16>
    %cst_40 = arith.constant dense<0.000000e+00> : vector<16x512xf32>
    %106 = tpu.matmul %104, %105, %cst_40 {dimension_numbers = #tpu.dot_dimension_numbers<[1], [0], [0], [1], [0, 0, 1, 1], [], []>} : vector<16x128xbf16>, vector<128x512xbf16>, vector<16x512xf32> -> vector<16x512xf32>
    %107 = arith.addf %103, %106 : vector<16x512xf32>
    %108 = vector.extract_strided_slice %107 {offsets = [0, 0], sizes = [16, 384], strides = [1, 1]} : vector<16x512xf32> to vector<16x384xf32>
    %109 = arith.negf %108 : vector<16x384xf32>
    %110 = math.exp %109 : vector<16x384xf32>
    %cst_41 = arith.constant 1.000000e+00 : f32
    %111 = vector.broadcast %cst_41 : f32 to vector<16x384xf32>
    %112 = arith.addf %111, %110 : vector<16x384xf32>
    %113 = arith.divf %111, %112 : vector<16x384xf32>
    %114 = vector.extract_strided_slice %113 {offsets = [0, 0], sizes = [16, 128], strides = [1, 1]} : vector<16x384xf32> to vector<16x128xf32>
    %115 = vector.extract_strided_slice %113 {offsets = [0, 128], sizes = [16, 128], strides = [1, 1]} : vector<16x384xf32> to vector<16x128xf32>
    %116 = vector.extract_strided_slice %113 {offsets = [0, 256], sizes = [16, 128], strides = [1, 1]} : vector<16x384xf32> to vector<16x128xf32>
    %117 = vector.extract_strided_slice %107 {offsets = [0, 384], sizes = [16, 128], strides = [1, 1]} : vector<16x512xf32> to vector<16x128xf32>
    %118 = math.tanh %117 : vector<16x128xf32>
    %119 = arith.mulf %115, %91 : vector<16x128xf32>
    %120 = arith.mulf %114, %118 : vector<16x128xf32>
    %121 = arith.addf %119, %120 : vector<16x128xf32>
    %122 = math.tanh %121 : vector<16x128xf32>
    %123 = arith.mulf %116, %122 : vector<16x128xf32>
    %124 = arith.truncf %123 : vector<16x128xf32> to vector<16x128xbf16>
    %c16_i32_42 = arith.constant 16 : i32
    %125 = arith.muli %c3_i32, %c16_i32_42 : i32
    %c0_i32_43 = arith.constant 0 : i32
    %126 = arith.addi %c0_i32_43, %125 : i32
    %127 = tpu.assume_multiple %126, 16 : i32
    %128 = arith.index_cast %127 : i32 to index
    %c0_44 = arith.constant 0 : index
    %129 = vector.load %arg12[%128, %c0_44] : memref<128x128xbf16, #tpu.memory_space<vmem>>, vector<16x128xbf16>
    tpu.vector_store %arg12[%128, %c0_44], %124 {strides = array<i32>} : memref<128x128xbf16, #tpu.memory_space<vmem>>, vector<16x128xbf16>,
    %c4_i32 = arith.constant 4 : i32
    %c16_i32_45 = arith.constant 16 : i32
    %130 = arith.muli %c4_i32, %c16_i32_45 : i32
    %131 = tpu.assume_multiple %130, 16 : i32
    %132 = arith.index_cast %131 : i32 to index
    %c0_46 = arith.constant 0 : index
    %133 = vector.load %arg11[%132, %c0_46] : memref<128x512xf32, #tpu.memory_space<vmem>>, vector<16x512xf32>
    %134 = arith.truncf %123 : vector<16x128xf32> to vector<16x128xbf16>
    %c0_47 = arith.constant 0 : index
    %c0_48 = arith.constant 0 : index
    %135 = vector.load %arg3[%c0_47, %c0_48] : memref<128x512xbf16, #tpu.memory_space<vmem>>, vector<128x512xbf16>
    %cst_49 = arith.constant dense<0.000000e+00> : vector<16x512xf32>
    %136 = tpu.matmul %134, %135, %cst_49 {dimension_numbers = #tpu.dot_dimension_numbers<[1], [0], [0], [1], [0, 0, 1, 1], [], []>} : vector<16x128xbf16>, vector<128x512xbf16>, vector<16x512xf32> -> vector<16x512xf32>
    %137 = arith.addf %133, %136 : vector<16x512xf32>
    %138 = vector.extract_strided_slice %137 {offsets = [0, 0], sizes = [16, 384], strides = [1, 1]} : vector<16x512xf32> to vector<16x384xf32>
    %139 = arith.negf %138 : vector<16x384xf32>
    %140 = math.exp %139 : vector<16x384xf32>
    %cst_50 = arith.constant 1.000000e+00 : f32
    %141 = vector.broadcast %cst_50 : f32 to vector<16x384xf32>
    %142 = arith.addf %141, %140 : vector<16x384xf32>
    %143 = arith.divf %141, %142 : vector<16x384xf32>
    %144 = vector.extract_strided_slice %143 {offsets = [0, 0], sizes = [16, 128], strides = [1, 1]} : vector<16x384xf32> to vector<16x128xf32>
    %145 = vector.extract_strided_slice %143 {offsets = [0, 128], sizes = [16, 128], strides = [1, 1]} : vector<16x384xf32> to vector<16x128xf32>
    %146 = vector.extract_strided_slice %143 {offsets = [0, 256], sizes = [16, 128], strides = [1, 1]} : vector<16x384xf32> to vector<16x128xf32>
    %147 = vector.extract_strided_slice %137 {offsets = [0, 384], sizes = [16, 128], strides = [1, 1]} : vector<16x512xf32> to vector<16x128xf32>
    %148 = math.tanh %147 : vector<16x128xf32>
    %149 = arith.mulf %145, %121 : vector<16x128xf32>
    %150 = arith.mulf %144, %148 : vector<16x128xf32>
    %151 = arith.addf %149, %150 : vector<16x128xf32>
    %152 = math.tanh %151 : vector<16x128xf32>
    %153 = arith.mulf %146, %152 : vector<16x128xf32>
    %154 = arith.truncf %153 : vector<16x128xf32> to vector<16x128xbf16>
    %c16_i32_51 = arith.constant 16 : i32
    %155 = arith.muli %c4_i32, %c16_i32_51 : i32
    %c0_i32_52 = arith.constant 0 : i32
    %156 = arith.addi %c0_i32_52, %155 : i32
    %157 = tpu.assume_multiple %156, 16 : i32
    %158 = arith.index_cast %157 : i32 to index
    %c0_53 = arith.constant 0 : index
    %159 = vector.load %arg12[%158, %c0_53] : memref<128x128xbf16, #tpu.memory_space<vmem>>, vector<16x128xbf16>
    tpu.vector_store %arg12[%158, %c0_53], %154 {strides = array<i32>} : memref<128x128xbf16, #tpu.memory_space<vmem>>, vector<16x128xbf16>,
    %c5_i32 = arith.constant 5 : i32
    %c16_i32_54 = arith.constant 16 : i32
    %160 = arith.muli %c5_i32, %c16_i32_54 : i32
    %161 = tpu.assume_multiple %160, 16 : i32
    %162 = arith.index_cast %161 : i32 to index
    %c0_55 = arith.constant 0 : index
    %163 = vector.load %arg11[%162, %c0_55] : memref<128x512xf32, #tpu.memory_space<vmem>>, vector<16x512xf32>
    %164 = arith.truncf %153 : vector<16x128xf32> to vector<16x128xbf16>
    %c0_56 = arith.constant 0 : index
    %c0_57 = arith.constant 0 : index
    %165 = vector.load %arg3[%c0_56, %c0_57] : memref<128x512xbf16, #tpu.memory_space<vmem>>, vector<128x512xbf16>
    %cst_58 = arith.constant dense<0.000000e+00> : vector<16x512xf32>
    %166 = tpu.matmul %164, %165, %cst_58 {dimension_numbers = #tpu.dot_dimension_numbers<[1], [0], [0], [1], [0, 0, 1, 1], [], []>} : vector<16x128xbf16>, vector<128x512xbf16>, vector<16x512xf32> -> vector<16x512xf32>
    %167 = arith.addf %163, %166 : vector<16x512xf32>
    %168 = vector.extract_strided_slice %167 {offsets = [0, 0], sizes = [16, 384], strides = [1, 1]} : vector<16x512xf32> to vector<16x384xf32>
    %169 = arith.negf %168 : vector<16x384xf32>
    %170 = math.exp %169 : vector<16x384xf32>
    %cst_59 = arith.constant 1.000000e+00 : f32
    %171 = vector.broadcast %cst_59 : f32 to vector<16x384xf32>
    %172 = arith.addf %171, %170 : vector<16x384xf32>
    %173 = arith.divf %171, %172 : vector<16x384xf32>
    %174 = vector.extract_strided_slice %173 {offsets = [0, 0], sizes = [16, 128], strides = [1, 1]} : vector<16x384xf32> to vector<16x128xf32>
    %175 = vector.extract_strided_slice %173 {offsets = [0, 128], sizes = [16, 128], strides = [1, 1]} : vector<16x384xf32> to vector<16x128xf32>
    %176 = vector.extract_strided_slice %173 {offsets = [0, 256], sizes = [16, 128], strides = [1, 1]} : vector<16x384xf32> to vector<16x128xf32>
    %177 = vector.extract_strided_slice %167 {offsets = [0, 384], sizes = [16, 128], strides = [1, 1]} : vector<16x512xf32> to vector<16x128xf32>
    %178 = math.tanh %177 : vector<16x128xf32>
    %179 = arith.mulf %175, %151 : vector<16x128xf32>
    %180 = arith.mulf %174, %178 : vector<16x128xf32>
    %181 = arith.addf %179, %180 : vector<16x128xf32>
    %182 = math.tanh %181 : vector<16x128xf32>
    %183 = arith.mulf %176, %182 : vector<16x128xf32>
    %184 = arith.truncf %183 : vector<16x128xf32> to vector<16x128xbf16>
    %c16_i32_60 = arith.constant 16 : i32
    %185 = arith.muli %c5_i32, %c16_i32_60 : i32
    %c0_i32_61 = arith.constant 0 : i32
    %186 = arith.addi %c0_i32_61, %185 : i32
    %187 = tpu.assume_multiple %186, 16 : i32
    %188 = arith.index_cast %187 : i32 to index
    %c0_62 = arith.constant 0 : index
    %189 = vector.load %arg12[%188, %c0_62] : memref<128x128xbf16, #tpu.memory_space<vmem>>, vector<16x128xbf16>
    tpu.vector_store %arg12[%188, %c0_62], %184 {strides = array<i32>} : memref<128x128xbf16, #tpu.memory_space<vmem>>, vector<16x128xbf16>,
    %c6_i32 = arith.constant 6 : i32
    %c16_i32_63 = arith.constant 16 : i32
    %190 = arith.muli %c6_i32, %c16_i32_63 : i32
    %191 = tpu.assume_multiple %190, 16 : i32
    %192 = arith.index_cast %191 : i32 to index
    %c0_64 = arith.constant 0 : index
    %193 = vector.load %arg11[%192, %c0_64] : memref<128x512xf32, #tpu.memory_space<vmem>>, vector<16x512xf32>
    %194 = arith.truncf %183 : vector<16x128xf32> to vector<16x128xbf16>
    %c0_65 = arith.constant 0 : index
    %c0_66 = arith.constant 0 : index
    %195 = vector.load %arg3[%c0_65, %c0_66] : memref<128x512xbf16, #tpu.memory_space<vmem>>, vector<128x512xbf16>
    %cst_67 = arith.constant dense<0.000000e+00> : vector<16x512xf32>
    %196 = tpu.matmul %194, %195, %cst_67 {dimension_numbers = #tpu.dot_dimension_numbers<[1], [0], [0], [1], [0, 0, 1, 1], [], []>} : vector<16x128xbf16>, vector<128x512xbf16>, vector<16x512xf32> -> vector<16x512xf32>
    %197 = arith.addf %193, %196 : vector<16x512xf32>
    %198 = vector.extract_strided_slice %197 {offsets = [0, 0], sizes = [16, 384], strides = [1, 1]} : vector<16x512xf32> to vector<16x384xf32>
    %199 = arith.negf %198 : vector<16x384xf32>
    %200 = math.exp %199 : vector<16x384xf32>
    %cst_68 = arith.constant 1.000000e+00 : f32
    %201 = vector.broadcast %cst_68 : f32 to vector<16x384xf32>
    %202 = arith.addf %201, %200 : vector<16x384xf32>
    %203 = arith.divf %201, %202 : vector<16x384xf32>
    %204 = vector.extract_strided_slice %203 {offsets = [0, 0], sizes = [16, 128], strides = [1, 1]} : vector<16x384xf32> to vector<16x128xf32>
    %205 = vector.extract_strided_slice %203 {offsets = [0, 128], sizes = [16, 128], strides = [1, 1]} : vector<16x384xf32> to vector<16x128xf32>
    %206 = vector.extract_strided_slice %203 {offsets = [0, 256], sizes = [16, 128], strides = [1, 1]} : vector<16x384xf32> to vector<16x128xf32>
    %207 = vector.extract_strided_slice %197 {offsets = [0, 384], sizes = [16, 128], strides = [1, 1]} : vector<16x512xf32> to vector<16x128xf32>
    %208 = math.tanh %207 : vector<16x128xf32>
    %209 = arith.mulf %205, %181 : vector<16x128xf32>
    %210 = arith.mulf %204, %208 : vector<16x128xf32>
    %211 = arith.addf %209, %210 : vector<16x128xf32>
    %212 = math.tanh %211 : vector<16x128xf32>
    %213 = arith.mulf %206, %212 : vector<16x128xf32>
    %214 = arith.truncf %213 : vector<16x128xf32> to vector<16x128xbf16>
    %c16_i32_69 = arith.constant 16 : i32
    %215 = arith.muli %c6_i32, %c16_i32_69 : i32
    %c0_i32_70 = arith.constant 0 : i32
    %216 = arith.addi %c0_i32_70, %215 : i32
    %217 = tpu.assume_multiple %216, 16 : i32
    %218 = arith.index_cast %217 : i32 to index
    %c0_71 = arith.constant 0 : index
    %219 = vector.load %arg12[%218, %c0_71] : memref<128x128xbf16, #tpu.memory_space<vmem>>, vector<16x128xbf16>
    tpu.vector_store %arg12[%218, %c0_71], %214 {strides = array<i32>} : memref<128x128xbf16, #tpu.memory_space<vmem>>, vector<16x128xbf16>,
    %c7_i32 = arith.constant 7 : i32
    %c16_i32_72 = arith.constant 16 : i32
    %220 = arith.muli %c7_i32, %c16_i32_72 : i32
    %221 = tpu.assume_multiple %220, 16 : i32
    %222 = arith.index_cast %221 : i32 to index
    %c0_73 = arith.constant 0 : index
    %223 = vector.load %arg11[%222, %c0_73] : memref<128x512xf32, #tpu.memory_space<vmem>>, vector<16x512xf32>
    %224 = arith.truncf %213 : vector<16x128xf32> to vector<16x128xbf16>
    %c0_74 = arith.constant 0 : index
    %c0_75 = arith.constant 0 : index
    %225 = vector.load %arg3[%c0_74, %c0_75] : memref<128x512xbf16, #tpu.memory_space<vmem>>, vector<128x512xbf16>
    %cst_76 = arith.constant dense<0.000000e+00> : vector<16x512xf32>
    %226 = tpu.matmul %224, %225, %cst_76 {dimension_numbers = #tpu.dot_dimension_numbers<[1], [0], [0], [1], [0, 0, 1, 1], [], []>} : vector<16x128xbf16>, vector<128x512xbf16>, vector<16x512xf32> -> vector<16x512xf32>
    %227 = arith.addf %223, %226 : vector<16x512xf32>
    %228 = vector.extract_strided_slice %227 {offsets = [0, 0], sizes = [16, 384], strides = [1, 1]} : vector<16x512xf32> to vector<16x384xf32>
    %229 = arith.negf %228 : vector<16x384xf32>
    %230 = math.exp %229 : vector<16x384xf32>
    %cst_77 = arith.constant 1.000000e+00 : f32
    %231 = vector.broadcast %cst_77 : f32 to vector<16x384xf32>
    %232 = arith.addf %231, %230 : vector<16x384xf32>
    %233 = arith.divf %231, %232 : vector<16x384xf32>
    %234 = vector.extract_strided_slice %233 {offsets = [0, 0], sizes = [16, 128], strides = [1, 1]} : vector<16x384xf32> to vector<16x128xf32>
    %235 = vector.extract_strided_slice %233 {offsets = [0, 128], sizes = [16, 128], strides = [1, 1]} : vector<16x384xf32> to vector<16x128xf32>
    %236 = vector.extract_strided_slice %233 {offsets = [0, 256], sizes = [16, 128], strides = [1, 1]} : vector<16x384xf32> to vector<16x128xf32>
    %237 = vector.extract_strided_slice %227 {offsets = [0, 384], sizes = [16, 128], strides = [1, 1]} : vector<16x512xf32> to vector<16x128xf32>
    %238 = math.tanh %237 : vector<16x128xf32>
    %239 = arith.mulf %235, %211 : vector<16x128xf32>
    %240 = arith.mulf %234, %238 : vector<16x128xf32>
    %241 = arith.addf %239, %240 : vector<16x128xf32>
    %242 = math.tanh %241 : vector<16x128xf32>
    %243 = arith.mulf %236, %242 : vector<16x128xf32>
    %244 = arith.truncf %243 : vector<16x128xf32> to vector<16x128xbf16>
    %c16_i32_78 = arith.constant 16 : i32
    %245 = arith.muli %c7_i32, %c16_i32_78 : i32
    %c0_i32_79 = arith.constant 0 : i32
    %246 = arith.addi %c0_i32_79, %245 : i32
    %247 = tpu.assume_multiple %246, 16 : i32
    %248 = arith.index_cast %247 : i32 to index
    %c0_80 = arith.constant 0 : index
    %249 = vector.load %arg12[%248, %c0_80] : memref<128x128xbf16, #tpu.memory_space<vmem>>, vector<16x128xbf16>
    tpu.vector_store %arg12[%248, %c0_80], %244 {strides = array<i32>} : memref<128x128xbf16, #tpu.memory_space<vmem>>, vector<16x128xbf16>,
    %c8_i32 = arith.constant 8 : i32
    %cst_81 = arith.constant 0.000000e+00 : f32
    %250 = vector.broadcast %cst_81 : f32 to vector<16x128xf32>
    %cst_82 = arith.constant 0.000000e+00 : f32
    %251 = vector.broadcast %cst_82 : f32 to vector<16x128xf32>
    %c0_83 = arith.constant 0 : index
    %c0_84 = arith.constant 0 : index
    %252 = vector.load %arg12[%c0_83, %c0_84] : memref<128x128xbf16, #tpu.memory_space<vmem>>, vector<128x128xbf16>
    %c0_85 = arith.constant 0 : index
    %c0_86 = arith.constant 0 : index
    %253 = vector.load %arg5[%c0_85, %c0_86] : memref<128x512xbf16, #tpu.memory_space<vmem>>, vector<128x512xbf16>
    %cst_87 = arith.constant dense<0.000000e+00> : vector<128x512xf32>
    %254 = tpu.matmul %252, %253, %cst_87 {dimension_numbers = #tpu.dot_dimension_numbers<[1], [0], [0], [1], [0, 0, 1, 1], [], []>} : vector<128x128xbf16>, vector<128x512xbf16>, vector<128x512xf32> -> vector<128x512xf32>
    %c0_88 = arith.constant 0 : index
    %c0_89 = arith.constant 0 : index
    %255 = vector.load %arg7[%c0_88, %c0_89] : memref<1x512xf32, #tpu.memory_space<vmem>>, vector<1x512xf32>
    %256 = vector.broadcast %255 : vector<1x512xf32> to vector<128x512xf32>
    %257 = arith.addf %254, %256 : vector<128x512xf32>
    %c0_90 = arith.constant 0 : index
    %c0_91 = arith.constant 0 : index
    %258 = vector.load %arg11[%c0_90, %c0_91] : memref<128x512xf32, #tpu.memory_space<vmem>>, vector<128x512xf32>
    tpu.vector_store %arg11[%c0_90, %c0_91], %257 {strides = array<i32>} : memref<128x512xf32, #tpu.memory_space<vmem>>, vector<128x512xf32>,
    %c0_i32_92 = arith.constant 0 : i32
    %c16_i32_93 = arith.constant 16 : i32
    %259 = arith.muli %c0_i32_92, %c16_i32_93 : i32
    %260 = tpu.assume_multiple %259, 16 : i32
    %261 = arith.index_cast %260 : i32 to index
    %c0_94 = arith.constant 0 : index
    %262 = vector.load %arg11[%261, %c0_94] : memref<128x512xf32, #tpu.memory_space<vmem>>, vector<16x512xf32>
    %263 = arith.truncf %250 : vector<16x128xf32> to vector<16x128xbf16>
    %c0_95 = arith.constant 0 : index
    %c0_96 = arith.constant 0 : index
    %264 = vector.load %arg6[%c0_95, %c0_96] : memref<128x512xbf16, #tpu.memory_space<vmem>>, vector<128x512xbf16>
    %cst_97 = arith.constant dense<0.000000e+00> : vector<16x512xf32>
    %265 = tpu.matmul %263, %264, %cst_97 {dimension_numbers = #tpu.dot_dimension_numbers<[1], [0], [0], [1], [0, 0, 1, 1], [], []>} : vector<16x128xbf16>, vector<128x512xbf16>, vector<16x512xf32> -> vector<16x512xf32>
    %266 = arith.addf %262, %265 : vector<16x512xf32>
    %267 = vector.extract_strided_slice %266 {offsets = [0, 0], sizes = [16, 384], strides = [1, 1]} : vector<16x512xf32> to vector<16x384xf32>
    %268 = arith.negf %267 : vector<16x384xf32>
    %269 = math.exp %268 : vector<16x384xf32>
    %cst_98 = arith.constant 1.000000e+00 : f32
    %270 = vector.broadcast %cst_98 : f32 to vector<16x384xf32>
    %271 = arith.addf %270, %269 : vector<16x384xf32>
    %272 = arith.divf %270, %271 : vector<16x384xf32>
    %273 = vector.extract_strided_slice %272 {offsets = [0, 0], sizes = [16, 128], strides = [1, 1]} : vector<16x384xf32> to vector<16x128xf32>
    %274 = vector.extract_strided_slice %272 {offsets = [0, 128], sizes = [16, 128], strides = [1, 1]} : vector<16x384xf32> to vector<16x128xf32>
    %275 = vector.extract_strided_slice %272 {offsets = [0, 256], sizes = [16, 128], strides = [1, 1]} : vector<16x384xf32> to vector<16x128xf32>
    %276 = vector.extract_strided_slice %266 {offsets = [0, 384], sizes = [16, 128], strides = [1, 1]} : vector<16x512xf32> to vector<16x128xf32>
    %277 = math.tanh %276 : vector<16x128xf32>
    %278 = arith.mulf %274, %251 : vector<16x128xf32>
    %279 = arith.mulf %273, %277 : vector<16x128xf32>
    %280 = arith.addf %278, %279 : vector<16x128xf32>
    %281 = math.tanh %280 : vector<16x128xf32>
    %282 = arith.mulf %275, %281 : vector<16x128xf32>
    %c1_i32_99 = arith.constant 1 : i32
    %c16_i32_100 = arith.constant 16 : i32
    %283 = arith.muli %c1_i32_99, %c16_i32_100 : i32
    %284 = tpu.assume_multiple %283, 16 : i32
    %285 = arith.index_cast %284 : i32 to index
    %c0_101 = arith.constant 0 : index
    %286 = vector.load %arg11[%285, %c0_101] : memref<128x512xf32, #tpu.memory_space<vmem>>, vector<16x512xf32>
    %287 = arith.truncf %282 : vector<16x128xf32> to vector<16x128xbf16>
    %c0_102 = arith.constant 0 : index
    %c0_103 = arith.constant 0 : index
    %288 = vector.load %arg6[%c0_102, %c0_103] : memref<128x512xbf16, #tpu.memory_space<vmem>>, vector<128x512xbf16>
    %cst_104 = arith.constant dense<0.000000e+00> : vector<16x512xf32>
    %289 = tpu.matmul %287, %288, %cst_104 {dimension_numbers = #tpu.dot_dimension_numbers<[1], [0], [0], [1], [0, 0, 1, 1], [], []>} : vector<16x128xbf16>, vector<128x512xbf16>, vector<16x512xf32> -> vector<16x512xf32>
    %290 = arith.addf %286, %289 : vector<16x512xf32>
    %291 = vector.extract_strided_slice %290 {offsets = [0, 0], sizes = [16, 384], strides = [1, 1]} : vector<16x512xf32> to vector<16x384xf32>
    %292 = arith.negf %291 : vector<16x384xf32>
    %293 = math.exp %292 : vector<16x384xf32>
    %cst_105 = arith.constant 1.000000e+00 : f32
    %294 = vector.broadcast %cst_105 : f32 to vector<16x384xf32>
    %295 = arith.addf %294, %293 : vector<16x384xf32>
    %296 = arith.divf %294, %295 : vector<16x384xf32>
    %297 = vector.extract_strided_slice %296 {offsets = [0, 0], sizes = [16, 128], strides = [1, 1]} : vector<16x384xf32> to vector<16x128xf32>
    %298 = vector.extract_strided_slice %296 {offsets = [0, 128], sizes = [16, 128], strides = [1, 1]} : vector<16x384xf32> to vector<16x128xf32>
    %299 = vector.extract_strided_slice %296 {offsets = [0, 256], sizes = [16, 128], strides = [1, 1]} : vector<16x384xf32> to vector<16x128xf32>
    %300 = vector.extract_strided_slice %290 {offsets = [0, 384], sizes = [16, 128], strides = [1, 1]} : vector<16x512xf32> to vector<16x128xf32>
    %301 = math.tanh %300 : vector<16x128xf32>
    %302 = arith.mulf %298, %280 : vector<16x128xf32>
    %303 = arith.mulf %297, %301 : vector<16x128xf32>
    %304 = arith.addf %302, %303 : vector<16x128xf32>
    %305 = math.tanh %304 : vector<16x128xf32>
    %306 = arith.mulf %299, %305 : vector<16x128xf32>
    %c2_i32_106 = arith.constant 2 : i32
    %c16_i32_107 = arith.constant 16 : i32
    %307 = arith.muli %c2_i32_106, %c16_i32_107 : i32
    %308 = tpu.assume_multiple %307, 16 : i32
    %309 = arith.index_cast %308 : i32 to index
    %c0_108 = arith.constant 0 : index
    %310 = vector.load %arg11[%309, %c0_108] : memref<128x512xf32, #tpu.memory_space<vmem>>, vector<16x512xf32>
    %311 = arith.truncf %306 : vector<16x128xf32> to vector<16x128xbf16>
    %c0_109 = arith.constant 0 : index
    %c0_110 = arith.constant 0 : index
    %312 = vector.load %arg6[%c0_109, %c0_110] : memref<128x512xbf16, #tpu.memory_space<vmem>>, vector<128x512xbf16>
    %cst_111 = arith.constant dense<0.000000e+00> : vector<16x512xf32>
    %313 = tpu.matmul %311, %312, %cst_111 {dimension_numbers = #tpu.dot_dimension_numbers<[1], [0], [0], [1], [0, 0, 1, 1], [], []>} : vector<16x128xbf16>, vector<128x512xbf16>, vector<16x512xf32> -> vector<16x512xf32>
    %314 = arith.addf %310, %313 : vector<16x512xf32>
    %315 = vector.extract_strided_slice %314 {offsets = [0, 0], sizes = [16, 384], strides = [1, 1]} : vector<16x512xf32> to vector<16x384xf32>
    %316 = arith.negf %315 : vector<16x384xf32>
    %317 = math.exp %316 : vector<16x384xf32>
    %cst_112 = arith.constant 1.000000e+00 : f32
    %318 = vector.broadcast %cst_112 : f32 to vector<16x384xf32>
    %319 = arith.addf %318, %317 : vector<16x384xf32>
    %320 = arith.divf %318, %319 : vector<16x384xf32>
    %321 = vector.extract_strided_slice %320 {offsets = [0, 0], sizes = [16, 128], strides = [1, 1]} : vector<16x384xf32> to vector<16x128xf32>
    %322 = vector.extract_strided_slice %320 {offsets = [0, 128], sizes = [16, 128], strides = [1, 1]} : vector<16x384xf32> to vector<16x128xf32>
    %323 = vector.extract_strided_slice %320 {offsets = [0, 256], sizes = [16, 128], strides = [1, 1]} : vector<16x384xf32> to vector<16x128xf32>
    %324 = vector.extract_strided_slice %314 {offsets = [0, 384], sizes = [16, 128], strides = [1, 1]} : vector<16x512xf32> to vector<16x128xf32>
    %325 = math.tanh %324 : vector<16x128xf32>
    %326 = arith.mulf %322, %304 : vector<16x128xf32>
    %327 = arith.mulf %321, %325 : vector<16x128xf32>
    %328 = arith.addf %326, %327 : vector<16x128xf32>
    %329 = math.tanh %328 : vector<16x128xf32>
    %330 = arith.mulf %323, %329 : vector<16x128xf32>
    %c3_i32_113 = arith.constant 3 : i32
    %c16_i32_114 = arith.constant 16 : i32
    %331 = arith.muli %c3_i32_113, %c16_i32_114 : i32
    %332 = tpu.assume_multiple %331, 16 : i32
    %333 = arith.index_cast %332 : i32 to index
    %c0_115 = arith.constant 0 : index
    %334 = vector.load %arg11[%333, %c0_115] : memref<128x512xf32, #tpu.memory_space<vmem>>, vector<16x512xf32>
    %335 = arith.truncf %330 : vector<16x128xf32> to vector<16x128xbf16>
    %c0_116 = arith.constant 0 : index
    %c0_117 = arith.constant 0 : index
    %336 = vector.load %arg6[%c0_116, %c0_117] : memref<128x512xbf16, #tpu.memory_space<vmem>>, vector<128x512xbf16>
    %cst_118 = arith.constant dense<0.000000e+00> : vector<16x512xf32>
    %337 = tpu.matmul %335, %336, %cst_118 {dimension_numbers = #tpu.dot_dimension_numbers<[1], [0], [0], [1], [0, 0, 1, 1], [], []>} : vector<16x128xbf16>, vector<128x512xbf16>, vector<16x512xf32> -> vector<16x512xf32>
    %338 = arith.addf %334, %337 : vector<16x512xf32>
    %339 = vector.extract_strided_slice %338 {offsets = [0, 0], sizes = [16, 384], strides = [1, 1]} : vector<16x512xf32> to vector<16x384xf32>
    %340 = arith.negf %339 : vector<16x384xf32>
    %341 = math.exp %340 : vector<16x384xf32>
    %cst_119 = arith.constant 1.000000e+00 : f32
    %342 = vector.broadcast %cst_119 : f32 to vector<16x384xf32>
    %343 = arith.addf %342, %341 : vector<16x384xf32>
    %344 = arith.divf %342, %343 : vector<16x384xf32>
    %345 = vector.extract_strided_slice %344 {offsets = [0, 0], sizes = [16, 128], strides = [1, 1]} : vector<16x384xf32> to vector<16x128xf32>
    %346 = vector.extract_strided_slice %344 {offsets = [0, 128], sizes = [16, 128], strides = [1, 1]} : vector<16x384xf32> to vector<16x128xf32>
    %347 = vector.extract_strided_slice %344 {offsets = [0, 256], sizes = [16, 128], strides = [1, 1]} : vector<16x384xf32> to vector<16x128xf32>
    %348 = vector.extract_strided_slice %338 {offsets = [0, 384], sizes = [16, 128], strides = [1, 1]} : vector<16x512xf32> to vector<16x128xf32>
    %349 = math.tanh %348 : vector<16x128xf32>
    %350 = arith.mulf %346, %328 : vector<16x128xf32>
    %351 = arith.mulf %345, %349 : vector<16x128xf32>
    %352 = arith.addf %350, %351 : vector<16x128xf32>
    %353 = math.tanh %352 : vector<16x128xf32>
    %354 = arith.mulf %347, %353 : vector<16x128xf32>
    %c4_i32_120 = arith.constant 4 : i32
    %c16_i32_121 = arith.constant 16 : i32
    %355 = arith.muli %c4_i32_120, %c16_i32_121 : i32
    %356 = tpu.assume_multiple %355, 16 : i32
    %357 = arith.index_cast %356 : i32 to index
    %c0_122 = arith.constant 0 : index
    %358 = vector.load %arg11[%357, %c0_122] : memref<128x512xf32, #tpu.memory_space<vmem>>, vector<16x512xf32>
    %359 = arith.truncf %354 : vector<16x128xf32> to vector<16x128xbf16>
    %c0_123 = arith.constant 0 : index
    %c0_124 = arith.constant 0 : index
    %360 = vector.load %arg6[%c0_123, %c0_124] : memref<128x512xbf16, #tpu.memory_space<vmem>>, vector<128x512xbf16>
    %cst_125 = arith.constant dense<0.000000e+00> : vector<16x512xf32>
    %361 = tpu.matmul %359, %360, %cst_125 {dimension_numbers = #tpu.dot_dimension_numbers<[1], [0], [0], [1], [0, 0, 1, 1], [], []>} : vector<16x128xbf16>, vector<128x512xbf16>, vector<16x512xf32> -> vector<16x512xf32>
    %362 = arith.addf %358, %361 : vector<16x512xf32>
    %363 = vector.extract_strided_slice %362 {offsets = [0, 0], sizes = [16, 384], strides = [1, 1]} : vector<16x512xf32> to vector<16x384xf32>
    %364 = arith.negf %363 : vector<16x384xf32>
    %365 = math.exp %364 : vector<16x384xf32>
    %cst_126 = arith.constant 1.000000e+00 : f32
    %366 = vector.broadcast %cst_126 : f32 to vector<16x384xf32>
    %367 = arith.addf %366, %365 : vector<16x384xf32>
    %368 = arith.divf %366, %367 : vector<16x384xf32>
    %369 = vector.extract_strided_slice %368 {offsets = [0, 0], sizes = [16, 128], strides = [1, 1]} : vector<16x384xf32> to vector<16x128xf32>
    %370 = vector.extract_strided_slice %368 {offsets = [0, 128], sizes = [16, 128], strides = [1, 1]} : vector<16x384xf32> to vector<16x128xf32>
    %371 = vector.extract_strided_slice %368 {offsets = [0, 256], sizes = [16, 128], strides = [1, 1]} : vector<16x384xf32> to vector<16x128xf32>
    %372 = vector.extract_strided_slice %362 {offsets = [0, 384], sizes = [16, 128], strides = [1, 1]} : vector<16x512xf32> to vector<16x128xf32>
    %373 = math.tanh %372 : vector<16x128xf32>
    %374 = arith.mulf %370, %352 : vector<16x128xf32>
    %375 = arith.mulf %369, %373 : vector<16x128xf32>
    %376 = arith.addf %374, %375 : vector<16x128xf32>
    %377 = math.tanh %376 : vector<16x128xf32>
    %378 = arith.mulf %371, %377 : vector<16x128xf32>
    %c5_i32_127 = arith.constant 5 : i32
    %c16_i32_128 = arith.constant 16 : i32
    %379 = arith.muli %c5_i32_127, %c16_i32_128 : i32
    %380 = tpu.assume_multiple %379, 16 : i32
    %381 = arith.index_cast %380 : i32 to index
    %c0_129 = arith.constant 0 : index
    %382 = vector.load %arg11[%381, %c0_129] : memref<128x512xf32, #tpu.memory_space<vmem>>, vector<16x512xf32>
    %383 = arith.truncf %378 : vector<16x128xf32> to vector<16x128xbf16>
    %c0_130 = arith.constant 0 : index
    %c0_131 = arith.constant 0 : index
    %384 = vector.load %arg6[%c0_130, %c0_131] : memref<128x512xbf16, #tpu.memory_space<vmem>>, vector<128x512xbf16>
    %cst_132 = arith.constant dense<0.000000e+00> : vector<16x512xf32>
    %385 = tpu.matmul %383, %384, %cst_132 {dimension_numbers = #tpu.dot_dimension_numbers<[1], [0], [0], [1], [0, 0, 1, 1], [], []>} : vector<16x128xbf16>, vector<128x512xbf16>, vector<16x512xf32> -> vector<16x512xf32>
    %386 = arith.addf %382, %385 : vector<16x512xf32>
    %387 = vector.extract_strided_slice %386 {offsets = [0, 0], sizes = [16, 384], strides = [1, 1]} : vector<16x512xf32> to vector<16x384xf32>
    %388 = arith.negf %387 : vector<16x384xf32>
    %389 = math.exp %388 : vector<16x384xf32>
    %cst_133 = arith.constant 1.000000e+00 : f32
    %390 = vector.broadcast %cst_133 : f32 to vector<16x384xf32>
    %391 = arith.addf %390, %389 : vector<16x384xf32>
    %392 = arith.divf %390, %391 : vector<16x384xf32>
    %393 = vector.extract_strided_slice %392 {offsets = [0, 0], sizes = [16, 128], strides = [1, 1]} : vector<16x384xf32> to vector<16x128xf32>
    %394 = vector.extract_strided_slice %392 {offsets = [0, 128], sizes = [16, 128], strides = [1, 1]} : vector<16x384xf32> to vector<16x128xf32>
    %395 = vector.extract_strided_slice %392 {offsets = [0, 256], sizes = [16, 128], strides = [1, 1]} : vector<16x384xf32> to vector<16x128xf32>
    %396 = vector.extract_strided_slice %386 {offsets = [0, 384], sizes = [16, 128], strides = [1, 1]} : vector<16x512xf32> to vector<16x128xf32>
    %397 = math.tanh %396 : vector<16x128xf32>
    %398 = arith.mulf %394, %376 : vector<16x128xf32>
    %399 = arith.mulf %393, %397 : vector<16x128xf32>
    %400 = arith.addf %398, %399 : vector<16x128xf32>
    %401 = math.tanh %400 : vector<16x128xf32>
    %402 = arith.mulf %395, %401 : vector<16x128xf32>
    %c6_i32_134 = arith.constant 6 : i32
    %c16_i32_135 = arith.constant 16 : i32
    %403 = arith.muli %c6_i32_134, %c16_i32_135 : i32
    %404 = tpu.assume_multiple %403, 16 : i32
    %405 = arith.index_cast %404 : i32 to index
    %c0_136 = arith.constant 0 : index
    %406 = vector.load %arg11[%405, %c0_136] : memref<128x512xf32, #tpu.memory_space<vmem>>, vector<16x512xf32>
    %407 = arith.truncf %402 : vector<16x128xf32> to vector<16x128xbf16>
    %c0_137 = arith.constant 0 : index
    %c0_138 = arith.constant 0 : index
    %408 = vector.load %arg6[%c0_137, %c0_138] : memref<128x512xbf16, #tpu.memory_space<vmem>>, vector<128x512xbf16>
    %cst_139 = arith.constant dense<0.000000e+00> : vector<16x512xf32>
    %409 = tpu.matmul %407, %408, %cst_139 {dimension_numbers = #tpu.dot_dimension_numbers<[1], [0], [0], [1], [0, 0, 1, 1], [], []>} : vector<16x128xbf16>, vector<128x512xbf16>, vector<16x512xf32> -> vector<16x512xf32>
    %410 = arith.addf %406, %409 : vector<16x512xf32>
    %411 = vector.extract_strided_slice %410 {offsets = [0, 0], sizes = [16, 384], strides = [1, 1]} : vector<16x512xf32> to vector<16x384xf32>
    %412 = arith.negf %411 : vector<16x384xf32>
    %413 = math.exp %412 : vector<16x384xf32>
    %cst_140 = arith.constant 1.000000e+00 : f32
    %414 = vector.broadcast %cst_140 : f32 to vector<16x384xf32>
    %415 = arith.addf %414, %413 : vector<16x384xf32>
    %416 = arith.divf %414, %415 : vector<16x384xf32>
    %417 = vector.extract_strided_slice %416 {offsets = [0, 0], sizes = [16, 128], strides = [1, 1]} : vector<16x384xf32> to vector<16x128xf32>
    %418 = vector.extract_strided_slice %416 {offsets = [0, 128], sizes = [16, 128], strides = [1, 1]} : vector<16x384xf32> to vector<16x128xf32>
    %419 = vector.extract_strided_slice %416 {offsets = [0, 256], sizes = [16, 128], strides = [1, 1]} : vector<16x384xf32> to vector<16x128xf32>
    %420 = vector.extract_strided_slice %410 {offsets = [0, 384], sizes = [16, 128], strides = [1, 1]} : vector<16x512xf32> to vector<16x128xf32>
    %421 = math.tanh %420 : vector<16x128xf32>
    %422 = arith.mulf %418, %400 : vector<16x128xf32>
    %423 = arith.mulf %417, %421 : vector<16x128xf32>
    %424 = arith.addf %422, %423 : vector<16x128xf32>
    %425 = math.tanh %424 : vector<16x128xf32>
    %426 = arith.mulf %419, %425 : vector<16x128xf32>
    %c7_i32_141 = arith.constant 7 : i32
    %c16_i32_142 = arith.constant 16 : i32
    %427 = arith.muli %c7_i32_141, %c16_i32_142 : i32
    %428 = tpu.assume_multiple %427, 16 : i32
    %429 = arith.index_cast %428 : i32 to index
    %c0_143 = arith.constant 0 : index
    %430 = vector.load %arg11[%429, %c0_143] : memref<128x512xf32, #tpu.memory_space<vmem>>, vector<16x512xf32>
    %431 = arith.truncf %426 : vector<16x128xf32> to vector<16x128xbf16>
    %c0_144 = arith.constant 0 : index
    %c0_145 = arith.constant 0 : index
    %432 = vector.load %arg6[%c0_144, %c0_145] : memref<128x512xbf16, #tpu.memory_space<vmem>>, vector<128x512xbf16>
    %cst_146 = arith.constant dense<0.000000e+00> : vector<16x512xf32>
    %433 = tpu.matmul %431, %432, %cst_146 {dimension_numbers = #tpu.dot_dimension_numbers<[1], [0], [0], [1], [0, 0, 1, 1], [], []>} : vector<16x128xbf16>, vector<128x512xbf16>, vector<16x512xf32> -> vector<16x512xf32>
    %434 = arith.addf %430, %433 : vector<16x512xf32>
    %435 = vector.extract_strided_slice %434 {offsets = [0, 0], sizes = [16, 384], strides = [1, 1]} : vector<16x512xf32> to vector<16x384xf32>
    %436 = arith.negf %435 : vector<16x384xf32>
    %437 = math.exp %436 : vector<16x384xf32>
    %cst_147 = arith.constant 1.000000e+00 : f32
    %438 = vector.broadcast %cst_147 : f32 to vector<16x384xf32>
    %439 = arith.addf %438, %437 : vector<16x384xf32>
    %440 = arith.divf %438, %439 : vector<16x384xf32>
    %441 = vector.extract_strided_slice %440 {offsets = [0, 0], sizes = [16, 128], strides = [1, 1]} : vector<16x384xf32> to vector<16x128xf32>
    %442 = vector.extract_strided_slice %440 {offsets = [0, 128], sizes = [16, 128], strides = [1, 1]} : vector<16x384xf32> to vector<16x128xf32>
    %443 = vector.extract_strided_slice %440 {offsets = [0, 256], sizes = [16, 128], strides = [1, 1]} : vector<16x384xf32> to vector<16x128xf32>
    %444 = vector.extract_strided_slice %434 {offsets = [0, 384], sizes = [16, 128], strides = [1, 1]} : vector<16x512xf32> to vector<16x128xf32>
    %445 = math.tanh %444 : vector<16x128xf32>
    %446 = arith.mulf %442, %424 : vector<16x128xf32>
    %447 = arith.mulf %441, %445 : vector<16x128xf32>
    %448 = arith.addf %446, %447 : vector<16x128xf32>
    %449 = math.tanh %448 : vector<16x128xf32>
    %450 = arith.mulf %443, %449 : vector<16x128xf32>
    %c8_i32_148 = arith.constant 8 : i32
    %451 = arith.truncf %450 : vector<16x128xf32> to vector<16x128xbf16>
    %c0_149 = arith.constant 0 : index
    %c0_150 = arith.constant 0 : index
    %452 = vector.load %arg8[%c0_149, %c0_150] : memref<128x128xbf16, #tpu.memory_space<vmem>>, vector<128x128xbf16>
    %cst_151 = arith.constant dense<0.000000e+00> : vector<16x128xf32>
    %453 = tpu.matmul %451, %452, %cst_151 {dimension_numbers = #tpu.dot_dimension_numbers<[1], [0], [0], [1], [0, 0, 1, 1], [], []>} : vector<16x128xbf16>, vector<128x128xbf16>, vector<16x128xf32> -> vector<16x128xf32>
    %c0_152 = arith.constant 0 : index
    %c0_153 = arith.constant 0 : index
    %454 = vector.load %arg9[%c0_152, %c0_153] : memref<1x128xf32, #tpu.memory_space<vmem>>, vector<1x128xf32>
    %455 = vector.broadcast %454 : vector<1x128xf32> to vector<16x128xf32>
    %456 = arith.addf %453, %455 : vector<16x128xf32>
    %c0_154 = arith.constant 0 : index
    %c0_155 = arith.constant 0 : index
    %457 = vector.load %arg10[%c0_154, %c0_155] : memref<16x128xf32, #tpu.memory_space<vmem>>, vector<16x128xf32>
    tpu.vector_store %arg10[%c0_154, %c0_155], %456 {strides = array<i32>} : memref<16x128xf32, #tpu.memory_space<vmem>>, vector<16x128xf32>,
    return
  }
  func.func @transform_0(%arg0: i32) -> (i32, i32, i32) {
    %c0_i32 = arith.constant 0 : i32
    %c0_i32_0 = arith.constant 0 : i32
    %c0_i32_1 = arith.constant 0 : i32
    return %arg0, %c0_i32, %c0_i32_0 : i32, i32, i32
  }
  func.func @transform_1(%arg0: i32) -> (i32, i32) {
    %c0_i32 = arith.constant 0 : i32
    %c0_i32_0 = arith.constant 0 : i32
    %c0_i32_1 = arith.constant 0 : i32
    return %c0_i32, %c0_i32_0 : i32, i32
  }
  func.func @transform_2(%arg0: i32) -> (i32, i32) {
    %c0_i32 = arith.constant 0 : i32
    %c0_i32_0 = arith.constant 0 : i32
    %c0_i32_1 = arith.constant 0 : i32
    return %c0_i32, %c0_i32_0 : i32, i32
  }
  func.func @transform_3(%arg0: i32) -> (i32, i32) {
    %c0_i32 = arith.constant 0 : i32
    %c0_i32_0 = arith.constant 0 : i32
    %c0_i32_1 = arith.constant 0 : i32
    return %c0_i32, %c0_i32_0 : i32, i32
  }
  func.func @transform_4(%arg0: i32) -> (i32, i32) {
    %c0_i32 = arith.constant 0 : i32
    %c0_i32_0 = arith.constant 0 : i32
    %c0_i32_1 = arith.constant 0 : i32
    return %c0_i32, %c0_i32_0 : i32, i32
  }
  func.func @transform_5(%arg0: i32) -> (i32, i32) {
    %c0_i32 = arith.constant 0 : i32
    %c0_i32_0 = arith.constant 0 : i32
    %c0_i32_1 = arith.constant 0 : i32
    return %c0_i32, %c0_i32_0 : i32, i32
  }
  func.func @transform_6(%arg0: i32) -> (i32, i32) {
    %c0_i32 = arith.constant 0 : i32
    %c0_i32_0 = arith.constant 0 : i32
    %c0_i32_1 = arith.constant 0 : i32
    return %c0_i32, %c0_i32_0 : i32, i32
  }
  func.func @transform_7(%arg0: i32) -> (i32, i32) {
    %c0_i32 = arith.constant 0 : i32
    %c0_i32_0 = arith.constant 0 : i32
    %c0_i32_1 = arith.constant 0 : i32
    return %c0_i32, %c0_i32_0 : i32, i32
  }
  func.func @transform_8(%arg0: i32) -> (i32, i32) {
    %c0_i32 = arith.constant 0 : i32
    %c0_i32_0 = arith.constant 0 : i32
    %c0_i32_1 = arith.constant 0 : i32
    return %c0_i32, %c0_i32_0 : i32, i32
  }
  func.func @transform_9(%arg0: i32) -> (i32, i32) {
    %c0_i32 = arith.constant 0 : i32
    %c0_i32_0 = arith.constant 0 : i32
    return %arg0, %c0_i32 : i32, i32
  }
}

</mosaic_0001>

<bundles_post_ra>
// kernel: lstm_classifier_forward.1
= control target key start
LH: loop header
LB: loop body
LE: loop exit
PB: predicated region body
PF: predicated region fallthrough
CT: control target
= control target key end

     0   :  { %s7314_s30 = smov 0   ;;  %s9111_s0 = inlined_call_operand.vmem [shape: bf16[2,128,64], index: 0, kind: input, shape index: {}]   ;;  %s9112_s1 = inlined_call_operand.vmem [shape: bf16[64,512], index: 1, kind: input, shape index: {}]   ;;  %s9113_s2 = inlined_call_operand.vmem [shape: bf16[128,512], index: 2, kind: input, shape index: {}]   ;;  %s9114_s3 = inlined_call_operand.vmem [shape: f32[1,512], index: 3, kind: input, shape index: {}]   ;;  %s9115_s4 = inlined_call_operand.vmem [shape: bf16[128,512], index: 4, kind: input, shape index: {}]   ;;  %s9116_s5 = inlined_call_operand.vmem [shape: bf16[128,512], index: 5, kind: input, shape index: {}]   ;;  %s9117_s6 = inlined_call_operand.vmem [shape: f32[1,512], index: 6, kind: input, shape index: {}]   ;;  %s9118_s7 = inlined_call_operand.vmem [shape: bf16[128,128], index: 7, kind: input, shape index: {}]   ;;  %s9119_s8 = inlined_call_operand.vmem [shape: f32[1,128], index: 8, kind: input, shape index: {}]   ;;  %s9120_s9 = inlined_call_operand.vmem [shape: f32[32,128], index: 9, kind: output, shape index: {}]  }
   0x1 LB: > { %s7320_s10 = sadd.s32 4294967295, %s7259_s30   ;;  %p5700_p0 = scmp.ge.s32.totalorder %s7259_s30, 1  ;;  %s7259_s30 = sphi %s7314_s30, %s19_s30  }
   0x2   : > { %p287_p1 = scmp.lt.s32.totalorder %s7259_s30, 3 }
   0x4   : > { %p288_p2 = pnand %p5700_p0, %p287_p1 }
   0x6   : > { %291 = sbr.rel (%p288_p2) target bundleno = 4528 (0x11b0), region = 56 }
   0xd   : > { %v6477_v0 = vld [vmem:[%s9112_s1 + $0x4] ss:$16 sps:$4 sm:$0xff]   ;;  %p323_p3 = scmp.lt.s32.totalorder %s7320_s10, 1  ;;  %v6479_v1 = vld [vmem:[%s9112_s1] ss:$16 sps:$4 sm:$0xff]   ;;  %v9125_v2 = vmov 0  }
   0xe   : > { %566 = vmatprep.mubr.bf16.mxu0 %v9125_v2  ;;  %626 = vmatprep.mubr.bf16.mxu1 %v9125_v2  ;;  %v6480_v3 = vld [vmem:[%s9112_s1 + $0x24] ss:$16 sps:$4 sm:$0xff]   ;;  %v6482_v4 = vld [vmem:[%s9112_s1 + $0x20] ss:$16 sps:$4 sm:$0xff]   ;;  %v6493_v9 = vld [vmem:[%s9112_s1 + $0xc] ss:$16 sps:$4 sm:$0xff]  }
   0xf   : > { %534 = vmatprep.subr.bf16.mxu0 %v6477_v0  ;;  %6202 = vmatprep.subr.bf16.mxu1 %v6477_v0  ;;  %s324_s17 = scalar_select %p323_p3, %s7320_s10, 1  ;;  %v6483_v5 = vld [vmem:[%s9112_s1 + $0x44] ss:$16 sps:$4 sm:$0xff]   ;;  %v6485_v6 = vld [vmem:[%s9112_s1 + $0x40] ss:$16 sps:$4 sm:$0xff]   ;;  %vm509_vm0 = vcmask 523264  }
  0x10   : > { %535 = vmatpush1.bf16.msra.mxu0 %v6479_v1  ;;  %6206 = vmatpush1.bf16.msra.mxu1 %v6479_v1  ;;  %v6486_v7 = vld [vmem:[%s9112_s1 + $0x64] ss:$16 sps:$4 sm:$0xff]   ;;  %v6488_v8 = vld [vmem:[%s9112_s1 + $0x60] ss:$16 sps:$4 sm:$0xff]   ;;  %v6491_v12 = vld [vmem:[%s9112_s1 + $0x8] ss:$16 sps:$4 sm:$0xff]   ;;  %v369_v1 = vlaneseq }
  0x11   : > { %536 = vmatprep.subr.bf16.mxu0 %v6480_v3  ;;  %6203 = vmatprep.subr.bf16.mxu1 %v6480_v3  ;;  %s6172_s22 = sshll.u32 %s324_s17, 6  ;;  %v6496_v13 = vld [vmem:[%s9112_s1 + $0x2c] ss:$16 sps:$4 sm:$0xff]   ;;  %v7373_v14 = vld [vmem:[%s9113_s2 + $0x4] ss:$16 sps:$4 sm:$0xff]   ;;  %vm7263_vm1 = vmmov 0  }
  0x12   : > { %s7346_s25 = scalar_lea.vmem %s9111_s0, %s6172_s22  ;;  %v7381_v15 = vld [vmem:[%s9113_s2] ss:$16 sps:$4 sm:$0xff]   ;;  %v6494_v16 = vld [vmem:[%s9112_s1 + $0x28] ss:$16 sps:$4 sm:$0xff]   ;;  %v7390_v17 = vld [vmem:[%s9113_s2 + $0x24] ss:$16 sps:$4 sm:$0xff]  }
  0x13   : > { %v6489_v10 = vld [vmem:[%s7346_s25] sm:$0xff]   ;;  %v7362_v11 = vld [vmem:[%s7346_s25 + $0x30] sm:$0xff]   ;;  %v6501_v18 = vld [vmem:[%s9112_s1 + $0x4c] ss:$16 sps:$4 sm:$0xff]   ;;  %v7675_v3 = vshrl.u32 %v369_v1, 7  ;;  %s5703_s12 = sshll.u32 %s7320_s10, 1 }
  0x14   : > { %537 = vmatpush1.bf16.msra.mxu0 %v6482_v4  ;;  %6207 = vmatpush1.bf16.msra.mxu1 %v6482_v4  ;;  %v6497_v19 = vld [vmem:[%s7346_s25 + $0x8] sm:$0xff]   ;;  %v7399_v20 = vld [vmem:[%s7346_s25 + $0x38] sm:$0xff]   ;;  %v7412_v23 = vld [vmem:[%s9113_s2 + $0x20] ss:$16 sps:$4 sm:$0xff]   ;;  %p329_p4 = scmp.lt.s32.totalorder %s5703_s12, 3 }
  0x15   : > { %538 = vmatprep.subr.bf16.mxu0 %v6483_v5  ;;  %6204 = vmatprep.subr.bf16.mxu1 %v6483_v5  ;;  %v6499_v21 = vld [vmem:[%s9112_s1 + $0x48] ss:$16 sps:$4 sm:$0xff]   ;;  %v6504_v22 = vld [vmem:[%s9112_s1 + $0x6c] ss:$16 sps:$4 sm:$0xff]   ;;  %v7420_v24 = vld [vmem:[%s9113_s2 + $0x44] ss:$16 sps:$4 sm:$0xff]  }
  0x16   : > { %v6502_v25 = vld [vmem:[%s9112_s1 + $0x68] ss:$16 sps:$4 sm:$0xff]   ;;  %v7430_v26 = vld [vmem:[%s9113_s2 + $0xc] ss:$16 sps:$4 sm:$0xff]   ;;  %v7436_v27 = vld [vmem:[%s9113_s2 + $0x40] ss:$16 sps:$4 sm:$0xff]  }
  0x17   : > { %v6505_v28 = vld [vmem:[%s7346_s25 + $0x10] sm:$0xff]   ;;  %v7443_v29 = vld [vmem:[%s9113_s2 + $0x8] ss:$16 sps:$4 sm:$0xff]   ;;  %v7449_v30 = vld [vmem:[%s9113_s2 + $0x2c] ss:$16 sps:$4 sm:$0xff]   ;;  %9137 = vst [vmem:[#allocation8_spill] sm:$0xff] %v7675_v3 }
  0x18   : > { %539 = vmatpush1.bf16.msra.mxu0 %v6485_v6  ;;  %6208 = vmatpush1.bf16.msra.mxu1 %v6485_v6  ;;  %v7455_v31 = vld [vmem:[%s9113_s2 + $0x64] ss:$16 sps:$4 sm:$0xff]   ;;  %v7462_v32 = vld [vmem:[%s9113_s2 + $0x60] ss:$16 sps:$4 sm:$0xff]   ;;  %v7469_v33 = vld [vmem:[%s9113_s2 + $0x28] ss:$16 sps:$4 sm:$0xff]  }
  0x19   : > { %540 = vmatprep.subr.bf16.mxu0 %v6486_v7  ;;  %6205 = vmatprep.subr.bf16.mxu1 %v6486_v7  ;;  %v7474_v34 = vld [vmem:[%s9113_s2 + $0x84] ss:$16 sps:$4 sm:$0xff]   ;;  %v7481_v35 = vld [vmem:[%s9113_s2 + $0x4c] ss:$16 sps:$4 sm:$0xff]   ;;  %v7489_v37 = vld [vmem:[%s9113_s2 + $0x80] ss:$16 sps:$4 sm:$0xff]  }
  0x1a   : > { %v6515_v36 = vld [vmem:[%s7346_s25 + $0x18] sm:$0xff]   ;;  %v7501_v39 = vld [vmem:[%s9113_s2 + $0xa4] ss:$16 sps:$4 sm:$0xff]   ;;  %v7514_v41 = vld [vmem:[%s9113_s2 + $0xa0] ss:$16 sps:$4 sm:$0xff]   ;;  %v9124_v5 = vsub.s32 0, %v7675_v3 }
  0x1b   : > { %v7496_v38 = vld [vmem:[%s9113_s2 + $0x48] ss:$16 sps:$4 sm:$0xff]   ;;  %v7507_v40 = vld [vmem:[%s9113_s2 + $0x6c] ss:$16 sps:$4 sm:$0xff]   ;;  %v7526_v43 = vld [vmem:[%s9113_s2 + $0xc4] ss:$16 sps:$4 sm:$0xff]  }
  0x1c   : > { %541 = vmatpush1.bf16.msra.mxu0 %v6488_v8  ;;  %6209 = vmatpush1.bf16.msra.mxu1 %v6488_v8  ;;  %v7519_v42 = vld [vmem:[%s9113_s2 + $0x68] ss:$16 sps:$4 sm:$0xff]   ;;  %v7531_v44 = vld [vmem:[%s9113_s2 + $0x8c] ss:$16 sps:$4 sm:$0xff]   ;;  %v6525_v45 = vld [vmem:[%s7346_s25 + $0x20] sm:$0xff]   ;;  %v9123_v8 = vsub.s32 1, %v7675_v3 }
  0x1d   : > { %647 = vmatprep.subr.bf16.mxu1 %v6493_v9  ;;  %1027 = vmatprep.subr.bf16.mxu0 %v7373_v14  ;;  %v7541_v46 = vld [vmem:[%s9113_s2 + $0xc0] ss:$16 sps:$4 sm:$0xff]   ;;  %v7546_v47 = vld [vmem:[%s9113_s2 + $0x88] ss:$16 sps:$4 sm:$0xff]   ;;  %v7551_v48 = vld [vmem:[%s9113_s2 + $0xe4] ss:$16 sps:$4 sm:$0xff]  }
  0x1e   : > { %v7556_v49 = vld [vmem:[%s9113_s2 + $0xac] ss:$16 sps:$4 sm:$0xff]   ;;  %v7567_v50 = vld [vmem:[%s9113_s2 + $0xe0] ss:$16 sps:$4 sm:$0xff]   ;;  %v7572_v51 = vld [vmem:[%s9113_s2 + $0xa8] ss:$16 sps:$4 sm:$0xff]  }
  0x1f   : > { %5729 = vmatmul.mubr.msk.bf16.vlgmr.msra.gmra.mrb[0].mxu0 %vm509_vm0, %v6489_v10  ;;  %5735 = vmatmul.mubr.msk.bf16.vlgmr.msra.gmra.mrb[0].mxu1 %vm509_vm0, %v7362_v11  ;;  %v7579_v52 = vld [vmem:[%s9113_s2 + $0xcc] ss:$16 sps:$4 sm:$0xff]   ;;  %v7589_v54 = vld [vmem:[%s9113_s2 + $0xc8] ss:$16 sps:$4 sm:$0xff]   ;;  %v367_v7 = vld [vmem:[%s9114_s3] sm:$0xf] }
  0x20   : > { %648 = vmatpush1.bf16.msra.mxu1 %v6491_v12  ;;  %576 = vmatprep.mubr.bf16.mxu0 %v9125_v2  ;;  %v6535_v53 = vld [vmem:[%s7346_s25 + $0x28] sm:$0xff]   ;;  %v7688_v12 = vrot.slane %v367_v7, %v9123_v8  ;;  %s9153_s12 = smov (!%p329_p4, %s5703_s12), 3 }
  0x21   : > { %649 = vmatprep.subr.bf16.mxu1 %v6496_v13  ;;  %636 = vmatprep.mubr.bf16.mxu1 %v9125_v2  ;;  %v7594_v55 = vld [vmem:[%s9113_s2 + $0xec] ss:$16 sps:$4 sm:$0xff]   ;;  %v7605_v56 = vld [vmem:[%s9113_s2 + $0xe8] ss:$16 sps:$4 sm:$0xff]   ;;  %s5704_s13 = sshll.u32 %s9153_s12, 3 }
  0x22   : > { %1028 = vmatpush1.bf16.msra.mxu0 %v7381_v15  ;;  %s332_s18 = scalar_lea.vmem %s9120_s9, %s5704_s13 }
  0x23   : > { %1029 = vmatprep.subr.bf16.mxu0 %v7390_v17 }
  0x24   : > { %650 = vmatpush1.bf16.msra.mxu1 %v6494_v16 }
  0x25   : > { %651 = vmatprep.subr.bf16.mxu1 %v6501_v18 }
  0x26   : > { %1030 = vmatpush1.bf16.msra.mxu0 %v7412_v23 }
  0x27   : > { %5730 = vmatmul.mubr.msk.bf16.gmra.mrb[4].mxu0 %vm509_vm0, %v6497_v19  ;;  %5736 = vmatmul.mubr.msk.bf16.gmra.mrb[4].mxu1 %vm509_vm0, %v7399_v20 }
  0x28   : > { %652 = vmatpush1.bf16.msra.mxu1 %v6499_v21  ;;  %586 = vmatprep.mubr.bf16.mxu0 %v9125_v2 }
  0x29   : > { %653 = vmatprep.subr.bf16.mxu1 %v6504_v22  ;;  %679 = vmatprep.mubr.bf16.mxu1 %v9125_v2 }
  0x2a   : > { %1031 = vmatprep.subr.bf16.mxu0 %v7420_v24 }
  0x2b   : > { %1032 = vmatpush1.bf16.msra.mxu0 %v7436_v27 }
  0x2c   : > { %654 = vmatpush1.bf16.msra.mxu1 %v6502_v25  ;;  %1033 = vmatprep.subr.bf16.mxu0 %v7455_v31 }
  0x2d   : > { %1070 = vmatprep.subr.bf16.mxu1 %v7430_v26 }
  0x2f   : > { %5731 = vmatmul.mubr.msk.bf16.gmra.mrb[8].mxu0 %vm509_vm0, %v6505_v28  ;;  %5737 = vmatmul.mubr.msk.bf16.vlgmr.msra.gmra.mrb[8].mxu1 %vm509_vm0, %v6489_v10 }
  0x30   : > { %1071 = vmatpush1.bf16.msra.mxu1 %v7443_v29  ;;  %596 = vmatprep.mubr.bf16.mxu0 %v9125_v2 }
  0x31   : > { %689 = vmatprep.mubr.bf16.mxu1 %v9125_v2  ;;  %1072 = vmatprep.subr.bf16.mxu1 %v7449_v30 }
  0x32   : > { %1034 = vmatpush1.bf16.msra.mxu0 %v7462_v32 }
  0x33   : > { %1035 = vmatprep.subr.bf16.mxu0 %v7474_v34 }
  0x34   : > { %1073 = vmatpush1.bf16.msra.mxu1 %v7469_v33 }
  0x35   : > { %1074 = vmatprep.subr.bf16.mxu1 %v7481_v35 }
  0x36   : > { %1036 = vmatpush1.bf16.msra.mxu0 %v7489_v37 }
  0x37   : > { %5732 = vmatmul.mubr.msk.bf16.gmra.mrb[12].mxu0 %vm509_vm0, %v6515_v36  ;;  %5738 = vmatmul.mubr.msk.bf16.gmra.mrb[12].mxu1 %vm509_vm0, %v6497_v19 }
  0x38   : > { %606 = vmatprep.mubr.bf16.mxu0 %v9125_v2  ;;  %699 = vmatprep.mubr.bf16.mxu1 %v9125_v2 }
  0x39   : > { %1075 = vmatpush1.bf16.msra.mxu1 %v7496_v38  ;;  %1037 = vmatprep.subr.bf16.mxu0 %v7501_v39 }
  0x3a   : > { %1076 = vmatprep.subr.bf16.mxu1 %v7507_v40  ;;  %1038 = vmatpush1.bf16.msra.mxu0 %v7514_v41 }
  0x3b   : > { %1039 = vmatprep.subr.bf16.mxu0 %v7526_v43 }
  0x3d   : > { %1077 = vmatpush1.bf16.msra.mxu1 %v7519_v42 }
  0x3e   : > { %1078 = vmatprep.subr.bf16.mxu1 %v7531_v44  ;;  %1040 = vmatpush1.bf16.msra.mxu0 %v7541_v46 }
  0x3f   : > { %5733 = vmatmul.mubr.msk.bf16.gmra.mrb[16].mxu0 %vm509_vm0, %v6525_v45  ;;  %5739 = vmatmul.mubr.msk.bf16.gmra.mrb[16].mxu1 %vm509_vm0, %v6505_v28 }
  0x40   : > { %616 = vmatprep.mubr.bf16.mxu0 %v9125_v2  ;;  %709 = vmatprep.mubr.bf16.mxu1 %v9125_v2 }
  0x41   : > { %1079 = vmatpush1.bf16.msra.mxu1 %v7546_v47  ;;  %1041 = vmatprep.subr.bf16.mxu0 %v7551_v48 }
  0x42   : > { %1080 = vmatprep.subr.bf16.mxu1 %v7556_v49  ;;  %1042 = vmatpush1.bf16.msra.mxu0 %v7567_v50 }
  0x43   : > { %1374 = vmatprep.subr.bf16.mxu0 %v7373_v14 }
  0x45   : > { %1081 = vmatpush1.bf16.msra.mxu1 %v7572_v51 }
  0x46   : > { %1082 = vmatprep.subr.bf16.mxu1 %v7579_v52 }
  0x47   : > { %5734 = vmatmul.mubr.msk.bf16.gmra.mrb[20].mxu0 %vm509_vm0, %v6535_v53  ;;  %5740 = vmatmul.mubr.msk.bf16.gmra.mrb[20].mxu1 %vm509_vm0, %v6515_v36  ;;  %v9122_v36 = vsub.s32 2, %v7675_v3 }
  0x48   : > { %719 = vmatprep.mubr.bf16.mxu1 %v9125_v2  ;;  %1059 = vmatprep.mubr.bf16.mxu0 %v9125_v2 }
  0x49   : > { %1083 = vmatpush1.bf16.msra.mxu1 %v7589_v54 }
  0x4a   : > { %1084 = vmatprep.subr.bf16.mxu1 %v7594_v55 }
  0x4d   : > { %1085 = vmatpush1.bf16.msra.mxu1 %v7605_v56 }
  0x4e   : > { %1417 = vmatprep.subr.bf16.mxu1 %v7430_v26 }
  0x4f   : > { %5741 = vmatmul.mubr.msk.bf16.gmra.mrb[24].mxu1 %vm509_vm0, %v6525_v45  ;;  %1060 = vmatmul.mubr.bf16.vlgmr.msra.gmra.mrb[0].mxu0 %v9125_v2 }
  0x50   : > { %729 = vmatprep.mubr.bf16.mxu1 %v9125_v2  ;;  %1375 = vmatpush1.bf16.msra.mxu0 %v7381_v15 }
  0x51   : > { %1376 = vmatprep.subr.bf16.mxu0 %v7390_v17  ;;  %1406 = vmatprep.mubr.bf16.mxu0 %v9125_v2 }
  0x54   : > { %1377 = vmatpush1.bf16.msra.mxu0 %v7412_v23 }
  0x55   : > { %1378 = vmatprep.subr.bf16.mxu0 %v7420_v24 }
  0x57   : > { %5742 = vmatmul.mubr.msk.bf16.gmra.mrb[28].mxu1 %vm509_vm0, %v6535_v53  ;;  %v9121_v53 = vsub.s32 3, %v7675_v3 }
  0x58   : > { %739 = vmatprep.mubr.bf16.mxu1 %v9125_v2  ;;  %1379 = vmatpush1.bf16.msra.mxu0 %v7436_v27 }
  0x59   : > { %1380 = vmatprep.subr.bf16.mxu0 %v7455_v31 }
  0x5c   : > { %1381 = vmatpush1.bf16.msra.mxu0 %v7462_v32 }
  0x5d   : > { %1382 = vmatprep.subr.bf16.mxu0 %v7474_v34 }
  0x5f   : > { %5743 = vmatmul.mubr.msk.bf16.gmra.mrb[32].mxu1 %vm509_vm0, %v7362_v11  ;;  %v7684_v11 = vrot.slane %v367_v7, %v9124_v5 }
  0x60   : > { %749 = vmatprep.mubr.bf16.mxu1 %v9125_v2  ;;  %1383 = vmatpush1.bf16.msra.mxu0 %v7489_v37 }
  0x61   : > { %1384 = vmatprep.subr.bf16.mxu0 %v7501_v39 }
  0x64   : > { %1385 = vmatpush1.bf16.msra.mxu0 %v7514_v41 }
  0x65   : > { %1386 = vmatprep.subr.bf16.mxu0 %v7526_v43 }
  0x67   : > { %5744 = vmatmul.mubr.msk.bf16.gmra.mrb[36].mxu1 %vm509_vm0, %v7399_v20 }
  0x68   : > { %1102 = vmatprep.mubr.bf16.mxu1 %v9125_v2  ;;  %1387 = vmatpush1.bf16.msra.mxu0 %v7541_v46 }
  0x69   : > { %1388 = vmatprep.subr.bf16.mxu0 %v7551_v48 }
  0x6c   : > { %1389 = vmatpush1.bf16.msra.mxu0 %v7567_v50 }
  0x6d   : > { %1722 = vmatprep.subr.bf16.mxu0 %v7373_v14 }
  0x6f   : > { %1103 = vmatmul.mubr.bf16.vlgmr.msra.gmra.mrb[8].mxu1 %v9125_v2 }
  0x70   : > { %1418 = vmatpush1.bf16.msra.mxu1 %v7443_v29  ;;  %1449 = vmatprep.mubr.bf16.mxu1 %v9125_v2 }
  0x71   : > { %1419 = vmatprep.subr.bf16.mxu1 %v7449_v30 }
  0x74   : > { %1420 = vmatpush1.bf16.msra.mxu1 %v7469_v33 }
  0x75   : > { %1421 = vmatprep.subr.bf16.mxu1 %v7481_v35 }
  0x78   : > { %1422 = vmatpush1.bf16.msra.mxu1 %v7496_v38 }
  0x79   : > { %1423 = vmatprep.subr.bf16.mxu1 %v7507_v40 }
  0x7c   : > { %1424 = vmatpush1.bf16.msra.mxu1 %v7519_v42 }
  0x7d   : > { %1425 = vmatprep.subr.bf16.mxu1 %v7531_v44 }
  0x80   : > { %1426 = vmatpush1.bf16.msra.mxu1 %v7546_v47 }
  0x81   : > { %1427 = vmatprep.subr.bf16.mxu1 %v7556_v49 }
  0x84   : > { %1428 = vmatpush1.bf16.msra.mxu1 %v7572_v51 }
  0x85   : > { %1429 = vmatprep.subr.bf16.mxu1 %v7579_v52 }
  0x88   : > { %1430 = vmatpush1.bf16.msra.mxu1 %v7589_v54 }
  0x89   : > { %1431 = vmatprep.subr.bf16.mxu1 %v7594_v55 }
  0x8c   : > { %1432 = vmatpush1.bf16.msra.mxu1 %v7605_v56 }
  0x8d   : > { %1765 = vmatprep.subr.bf16.mxu1 %v7430_v26 }
  0xf2   : > { %v7659_v57 = vpop.f32.mrb[0].mxu1 }
  0xf3   : > { %v7661_v58 = vpop.f32.mrb[1].mxu1 }
  0xf4   : > { %v7663_v59 = vpop.f32.mrb[2].mxu1 }
  0xf5   : > { %v7665_v60 = vpop.f32.mrb[3].mxu1 }
  0xfa   : > { %v7667_v61 = vpop.f32.mrb[4].mxu1 }
  0xfb   : > { %9133 = vst [vmem:[#allocation4_spill] sm:$0xff] %v7667_v61  ;;  %v7669_v62 = vpop.f32.mrb[5].mxu1 }
  0xfc   : > { %9134 = vst [vmem:[#allocation5_spill] sm:$0xff] %v7669_v62  ;;  %v7671_v63 = vpop.f32.mrb[6].mxu1 }
  0xfd   : > { %9135 = vst [vmem:[#allocation6_spill] sm:$0xff] %v7671_v63  ;;  %v7673_v0 = vpop.f32.mrb[7].mxu1 }
  0xfe   : > { %9136 = vst [vmem:[#allocation7_spill] sm:$0xff] %v7673_v0 }
 0x122   : > { %v1061_v4 = vpop.f32.mrb[0].mxu0 }
 0x123   : > { %v1063_v6 = vpop.f32.mrb[1].mxu0  ;;  %v6210_v13 = vadd.f32 %v1061_v4, %v7684_v11 }
 0x124   : > { %v1065_v9 = vpop.f32.mrb[2].mxu0  ;;  %v6211_v16 = vadd.f32 %v1063_v6, %v7688_v12 }
 0x125   : > { %v1067_v10 = vpop.f32.mrb[3].mxu0  ;;  %v6212_v18 = vadd.f32 %v1065_v9, %v7684_v11  ;;  %v5777_v20 = vmul.f32 -1.442695, %v6210_v13 }
 0x126   : > { %v6213_v19 = vadd.f32 %v1067_v10, %v7688_v12  ;;  %v5778_v21 = vmul.f32 -1.442695, %v6211_v16  ;;  %v7698_v10 = vrot.slane %v367_v7, %v9122_v36  ;;  %v7702_v16 = vrot.slane %v367_v7, %v9121_v53 }
 0x127   : > { %v5780_v22 = vmul.f32 -1.442695, %v6212_v18  ;;  %6709 = vpow2.f32 %v5777_v20 }
 0x128   : > { %v5781_v25 = vmul.f32 -1.442695, %v6213_v19  ;;  %6711 = vpow2.f32 %v5778_v21 }
 0x129   : > { %6713 = vpow2.f32 %v5780_v22 }
 0x12a   : > { %6715 = vpow2.f32 %v5781_v25 }
 0x131   : > { %v6710_v28 = vpop.eup %6709 }
 0x132   : > { %v6712_v45 = vpop.eup %6711  ;;  %v1139_v6 = vadd.f32 1.0, %v6710_v28 }
 0x133   : > { %v6714_v1 = vpop.eup %6713  ;;  %v1140_v9 = vadd.f32 1.0, %v6712_v45 }
 0x134   : > { %v6716_v4 = vpop.eup %6715  ;;  %v1142_v13 = vadd.f32 1.0, %v6714_v1  ;;  %6717 = vrcp.f32 %v1139_v6 }
 0x135   : > { %v1143_v18 = vadd.f32 1.0, %v6716_v4  ;;  %6719 = vrcp.f32 %v1140_v9 }
 0x136   : > { %6721 = vrcp.f32 %v1142_v13 }
 0x137   : > { %6723 = vrcp.f32 %v1143_v18 }
 0x13e   : > { %v6718_v6 = vpop.eup %6717 }
 0x13f   : > { %v6720_v9 = vpop.eup %6719 }
 0x142   : > { %v1104_v19 = vpop.f32.mrb[8].mxu1 }
 0x143   : > { %v6250_v20 = vadd.f32 %v1104_v19, %v7698_v10  ;;  %v1106_v21 = vpop.f32.mrb[9].mxu1  ;;  %v6722_v19 = vpop.eup %6721 }
 0x144   : > { %v6251_v22 = vadd.f32 %v1106_v21, %v7702_v16  ;;  %v1108_v25 = vpop.f32.mrb[10].mxu1  ;;  %v6724_v53 = vpop.eup %6723  ;;  %v1159_v21 = vmul.f32 0.0, %v6720_v9 }
 0x145   : > { %v5779_v28 = vmul.f32 -1.442695, %v6250_v20  ;;  %v6252_v45 = vadd.f32 %v1108_v25, %v7698_v10  ;;  %v1110_v1 = vpop.f32.mrb[11].mxu1  ;;  %v1160_v25 = vmul.f32 0.0, %v6724_v53 }
 0x146   : > { %6725 = vtanh.f32 %v6251_v22  ;;  %v6253_v7 = vadd.f32 %v1110_v1, %v7702_v16 }
 0x147   : > { %6727 = vpow2.f32 %v5779_v28  ;;  %v5782_v4 = vmul.f32 -1.442695, %v6252_v45 }
 0x148   : > { %6729 = vtanh.f32 %v6253_v7 }
 0x149   : > { %6731 = vpow2.f32 %v5782_v4 }
 0x150   : > { %v6726_v13 = vpop.eup %6725 }
 0x151   : > { %v6728_v36 = vpop.eup %6727  ;;  %v1161_v8 = vmul.f32 %v6726_v13, %v6718_v6 }
 0x152   : > { %v6730_v18 = vpop.eup %6729  ;;  %v1141_v20 = vadd.f32 1.0, %v6728_v36 }
 0x153   : > { %v6732_v5 = vpop.eup %6731  ;;  %v7708_v2 = vadd.f32 %v1161_v8, %v1159_v21  ;;  %v1162_v22 = vmul.f32 %v6730_v18, %v6722_v19 }
 0x154   : > { %6733 = vrcp.f32 %v1141_v20  ;;  %v1144_v28 = vadd.f32 1.0, %v6732_v5  ;;  %v9138_v5 = vmov 0  }
 0x155   : > { %6735 = vtanh.f32 %v7708_v2  ;;  %v7711_v45 = vadd.f32 %v1162_v22, %v1160_v25 }
 0x156   : > { %6737 = vrcp.f32 %v1144_v28 }
 0x157   : > { %6739 = vtanh.f32 %v7711_v45 }
 0x15e   : > { %v6734_v1 = vpop.eup %6733 }
 0x15f   : > { %v6736_v7 = vpop.eup %6735 }
 0x160   : > { %v6738_v4 = vpop.eup %6737  ;;  %v1167_v9 = vmul.f32 %v6736_v7, %v6734_v1 }
 0x161   : > { %v6740_v6 = vpop.eup %6739 }
 0x162   : > { %v1168_v36 = vmul.f32 %v6740_v6, %v6738_v4 }
 0x164   : > { %v7714_v13 = vpack.c.bf16 %v1168_v36, %v1167_v9 }
 0x166   : > { %1407 = vmatmul.mubr.bf16.vlgmr.msra.gmra.mrb[4].mxu0 %v7714_v13  ;;  %1450 = vmatmul.mubr.bf16.vlgmr.msra.gmra.mrb[12].mxu1 %v7714_v13 }
 0x167   : > { %1723 = vmatpush1.bf16.msra.mxu0 %v7381_v15  ;;  %1766 = vmatpush1.bf16.msra.mxu1 %v7443_v29 }
 0x168   : > { %1724 = vmatprep.subr.bf16.mxu0 %v7390_v17  ;;  %1767 = vmatprep.subr.bf16.mxu1 %v7449_v30 }
 0x169   : > { %1754 = vmatprep.mubr.bf16.mxu0 %v9138_v5  ;;  %1797 = vmatprep.mubr.bf16.mxu1 %v9138_v5 }
 0x16b   : > { %1725 = vmatpush1.bf16.msra.mxu0 %v7412_v23  ;;  %1768 = vmatpush1.bf16.msra.mxu1 %v7469_v33 }
 0x16c   : > { %1726 = vmatprep.subr.bf16.mxu0 %v7420_v24  ;;  %1769 = vmatprep.subr.bf16.mxu1 %v7481_v35 }
 0x16f   : > { %1727 = vmatpush1.bf16.msra.mxu0 %v7436_v27  ;;  %1770 = vmatpush1.bf16.msra.mxu1 %v7496_v38 }
 0x170   : > { %1728 = vmatprep.subr.bf16.mxu0 %v7455_v31  ;;  %1771 = vmatprep.subr.bf16.mxu1 %v7507_v40 }
 0x173   : > { %1729 = vmatpush1.bf16.msra.mxu0 %v7462_v32  ;;  %1772 = vmatpush1.bf16.msra.mxu1 %v7519_v42 }
 0x174   : > { %1730 = vmatprep.subr.bf16.mxu0 %v7474_v34  ;;  %1773 = vmatprep.subr.bf16.mxu1 %v7531_v44 }
 0x177   : > { %1731 = vmatpush1.bf16.msra.mxu0 %v7489_v37  ;;  %1774 = vmatpush1.bf16.msra.mxu1 %v7546_v47 }
 0x178   : > { %1732 = vmatprep.subr.bf16.mxu0 %v7501_v39  ;;  %1775 = vmatprep.subr.bf16.mxu1 %v7556_v49 }
 0x17b   : > { %1733 = vmatpush1.bf16.msra.mxu0 %v7514_v41  ;;  %1776 = vmatpush1.bf16.msra.mxu1 %v7572_v51 }
 0x17c   : > { %1734 = vmatprep.subr.bf16.mxu0 %v7526_v43  ;;  %1777 = vmatprep.subr.bf16.mxu1 %v7579_v52 }
 0x17f   : > { %1735 = vmatpush1.bf16.msra.mxu0 %v7541_v46  ;;  %1778 = vmatpush1.bf16.msra.mxu1 %v7589_v54 }
 0x180   : > { %1736 = vmatprep.subr.bf16.mxu0 %v7551_v48  ;;  %1779 = vmatprep.subr.bf16.mxu1 %v7594_v55 }
 0x183   : > { %1737 = vmatpush1.bf16.msra.mxu0 %v7567_v50  ;;  %1780 = vmatpush1.bf16.msra.mxu1 %v7605_v56 }
 0x184   : > { %2070 = vmatprep.subr.bf16.mxu0 %v7373_v14  ;;  %2113 = vmatprep.subr.bf16.mxu1 %v7430_v26 }
 0x239   : > { %v1408_v8 = vpop.f32.mrb[4].mxu0  ;;  %v1451_v53 = vpop.f32.mrb[12].mxu1 }
 0x23a   : > { %v6214_v19 = vadd.f32 %v1408_v8, %v7684_v11  ;;  %v1410_v21 = vpop.f32.mrb[5].mxu0  ;;  %v1453_v18 = vpop.f32.mrb[13].mxu1  ;;  %v6254_v36 = vadd.f32 %v1451_v53, %v7698_v10 }
 0x23b   : > { %v6215_v20 = vadd.f32 %v1410_v21, %v7688_v12  ;;  %v1412_v25 = vpop.f32.mrb[6].mxu0  ;;  %v1455_v22 = vpop.f32.mrb[14].mxu1  ;;  %v6255_v21 = vadd.f32 %v1453_v18, %v7702_v16 }
 0x23c   : > { %v5815_v28 = vmul.f32 -1.442695, %v6214_v19  ;;  %v6216_v1 = vadd.f32 %v1412_v25, %v7684_v11  ;;  %v1414_v7 = vpop.f32.mrb[7].mxu0  ;;  %v1457_v4 = vpop.f32.mrb[15].mxu1  ;;  %v6256_v8 = vadd.f32 %v1455_v22, %v7698_v10  ;;  %v5817_v19 = vmul.f32 -1.442695, %v6254_v36 }
 0x23d   : > { %v5816_v6 = vmul.f32 -1.442695, %v6215_v20  ;;  %v6217_v14 = vadd.f32 %v1414_v7, %v7688_v12  ;;  %v6257_v20 = vadd.f32 %v1457_v4, %v7702_v16 }
 0x23e   : > { %6741 = vpow2.f32 %v5815_v28  ;;  %v5818_v26 = vmul.f32 -1.442695, %v6216_v1  ;;  %v5820_v3 = vmul.f32 -1.442695, %v6256_v8 }
 0x23f   : > { %v5819_v9 = vmul.f32 -1.442695, %v6217_v14  ;;  %6743 = vpow2.f32 %v5816_v6 }
 0x240   : > { %6745 = vpow2.f32 %v5818_v26 }
 0x241   : > { %6747 = vpow2.f32 %v5819_v9 }
 0x242   : > { %6749 = vtanh.f32 %v6255_v21 }
 0x243   : > { %6751 = vpow2.f32 %v5817_v19 }
 0x244   : > { %6753 = vpow2.f32 %v5820_v3 }
 0x248   : > { %v6742_v25 = vpop.eup %6741 }
 0x249   : > { %v1486_v0 = vadd.f32 1.0, %v6742_v25  ;;  %v6744_v28 = vpop.eup %6743 }
 0x24a   : > { %v6746_v1 = vpop.eup %6745  ;;  %v1487_v7 = vadd.f32 1.0, %v6744_v28 }
 0x24b   : > { %6755 = vrcp.f32 %v1486_v0  ;;  %v1489_v53 = vadd.f32 1.0, %v6746_v1  ;;  %v6748_v6 = vpop.eup %6747 }
 0x24c   : > { %6757 = vtanh.f32 %v6257_v20  ;;  %v1490_v22 = vadd.f32 1.0, %v6748_v6  ;;  %v6750_v18 = vpop.eup %6749 }
 0x24d   : > { %6759 = vrcp.f32 %v1487_v7  ;;  %v6752_v14 = vpop.eup %6751 }
 0x24e   : > { %6761 = vrcp.f32 %v1489_v53  ;;  %v6754_v26 = vpop.eup %6753  ;;  %v1488_v19 = vadd.f32 1.0, %v6752_v14 }
 0x24f   : > { %6763 = vrcp.f32 %v1490_v22  ;;  %v1491_v20 = vadd.f32 1.0, %v6754_v26 }
 0x250   : > { %6765 = vrcp.f32 %v1488_v19 }
 0x255   : > { %v6756_v9 = vpop.eup %6755 }
 0x256   : > { %v6758_v36 = vpop.eup %6757  ;;  %v1508_v4 = vmul.f32 %v6756_v9, %v6750_v18 }
 0x257   : > { %v6760_v8 = vpop.eup %6759 }
 0x258   : > { %v6762_v21 = vpop.eup %6761  ;;  %v1506_v3 = vmul.f32 %v6760_v8, %v7708_v2 }
 0x259   : > { %v1509_v0 = vmul.f32 %v6762_v21, %v6758_v36  ;;  %v6764_v25 = vpop.eup %6763 }
 0x25a   : > { %v7761_v28 = vadd.f32 %v1508_v4, %v1506_v3  ;;  %v1507_v1 = vmul.f32 %v6764_v25, %v7711_v45  ;;  %v6766_v53 = vpop.eup %6765 }
 0x25c   : > { %6767 = vtanh.f32 %v7761_v28  ;;  %v7765_v7 = vadd.f32 %v1509_v0, %v1507_v1 }
 0x25d   : > { %6769 = vrcp.f32 %v1491_v20 }
 0x25e   : > { %6771 = vtanh.f32 %v7765_v7 }
 0x266   : > { %v6768_v6 = vpop.eup %6767 }
 0x267   : > { %v6770_v22 = vpop.eup %6769  ;;  %v1514_v2 = vmul.f32 %v6768_v6, %v6766_v53 }
 0x268   : > { %v6772_v18 = vpop.eup %6771 }
 0x269   : > { %v1515_v14 = vmul.f32 %v6772_v18, %v6770_v22 }
 0x26b   : > { %v7768_v9 = vpack.c.bf16 %v1515_v14, %v1514_v2 }
 0x26d   : > { %1755 = vmatmul.mubr.bf16.vlgmr.msra.gmra.mrb[8].mxu0 %v7768_v9  ;;  %1798 = vmatmul.mubr.bf16.vlgmr.msra.gmra.mrb[16].mxu1 %v7768_v9 }
 0x26e   : > { %2071 = vmatpush1.bf16.msra.mxu0 %v7381_v15  ;;  %2114 = vmatpush1.bf16.msra.mxu1 %v7443_v29 }
 0x26f   : > { %2072 = vmatprep.subr.bf16.mxu0 %v7390_v17  ;;  %2115 = vmatprep.subr.bf16.mxu1 %v7449_v30 }
 0x270   : > { %2102 = vmatprep.mubr.bf16.mxu0 %v9138_v5  ;;  %2145 = vmatprep.mubr.bf16.mxu1 %v9138_v5 }
 0x272   : > { %2073 = vmatpush1.bf16.msra.mxu0 %v7412_v23  ;;  %2116 = vmatpush1.bf16.msra.mxu1 %v7469_v33 }
 0x273   : > { %2074 = vmatprep.subr.bf16.mxu0 %v7420_v24  ;;  %2117 = vmatprep.subr.bf16.mxu1 %v7481_v35 }
 0x276   : > { %2075 = vmatpush1.bf16.msra.mxu0 %v7436_v27  ;;  %2118 = vmatpush1.bf16.msra.mxu1 %v7496_v38 }
 0x277   : > { %2076 = vmatprep.subr.bf16.mxu0 %v7455_v31  ;;  %2119 = vmatprep.subr.bf16.mxu1 %v7507_v40 }
 0x27a   : > { %2077 = vmatpush1.bf16.msra.mxu0 %v7462_v32  ;;  %2120 = vmatpush1.bf16.msra.mxu1 %v7519_v42 }
 0x27b   : > { %2078 = vmatprep.subr.bf16.mxu0 %v7474_v34  ;;  %2121 = vmatprep.subr.bf16.mxu1 %v7531_v44 }
 0x27e   : > { %2079 = vmatpush1.bf16.msra.mxu0 %v7489_v37  ;;  %2122 = vmatpush1.bf16.msra.mxu1 %v7546_v47 }
 0x27f   : > { %2080 = vmatprep.subr.bf16.mxu0 %v7501_v39  ;;  %2123 = vmatprep.subr.bf16.mxu1 %v7556_v49 }
 0x282   : > { %2081 = vmatpush1.bf16.msra.mxu0 %v7514_v41  ;;  %2124 = vmatpush1.bf16.msra.mxu1 %v7572_v51 }
 0x283   : > { %2082 = vmatprep.subr.bf16.mxu0 %v7526_v43  ;;  %2125 = vmatprep.subr.bf16.mxu1 %v7579_v52 }
 0x286   : > { %2083 = vmatpush1.bf16.msra.mxu0 %v7541_v46  ;;  %2126 = vmatpush1.bf16.msra.mxu1 %v7589_v54 }
 0x287   : > { %2084 = vmatprep.subr.bf16.mxu0 %v7551_v48  ;;  %2127 = vmatprep.subr.bf16.mxu1 %v7594_v55 }
 0x28a   : > { %2085 = vmatpush1.bf16.msra.mxu0 %v7567_v50  ;;  %2128 = vmatpush1.bf16.msra.mxu1 %v7605_v56 }
 0x340   : > { %v1756_v15 = vpop.f32.mrb[8].mxu0  ;;  %v1799_v17 = vpop.f32.mrb[16].mxu1 }
 0x341   : > { %v6218_v23 = vadd.f32 %v1756_v15, %v7684_v11  ;;  %v1758_v24 = vpop.f32.mrb[9].mxu0  ;;  %v1801_v27 = vpop.f32.mrb[17].mxu1  ;;  %v6258_v41 = vadd.f32 %v1799_v17, %v7698_v10 }
 0x342   : > { %v6219_v29 = vadd.f32 %v1758_v24, %v7688_v12  ;;  %v1760_v30 = vpop.f32.mrb[10].mxu0  ;;  %v1803_v31 = vpop.f32.mrb[18].mxu1  ;;  %v6259_v43 = vadd.f32 %v1801_v27, %v7702_v16  ;;  %v7834_v27 = vld [vmem:[%s9113_s2 + $0xc] ss:$16 sps:$4 sm:$0xff]  }
 0x343   : > { %v5853_v32 = vmul.f32 -1.442695, %v6218_v23  ;;  %v6220_v33 = vadd.f32 %v1760_v30, %v7684_v11  ;;  %v1762_v34 = vpop.f32.mrb[11].mxu0  ;;  %v1805_v35 = vpop.f32.mrb[19].mxu1  ;;  %v6260_v42 = vadd.f32 %v1803_v31, %v7698_v10  ;;  %v5855_v44 = vmul.f32 -1.442695, %v6258_v41  ;;  %2461 = vmatprep.subr.bf16.mxu1 %v7834_v27 }
 0x344   : > { %v5854_v37 = vmul.f32 -1.442695, %v6219_v29  ;;  %v6221_v38 = vadd.f32 %v1762_v34, %v7688_v12  ;;  %v6261_v48 = vadd.f32 %v1805_v35, %v7702_v16  ;;  %v7839_v29 = vld [vmem:[%s9113_s2] ss:$16 sps:$4 sm:$0xff]   ;;  %v7844_v30 = vld [vmem:[%s9113_s2 + $0x8] ss:$16 sps:$4 sm:$0xff]  }
 0x345   : > { %6773 = vpow2.f32 %v5853_v32  ;;  %v5856_v39 = vmul.f32 -1.442695, %v6220_v33  ;;  %v5858_v46 = vmul.f32 -1.442695, %v6260_v42  ;;  %v7853_v31 = vld [vmem:[%s9113_s2 + $0x24] ss:$16 sps:$4 sm:$0xff]  }
 0x346   : > { %v5857_v40 = vmul.f32 -1.442695, %v6221_v38  ;;  %6775 = vpow2.f32 %v5854_v37  ;;  %v7858_v32 = vld [vmem:[%s9113_s2 + $0x2c] ss:$16 sps:$4 sm:$0xff]   ;;  %v7863_v33 = vld [vmem:[%s9113_s2 + $0x20] ss:$16 sps:$4 sm:$0xff]  }
 0x347   : > { %6777 = vpow2.f32 %v5856_v39  ;;  %v7868_v34 = vld [vmem:[%s9113_s2 + $0x28] ss:$16 sps:$4 sm:$0xff]   ;;  %v7877_v35 = vld [vmem:[%s9113_s2 + $0x44] ss:$16 sps:$4 sm:$0xff]   ;;  %v7882_v37 = vld [vmem:[%s9113_s2 + $0x4c] ss:$16 sps:$4 sm:$0xff]  }
 0x348   : > { %6779 = vpow2.f32 %v5857_v40  ;;  %v7887_v38 = vld [vmem:[%s9113_s2 + $0x40] ss:$16 sps:$4 sm:$0xff]   ;;  %v7892_v39 = vld [vmem:[%s9113_s2 + $0x48] ss:$16 sps:$4 sm:$0xff]   ;;  %v7901_v40 = vld [vmem:[%s9113_s2 + $0x64] ss:$16 sps:$4 sm:$0xff]  }
 0x349   : > { %6781 = vtanh.f32 %v6259_v43  ;;  %v7906_v41 = vld [vmem:[%s9113_s2 + $0x6c] ss:$16 sps:$4 sm:$0xff]   ;;  %v7911_v42 = vld [vmem:[%s9113_s2 + $0x60] ss:$16 sps:$4 sm:$0xff]   ;;  %v7916_v43 = vld [vmem:[%s9113_s2 + $0x68] ss:$16 sps:$4 sm:$0xff]  }
 0x34a   : > { %6783 = vpow2.f32 %v5855_v44  ;;  %v7925_v44 = vld [vmem:[%s9113_s2 + $0x80] ss:$16 sps:$4 sm:$0xff]  }
 0x34b   : > { %6785 = vpow2.f32 %v5858_v46  ;;  %v7930_v46 = vld [vmem:[%s9113_s2 + $0x84] ss:$16 sps:$4 sm:$0xff]  }
 0x34f   : > { %v6774_v47 = vpop.eup %6773 }
 0x350   : > { %v1834_v49 = vadd.f32 1.0, %v6774_v47  ;;  %v6776_v50 = vpop.eup %6775  ;;  %v7935_v47 = vld [vmem:[%s9113_s2 + $0x88] ss:$16 sps:$4 sm:$0xff]  }
 0x351   : > { %v6778_v51 = vpop.eup %6777  ;;  %v1835_v52 = vadd.f32 1.0, %v6776_v50  ;;  %v7951_v50 = vld [vmem:[%s9113_s2 + $0xac] ss:$16 sps:$4 sm:$0xff]  }
 0x352   : > { %6787 = vrcp.f32 %v1834_v49  ;;  %v1837_v54 = vadd.f32 1.0, %v6778_v51  ;;  %v6780_v55 = vpop.eup %6779  ;;  %v7945_v49 = vld [vmem:[%s9113_s2 + $0xa4] ss:$16 sps:$4 sm:$0xff]   ;;  %v7958_v51 = vld [vmem:[%s9113_s2 + $0xa0] ss:$16 sps:$4 sm:$0xff]  }
 0x353   : > { %6789 = vtanh.f32 %v6261_v48  ;;  %v1838_v56 = vadd.f32 1.0, %v6780_v55  ;;  %v6782_v45 = vpop.eup %6781  ;;  %v7940_v48 = vld [vmem:[%s9113_s2 + $0x8c] ss:$16 sps:$4 sm:$0xff]  }
 0x354   : > { %6791 = vrcp.f32 %v1835_v52  ;;  %v6784_v26 = vpop.eup %6783  ;;  %v7965_v52 = vld [vmem:[%s9113_s2 + $0xa8] ss:$16 sps:$4 sm:$0xff]   ;;  %v7976_v55 = vld [vmem:[%s9113_s2 + $0xcc] ss:$16 sps:$4 sm:$0xff]  }
 0x355   : > { %6793 = vrcp.f32 %v1837_v54  ;;  %v6786_v36 = vpop.eup %6785  ;;  %v1836_v0 = vadd.f32 1.0, %v6784_v26  ;;  %v7970_v54 = vld [vmem:[%s9113_s2 + $0xc4] ss:$16 sps:$4 sm:$0xff]  }
 0x356   : > { %6795 = vrcp.f32 %v1838_v56  ;;  %v1839_v6 = vadd.f32 1.0, %v6786_v36  ;;  %v7982_v56 = vld [vmem:[%s9113_s2 + $0xc0] ss:$16 sps:$4 sm:$0xff]   ;;  %v7994_v26 = vld [vmem:[%s9113_s2 + $0xe4] ss:$16 sps:$4 sm:$0xff]  }
 0x357   : > { %6797 = vrcp.f32 %v1836_v0  ;;  %v8000_v36 = vld [vmem:[%s9113_s2 + $0xec] ss:$16 sps:$4 sm:$0xff]  }
 0x35c   : > { %v6788_v4 = vpop.eup %6787 }
 0x35d   : > { %v6790_v8 = vpop.eup %6789  ;;  %v1856_v21 = vmul.f32 %v6788_v4, %v6782_v45  ;;  %v7989_v45 = vld [vmem:[%s9113_s2 + $0xc8] ss:$16 sps:$4 sm:$0xff]   ;;  %v8006_v4 = vld [vmem:[%s9113_s2 + $0xe0] ss:$16 sps:$4 sm:$0xff]  }
 0x35e   : > { %v6792_v19 = vpop.eup %6791 }
 0x35f   : > { %v6794_v3 = vpop.eup %6793  ;;  %v1854_v25 = vmul.f32 %v6792_v19, %v7761_v28 }
 0x360   : > { %v1857_v20 = vmul.f32 %v6794_v3, %v6790_v8  ;;  %v6796_v1 = vpop.eup %6795  ;;  %v8013_v8 = vld [vmem:[%s9113_s2 + $0xe8] ss:$16 sps:$4 sm:$0xff]  }
 0x361   : > { %v7813_v53 = vadd.f32 %v1856_v21, %v1854_v25  ;;  %v1855_v22 = vmul.f32 %v6796_v1, %v7765_v7  ;;  %v6798_v2 = vpop.eup %6797  ;;  %v7829_v7 = vld [vmem:[%s9113_s2 + $0x4] ss:$16 sps:$4 sm:$0xff]  }
 0x362   : > { %2418 = vmatprep.subr.bf16.mxu0 %v7829_v7 }
 0x363   : > { %6799 = vtanh.f32 %v7813_v53  ;;  %v7817_v18 = vadd.f32 %v1857_v20, %v1855_v22 }
 0x364   : > { %6801 = vrcp.f32 %v1839_v6 }
 0x365   : > { %6803 = vtanh.f32 %v7817_v18 }
 0x36d   : > { %v6800_v14 = vpop.eup %6799 }
 0x36e   : > { %v6802_v15 = vpop.eup %6801  ;;  %v1862_v28 = vmul.f32 %v6800_v14, %v6798_v2 }
 0x36f   : > { %v6804_v17 = vpop.eup %6803 }
 0x370   : > { %v1863_v23 = vmul.f32 %v6804_v17, %v6802_v15 }
 0x372   : > { %v7820_v24 = vpack.c.bf16 %v1863_v23, %v1862_v28 }
 0x374   : > { %9139 = vst [vmem:[#allocation9_spill] sm:$0xff] %v7820_v24  ;;  %2103 = vmatmul.mubr.bf16.vlgmr.msra.gmra.mrb[12].mxu0 %v7820_v24  ;;  %2146 = vmatmul.mubr.bf16.vlgmr.msra.gmra.mrb[20].mxu1 %v7820_v24 }
 0x375   : > { %2450 = vmatprep.mubr.bf16.mxu0 %v9138_v5  ;;  %2493 = vmatprep.mubr.bf16.mxu1 %v9138_v5 }
 0x376   : > { %2419 = vmatpush1.bf16.msra.mxu0 %v7839_v29  ;;  %2462 = vmatpush1.bf16.msra.mxu1 %v7844_v30 }
 0x377   : > { %2420 = vmatprep.subr.bf16.mxu0 %v7853_v31  ;;  %2463 = vmatprep.subr.bf16.mxu1 %v7858_v32 }
 0x37a   : > { %2421 = vmatpush1.bf16.msra.mxu0 %v7863_v33  ;;  %2464 = vmatpush1.bf16.msra.mxu1 %v7868_v34 }
 0x37b   : > { %2422 = vmatprep.subr.bf16.mxu0 %v7877_v35  ;;  %2465 = vmatprep.subr.bf16.mxu1 %v7882_v37 }
 0x37e   : > { %2423 = vmatpush1.bf16.msra.mxu0 %v7887_v38  ;;  %2466 = vmatpush1.bf16.msra.mxu1 %v7892_v39 }
 0x37f   : > { %2424 = vmatprep.subr.bf16.mxu0 %v7901_v40  ;;  %2467 = vmatprep.subr.bf16.mxu1 %v7906_v41 }
 0x382   : > { %2425 = vmatpush1.bf16.msra.mxu0 %v7911_v42  ;;  %2468 = vmatpush1.bf16.msra.mxu1 %v7916_v43 }
 0x383   : > { %2426 = vmatprep.subr.bf16.mxu0 %v7930_v46  ;;  %2469 = vmatprep.subr.bf16.mxu1 %v7940_v48 }
 0x386   : > { %2427 = vmatpush1.bf16.msra.mxu0 %v7925_v44  ;;  %2470 = vmatpush1.bf16.msra.mxu1 %v7935_v47 }
 0x387   : > { %2428 = vmatprep.subr.bf16.mxu0 %v7945_v49  ;;  %2471 = vmatprep.subr.bf16.mxu1 %v7951_v50 }
 0x38a   : > { %2429 = vmatpush1.bf16.msra.mxu0 %v7958_v51  ;;  %2472 = vmatpush1.bf16.msra.mxu1 %v7965_v52 }
 0x38b   : > { %2430 = vmatprep.subr.bf16.mxu0 %v7970_v54  ;;  %2473 = vmatprep.subr.bf16.mxu1 %v7976_v55 }
 0x38e   : > { %2431 = vmatpush1.bf16.msra.mxu0 %v7982_v56  ;;  %2474 = vmatpush1.bf16.msra.mxu1 %v7989_v45 }
 0x38f   : > { %2432 = vmatprep.subr.bf16.mxu0 %v7994_v26  ;;  %2475 = vmatprep.subr.bf16.mxu1 %v8000_v36 }
 0x392   : > { %2433 = vmatpush1.bf16.msra.mxu0 %v8006_v4  ;;  %2476 = vmatpush1.bf16.msra.mxu1 %v8013_v8 }
 0x393   : > { %2766 = vmatprep.subr.bf16.mxu0 %v7829_v7  ;;  %2809 = vmatprep.subr.bf16.mxu1 %v7834_v27 }
 0x447   : > { %v2104_v21 = vpop.f32.mrb[12].mxu0  ;;  %v2147_v19 = vpop.f32.mrb[20].mxu1 }
 0x448   : > { %v6222_v3 = vadd.f32 %v2104_v21, %v7684_v11  ;;  %v2106_v0 = vpop.f32.mrb[13].mxu0  ;;  %v2149_v25 = vpop.f32.mrb[21].mxu1  ;;  %v6262_v21 = vadd.f32 %v2147_v19, %v7698_v10 }
 0x449   : > { %v6223_v20 = vadd.f32 %v2106_v0, %v7688_v12  ;;  %v2108_v1 = vpop.f32.mrb[14].mxu0  ;;  %v2151_v6 = vpop.f32.mrb[22].mxu1  ;;  %v6263_v0 = vadd.f32 %v2149_v25, %v7702_v16 }
 0x44a   : > { %v5891_v22 = vmul.f32 -1.442695, %v6222_v3  ;;  %v6224_v2 = vadd.f32 %v2108_v1, %v7684_v11  ;;  %v2110_v14 = vpop.f32.mrb[15].mxu0  ;;  %v2153_v15 = vpop.f32.mrb[23].mxu1  ;;  %v6264_v62 = vadd.f32 %v2151_v6, %v7698_v10  ;;  %v5893_v3 = vmul.f32 -1.442695, %v6262_v21 }
 0x44b   : > { %v5892_v17 = vmul.f32 -1.442695, %v6223_v20  ;;  %v6225_v28 = vadd.f32 %v2110_v14, %v7688_v12  ;;  %v6265_v20 = vadd.f32 %v2153_v15, %v7702_v16 }
 0x44c   : > { %6805 = vpow2.f32 %v5891_v22  ;;  %v5894_v23 = vmul.f32 -1.442695, %v6224_v2  ;;  %v5896_v61 = vmul.f32 -1.442695, %v6264_v62 }
 0x44d   : > { %v5895_v63 = vmul.f32 -1.442695, %v6225_v28  ;;  %6807 = vpow2.f32 %v5892_v17 }
 0x44e   : > { %6809 = vpow2.f32 %v5894_v23 }
 0x44f   : > { %6811 = vpow2.f32 %v5895_v63 }
 0x450   : > { %6813 = vtanh.f32 %v6263_v0 }
 0x451   : > { %6815 = vpow2.f32 %v5893_v3 }
 0x452   : > { %6817 = vpow2.f32 %v5896_v61 }
 0x456   : > { %v6806_v1 = vpop.eup %6805 }
 0x457   : > { %v2182_v24 = vadd.f32 1.0, %v6806_v1  ;;  %v6808_v22 = vpop.eup %6807 }
 0x458   : > { %v6810_v2 = vpop.eup %6809  ;;  %v2183_v14 = vadd.f32 1.0, %v6808_v22 }
 0x459   : > { %6819 = vrcp.f32 %v2182_v24  ;;  %v2185_v19 = vadd.f32 1.0, %v6810_v2  ;;  %v6812_v17 = vpop.eup %6811 }
 0x45a   : > { %6821 = vtanh.f32 %v6265_v20  ;;  %v2186_v63 = vadd.f32 1.0, %v6812_v17  ;;  %v6814_v25 = vpop.eup %6813 }
 0x45b   : > { %6823 = vrcp.f32 %v2183_v14  ;;  %v6816_v62 = vpop.eup %6815 }
 0x45c   : > { %6825 = vrcp.f32 %v2185_v19  ;;  %v6818_v6 = vpop.eup %6817  ;;  %v2184_v3 = vadd.f32 1.0, %v6816_v62 }
 0x45d   : > { %6827 = vrcp.f32 %v2186_v63  ;;  %v2187_v20 = vadd.f32 1.0, %v6818_v6 }
 0x45e   : > { %6829 = vrcp.f32 %v2184_v3 }
 0x463   : > { %v6820_v28 = vpop.eup %6819 }
 0x464   : > { %v6822_v23 = vpop.eup %6821  ;;  %v2204_v15 = vmul.f32 %v6820_v28, %v6814_v25 }
 0x465   : > { %v6824_v21 = vpop.eup %6823 }
 0x466   : > { %v6826_v0 = vpop.eup %6825  ;;  %v2202_v61 = vmul.f32 %v6824_v21, %v7813_v53 }
 0x467   : > { %v2205_v24 = vmul.f32 %v6826_v0, %v6822_v23  ;;  %v6828_v1 = vpop.eup %6827 }
 0x468   : > { %v8029_v22 = vadd.f32 %v2204_v15, %v2202_v61  ;;  %v2203_v2 = vmul.f32 %v6828_v1, %v7817_v18  ;;  %v6830_v19 = vpop.eup %6829 }
 0x46a   : > { %6831 = vtanh.f32 %v8029_v22  ;;  %v8033_v14 = vadd.f32 %v2205_v24, %v2203_v2 }
 0x46b   : > { %6833 = vrcp.f32 %v2187_v20 }
 0x46c   : > { %6835 = vtanh.f32 %v8033_v14 }
 0x474   : > { %v6832_v17 = vpop.eup %6831 }
 0x475   : > { %v6834_v63 = vpop.eup %6833  ;;  %v2210_v53 = vmul.f32 %v6832_v17, %v6830_v19 }
 0x476   : > { %v6836_v25 = vpop.eup %6835 }
 0x477   : > { %v2211_v62 = vmul.f32 %v6836_v25, %v6834_v63 }
 0x479   : > { %v8036_v28 = vpack.c.bf16 %v2211_v62, %v2210_v53 }
 0x47b   : > { %9140 = vst [vmem:[#allocation10_spill] sm:$0xff] %v8036_v28  ;;  %2451 = vmatmul.mubr.bf16.vlgmr.msra.gmra.mrb[16].mxu0 %v8036_v28  ;;  %2494 = vmatmul.mubr.bf16.vlgmr.msra.gmra.mrb[24].mxu1 %v8036_v28 }
 0x47c   : > { %2767 = vmatpush1.bf16.msra.mxu0 %v7839_v29  ;;  %2810 = vmatpush1.bf16.msra.mxu1 %v7844_v30 }
 0x47d   : > { %2768 = vmatprep.subr.bf16.mxu0 %v7853_v31  ;;  %2811 = vmatprep.subr.bf16.mxu1 %v7858_v32 }
 0x47e   : > { %2798 = vmatprep.mubr.bf16.mxu0 %v9138_v5  ;;  %2841 = vmatprep.mubr.bf16.mxu1 %v9138_v5 }
 0x480   : > { %2769 = vmatpush1.bf16.msra.mxu0 %v7863_v33  ;;  %2812 = vmatpush1.bf16.msra.mxu1 %v7868_v34 }
 0x481   : > { %2770 = vmatprep.subr.bf16.mxu0 %v7877_v35  ;;  %2813 = vmatprep.subr.bf16.mxu1 %v7882_v37 }
 0x484   : > { %2771 = vmatpush1.bf16.msra.mxu0 %v7887_v38  ;;  %2814 = vmatpush1.bf16.msra.mxu1 %v7892_v39 }
 0x485   : > { %2772 = vmatprep.subr.bf16.mxu0 %v7901_v40  ;;  %2815 = vmatprep.subr.bf16.mxu1 %v7906_v41 }
 0x488   : > { %2773 = vmatpush1.bf16.msra.mxu0 %v7911_v42  ;;  %2816 = vmatpush1.bf16.msra.mxu1 %v7916_v43 }
 0x489   : > { %2774 = vmatprep.subr.bf16.mxu0 %v7930_v46  ;;  %2817 = vmatprep.subr.bf16.mxu1 %v7940_v48 }
 0x48c   : > { %2775 = vmatpush1.bf16.msra.mxu0 %v7925_v44  ;;  %2818 = vmatpush1.bf16.msra.mxu1 %v7935_v47 }
 0x48d   : > { %2776 = vmatprep.subr.bf16.mxu0 %v7945_v49  ;;  %2819 = vmatprep.subr.bf16.mxu1 %v7951_v50 }
 0x490   : > { %2777 = vmatpush1.bf16.msra.mxu0 %v7958_v51  ;;  %2820 = vmatpush1.bf16.msra.mxu1 %v7965_v52 }
 0x491   : > { %2778 = vmatprep.subr.bf16.mxu0 %v7970_v54  ;;  %2821 = vmatprep.subr.bf16.mxu1 %v7976_v55 }
 0x494   : > { %2779 = vmatpush1.bf16.msra.mxu0 %v7982_v56  ;;  %2822 = vmatpush1.bf16.msra.mxu1 %v7989_v45 }
 0x495   : > { %2780 = vmatprep.subr.bf16.mxu0 %v7994_v26  ;;  %2823 = vmatprep.subr.bf16.mxu1 %v8000_v36 }
 0x498   : > { %2781 = vmatpush1.bf16.msra.mxu0 %v8006_v4  ;;  %2824 = vmatpush1.bf16.msra.mxu1 %v8013_v8 }
 0x499   : > { %3114 = vmatprep.subr.bf16.mxu0 %v7829_v7  ;;  %3157 = vmatprep.subr.bf16.mxu1 %v7834_v27 }
 0x54e   : > { %v2452_v18 = vpop.f32.mrb[16].mxu0  ;;  %v2495_v6 = vpop.f32.mrb[24].mxu1 }
 0x54f   : > { %v6226_v23 = vadd.f32 %v2452_v18, %v7684_v11  ;;  %v2454_v15 = vpop.f32.mrb[17].mxu0  ;;  %v2497_v21 = vpop.f32.mrb[25].mxu1  ;;  %v6266_v53 = vadd.f32 %v2495_v6, %v7698_v10 }
 0x550   : > { %v6227_v0 = vadd.f32 %v2454_v15, %v7688_v12  ;;  %v2456_v3 = vpop.f32.mrb[18].mxu0  ;;  %v2499_v61 = vpop.f32.mrb[26].mxu1  ;;  %v6267_v18 = vadd.f32 %v2497_v21, %v7702_v16 }
 0x551   : > { %v5929_v24 = vmul.f32 -1.442695, %v6226_v23  ;;  %v6228_v1 = vadd.f32 %v2456_v3, %v7684_v11  ;;  %v2458_v20 = vpop.f32.mrb[19].mxu0  ;;  %v2501_v2 = vpop.f32.mrb[27].mxu1  ;;  %v6268_v62 = vadd.f32 %v2499_v61, %v7698_v10  ;;  %v5931_v23 = vmul.f32 -1.442695, %v6266_v53 }
 0x552   : > { %v5930_v19 = vmul.f32 -1.442695, %v6227_v0  ;;  %v6229_v17 = vadd.f32 %v2458_v20, %v7688_v12  ;;  %v6269_v0 = vadd.f32 %v2501_v2, %v7702_v16 }
 0x553   : > { %6837 = vpow2.f32 %v5929_v24  ;;  %v5932_v63 = vmul.f32 -1.442695, %v6228_v1  ;;  %v5934_v15 = vmul.f32 -1.442695, %v6268_v62 }
 0x554   : > { %v5933_v25 = vmul.f32 -1.442695, %v6229_v17  ;;  %6839 = vpow2.f32 %v5930_v19 }
 0x555   : > { %6841 = vpow2.f32 %v5932_v63 }
 0x556   : > { %6843 = vpow2.f32 %v5933_v25 }
 0x557   : > { %6845 = vtanh.f32 %v6267_v18 }
 0x558   : > { %6847 = vpow2.f32 %v5931_v23 }
 0x559   : > { %6849 = vpow2.f32 %v5934_v15 }
 0x55d   : > { %v6838_v3 = vpop.eup %6837 }
 0x55e   : > { %v2530_v28 = vadd.f32 1.0, %v6838_v3  ;;  %v6840_v24 = vpop.eup %6839 }
 0x55f   : > { %v6842_v1 = vpop.eup %6841  ;;  %v2531_v20 = vadd.f32 1.0, %v6840_v24 }
 0x560   : > { %6851 = vrcp.f32 %v2530_v28  ;;  %v2533_v6 = vadd.f32 1.0, %v6842_v1  ;;  %v6844_v19 = vpop.eup %6843 }
 0x561   : > { %6853 = vtanh.f32 %v6269_v0  ;;  %v2534_v61 = vadd.f32 1.0, %v6844_v19  ;;  %v6846_v21 = vpop.eup %6845 }
 0x562   : > { %6855 = vrcp.f32 %v2531_v20  ;;  %v6848_v17 = vpop.eup %6847 }
 0x563   : > { %6857 = vrcp.f32 %v2533_v6  ;;  %v6850_v63 = vpop.eup %6849  ;;  %v2532_v23 = vadd.f32 1.0, %v6848_v17 }
 0x564   : > { %6859 = vrcp.f32 %v2534_v61  ;;  %v2535_v0 = vadd.f32 1.0, %v6850_v63 }
 0x565   : > { %6861 = vrcp.f32 %v2532_v23 }
 0x56a   : > { %v6852_v25 = vpop.eup %6851 }
 0x56b   : > { %v6854_v53 = vpop.eup %6853  ;;  %v2552_v2 = vmul.f32 %v6852_v25, %v6846_v21 }
 0x56c   : > { %v6856_v62 = vpop.eup %6855 }
 0x56d   : > { %v6858_v18 = vpop.eup %6857  ;;  %v2550_v15 = vmul.f32 %v6856_v62, %v8029_v22 }
 0x56e   : > { %v2553_v28 = vmul.f32 %v6858_v18, %v6854_v53  ;;  %v6860_v3 = vpop.eup %6859 }
 0x56f   : > { %v8083_v24 = vadd.f32 %v2552_v2, %v2550_v15  ;;  %v2551_v1 = vmul.f32 %v6860_v3, %v8033_v14  ;;  %v6862_v6 = vpop.eup %6861 }
 0x571   : > { %6863 = vtanh.f32 %v8083_v24  ;;  %v8087_v20 = vadd.f32 %v2553_v28, %v2551_v1 }
 0x572   : > { %6865 = vrcp.f32 %v2535_v0 }
 0x573   : > { %6867 = vtanh.f32 %v8087_v20 }
 0x57b   : > { %v6864_v19 = vpop.eup %6863 }
 0x57c   : > { %v6866_v61 = vpop.eup %6865  ;;  %v2558_v22 = vmul.f32 %v6864_v19, %v6862_v6 }
 0x57d   : > { %v6868_v21 = vpop.eup %6867 }
 0x57e   : > { %v2559_v17 = vmul.f32 %v6868_v21, %v6866_v61 }
 0x580   : > { %v8090_v25 = vpack.c.bf16 %v2559_v17, %v2558_v22 }
 0x582   : > { %2799 = vmatmul.mubr.bf16.vlgmr.msra.gmra.mrb[20].mxu0 %v8090_v25  ;;  %2842 = vmatmul.mubr.bf16.vlgmr.msra.gmra.mrb[28].mxu1 %v8090_v25 }
 0x583   : > { %3115 = vmatpush1.bf16.msra.mxu0 %v7839_v29  ;;  %3158 = vmatpush1.bf16.msra.mxu1 %v7844_v30 }
 0x584   : > { %3116 = vmatprep.subr.bf16.mxu0 %v7853_v31  ;;  %3159 = vmatprep.subr.bf16.mxu1 %v7858_v32 }
 0x585   : > { %3146 = vmatprep.mubr.bf16.mxu0 %v9138_v5  ;;  %3189 = vmatprep.mubr.bf16.mxu1 %v9138_v5 }
 0x587   : > { %3117 = vmatpush1.bf16.msra.mxu0 %v7863_v33  ;;  %3160 = vmatpush1.bf16.msra.mxu1 %v7868_v34 }
 0x588   : > { %3118 = vmatprep.subr.bf16.mxu0 %v7877_v35  ;;  %3161 = vmatprep.subr.bf16.mxu1 %v7882_v37 }
 0x58b   : > { %3119 = vmatpush1.bf16.msra.mxu0 %v7887_v38  ;;  %3162 = vmatpush1.bf16.msra.mxu1 %v7892_v39 }
 0x58c   : > { %3120 = vmatprep.subr.bf16.mxu0 %v7901_v40  ;;  %3163 = vmatprep.subr.bf16.mxu1 %v7906_v41 }
 0x58f   : > { %3121 = vmatpush1.bf16.msra.mxu0 %v7911_v42  ;;  %3164 = vmatpush1.bf16.msra.mxu1 %v7916_v43 }
 0x590   : > { %3122 = vmatprep.subr.bf16.mxu0 %v7930_v46  ;;  %3165 = vmatprep.subr.bf16.mxu1 %v7940_v48 }
 0x593   : > { %3123 = vmatpush1.bf16.msra.mxu0 %v7925_v44  ;;  %3166 = vmatpush1.bf16.msra.mxu1 %v7935_v47 }
 0x594   : > { %3124 = vmatprep.subr.bf16.mxu0 %v7945_v49  ;;  %3167 = vmatprep.subr.bf16.mxu1 %v7951_v50 }
 0x597   : > { %3125 = vmatpush1.bf16.msra.mxu0 %v7958_v51  ;;  %3168 = vmatpush1.bf16.msra.mxu1 %v7965_v52 }
 0x598   : > { %3126 = vmatprep.subr.bf16.mxu0 %v7970_v54  ;;  %3169 = vmatprep.subr.bf16.mxu1 %v7976_v55 }
 0x59b   : > { %3127 = vmatpush1.bf16.msra.mxu0 %v7982_v56  ;;  %3170 = vmatpush1.bf16.msra.mxu1 %v7989_v45 }
 0x59c   : > { %3128 = vmatprep.subr.bf16.mxu0 %v7994_v26  ;;  %3171 = vmatprep.subr.bf16.mxu1 %v8000_v36 }
 0x59f   : > { %3129 = vmatpush1.bf16.msra.mxu0 %v8006_v4  ;;  %3172 = vmatpush1.bf16.msra.mxu1 %v8013_v8 }
 0x5a0   : > { %3462 = vmatprep.subr.bf16.mxu0 %v7829_v7  ;;  %3505 = vmatprep.subr.bf16.mxu1 %v7834_v27 }
 0x655   : > { %v2800_v14 = vpop.f32.mrb[20].mxu0  ;;  %v2843_v63 = vpop.f32.mrb[28].mxu1 }
 0x656   : > { %v6230_v53 = vadd.f32 %v2800_v14, %v7684_v11  ;;  %v2802_v2 = vpop.f32.mrb[21].mxu0  ;;  %v2845_v62 = vpop.f32.mrb[29].mxu1  ;;  %v6270_v61 = vadd.f32 %v2843_v63, %v7698_v10 }
 0x657   : > { %v6231_v18 = vadd.f32 %v2802_v2, %v7688_v12  ;;  %v2804_v23 = vpop.f32.mrb[22].mxu0  ;;  %v2847_v15 = vpop.f32.mrb[30].mxu1  ;;  %v6271_v22 = vadd.f32 %v2845_v62, %v7702_v16 }
 0x658   : > { %v5967_v28 = vmul.f32 -1.442695, %v6230_v53  ;;  %v6232_v3 = vadd.f32 %v2804_v23, %v7684_v11  ;;  %v2806_v0 = vpop.f32.mrb[23].mxu0  ;;  %v2849_v1 = vpop.f32.mrb[31].mxu1  ;;  %v6272_v21 = vadd.f32 %v2847_v15, %v7698_v10  ;;  %v5969_v17 = vmul.f32 -1.442695, %v6270_v61 }
 0x659   : > { %v5968_v6 = vmul.f32 -1.442695, %v6231_v18  ;;  %v6233_v7 = vadd.f32 %v2806_v0, %v7688_v12  ;;  %v6273_v2 = vadd.f32 %v2849_v1, %v7702_v16 }
 0x65a   : > { %6869 = vpow2.f32 %v5967_v28  ;;  %v5970_v27 = vmul.f32 -1.442695, %v6232_v3  ;;  %v5972_v14 = vmul.f32 -1.442695, %v6272_v21 }
 0x65b   : > { %v5971_v19 = vmul.f32 -1.442695, %v6233_v7  ;;  %6871 = vpow2.f32 %v5968_v6 }
 0x65c   : > { %6873 = vpow2.f32 %v5970_v27 }
 0x65d   : > { %6875 = vpow2.f32 %v5971_v19 }
 0x65e   : > { %6877 = vtanh.f32 %v6271_v22 }
 0x65f   : > { %6879 = vpow2.f32 %v5969_v17 }
 0x660   : > { %6881 = vpow2.f32 %v5972_v14 }
 0x664   : > { %v6870_v53 = vpop.eup %6869 }
 0x665   : > { %v2878_v18 = vadd.f32 1.0, %v6870_v53  ;;  %v6872_v23 = vpop.eup %6871 }
 0x666   : > { %v6874_v28 = vpop.eup %6873  ;;  %v2879_v3 = vadd.f32 1.0, %v6872_v23 }
 0x667   : > { %6883 = vrcp.f32 %v2878_v18  ;;  %v2881_v63 = vadd.f32 1.0, %v6874_v28  ;;  %v6876_v0 = vpop.eup %6875 }
 0x668   : > { %6885 = vtanh.f32 %v6273_v2  ;;  %v2882_v15 = vadd.f32 1.0, %v6876_v0  ;;  %v6878_v62 = vpop.eup %6877 }
 0x669   : > { %6887 = vrcp.f32 %v2879_v3  ;;  %v6880_v6 = vpop.eup %6879 }
 0x66a   : > { %6889 = vrcp.f32 %v2881_v63  ;;  %v6882_v7 = vpop.eup %6881  ;;  %v2880_v22 = vadd.f32 1.0, %v6880_v6 }
 0x66b   : > { %6891 = vrcp.f32 %v2882_v15  ;;  %v2883_v2 = vadd.f32 1.0, %v6882_v7 }
 0x66c   : > { %6893 = vrcp.f32 %v2880_v22 }
 0x671   : > { %v6884_v27 = vpop.eup %6883 }
 0x672   : > { %v6886_v19 = vpop.eup %6885  ;;  %v2900_v1 = vmul.f32 %v6884_v27, %v6878_v62 }
 0x673   : > { %v6888_v61 = vpop.eup %6887 }
 0x674   : > { %v6890_v21 = vpop.eup %6889  ;;  %v2898_v17 = vmul.f32 %v6888_v61, %v8083_v24 }
 0x675   : > { %v2901_v14 = vmul.f32 %v6890_v21, %v6886_v19  ;;  %v6892_v53 = vpop.eup %6891 }
 0x676   : > { %v8137_v18 = vadd.f32 %v2900_v1, %v2898_v17  ;;  %v2899_v23 = vmul.f32 %v6892_v53, %v8087_v20  ;;  %v6894_v3 = vpop.eup %6893 }
 0x678   : > { %6895 = vtanh.f32 %v8137_v18  ;;  %v8141_v28 = vadd.f32 %v2901_v14, %v2899_v23 }
 0x679   : > { %6897 = vrcp.f32 %v2883_v2 }
 0x67a   : > { %6899 = vtanh.f32 %v8141_v28 }
 0x682   : > { %v6896_v63 = vpop.eup %6895 }
 0x683   : > { %v6898_v0 = vpop.eup %6897  ;;  %v2906_v24 = vmul.f32 %v6896_v63, %v6894_v3 }
 0x684   : > { %v6900_v15 = vpop.eup %6899 }
 0x685   : > { %v2907_v62 = vmul.f32 %v6900_v15, %v6898_v0 }
 0x687   : > { %v8144_v6 = vpack.c.bf16 %v2907_v62, %v2906_v24 }
 0x689   : > { %3147 = vmatmul.mubr.bf16.vlgmr.msra.gmra.mrb[24].mxu0 %v8144_v6  ;;  %3190 = vmatmul.mubr.bf16.vlgmr.msra.gmra.mrb[32].mxu1 %v8144_v6 }
 0x68a   : > { %3463 = vmatpush1.bf16.msra.mxu0 %v7839_v29  ;;  %3506 = vmatpush1.bf16.msra.mxu1 %v7844_v30  ;;  %v6607_v29 = vld [vmem:[%s9115_s4 + $0x4] ss:$16 sps:$4 sm:$0xff]   ;;  %v6610_v30 = vld [vmem:[%s9115_s4 + $0xc] ss:$16 sps:$4 sm:$0xff]  }
 0x68b   : > { %3464 = vmatprep.subr.bf16.mxu0 %v7853_v31  ;;  %3507 = vmatprep.subr.bf16.mxu1 %v7858_v32  ;;  %v629_v31 = vadd.f32 %v7659_v57, %v7684_v11  ;;  %v631_v32 = vadd.f32 %v7661_v58, %v7688_v12 }
 0x68c   : > { %3494 = vmatprep.mubr.bf16.mxu0 %v9138_v5  ;;  %3537 = vmatprep.mubr.bf16.mxu1 %v9138_v5 }
 0x68e   : > { %3465 = vmatpush1.bf16.msra.mxu0 %v7863_v33  ;;  %3508 = vmatpush1.bf16.msra.mxu1 %v7868_v34 }
 0x68f   : > { %3466 = vmatprep.subr.bf16.mxu0 %v7877_v35  ;;  %3509 = vmatprep.subr.bf16.mxu1 %v7882_v37  ;;  %v633_v35 = vadd.f32 %v7663_v59, %v7684_v11 }
 0x692   : > { %3467 = vmatpush1.bf16.msra.mxu0 %v7887_v38  ;;  %3510 = vmatpush1.bf16.msra.mxu1 %v7892_v39 }
 0x693   : > { %3468 = vmatprep.subr.bf16.mxu0 %v7901_v40  ;;  %3511 = vmatprep.subr.bf16.mxu1 %v7906_v41  ;;  %v635_v40 = vadd.f32 %v7665_v60, %v7688_v12 }
 0x696   : > { %3469 = vmatpush1.bf16.msra.mxu0 %v7911_v42  ;;  %3512 = vmatpush1.bf16.msra.mxu1 %v7916_v43 }
 0x697   : > { %3470 = vmatprep.subr.bf16.mxu0 %v7930_v46  ;;  %3513 = vmatprep.subr.bf16.mxu1 %v7940_v48 }
 0x69a   : > { %3471 = vmatpush1.bf16.msra.mxu0 %v7925_v44  ;;  %3514 = vmatpush1.bf16.msra.mxu1 %v7935_v47 }
 0x69b   : > { %3472 = vmatprep.subr.bf16.mxu0 %v7945_v49  ;;  %3515 = vmatprep.subr.bf16.mxu1 %v7951_v50 }
 0x69e   : > { %3473 = vmatpush1.bf16.msra.mxu0 %v7958_v51  ;;  %3516 = vmatpush1.bf16.msra.mxu1 %v7965_v52 }
 0x69f   : > { %3474 = vmatprep.subr.bf16.mxu0 %v7970_v54  ;;  %3517 = vmatprep.subr.bf16.mxu1 %v7976_v55 }
 0x6a2   : > { %3475 = vmatpush1.bf16.msra.mxu0 %v7982_v56  ;;  %3518 = vmatpush1.bf16.msra.mxu1 %v7989_v45 }
 0x6a3   : > { %3476 = vmatprep.subr.bf16.mxu0 %v7994_v26  ;;  %3519 = vmatprep.subr.bf16.mxu1 %v8000_v36 }
 0x6a6   : > { %3477 = vmatpush1.bf16.msra.mxu0 %v8006_v4  ;;  %3520 = vmatpush1.bf16.msra.mxu1 %v8013_v8 }
 0x6a7   : > { %3829 = vmatprep.subr.bf16.mxu0 %v6607_v29  ;;  %3942 = vmatprep.subr.bf16.mxu1 %v6610_v30 }
 0x75c   : > { %v3148_v33 = vpop.f32.mrb[24].mxu0  ;;  %v3191_v34 = vpop.f32.mrb[32].mxu1 }
 0x75d   : > { %v3200_v37 = vadd.f32 %v3148_v33, %v629_v31  ;;  %v3150_v38 = vpop.f32.mrb[25].mxu0  ;;  %v3193_v39 = vpop.f32.mrb[33].mxu1  ;;  %v6274_v59 = vadd.f32 %v3191_v34, %v7698_v10  ;;  %v6605_v33 = vld [vmem:[%s9115_s4] ss:$16 sps:$4 sm:$0xff]  }
 0x75e   : > { %v3201_v41 = vadd.f32 %v3150_v38, %v631_v32  ;;  %v3152_v42 = vpop.f32.mrb[26].mxu0  ;;  %v3195_v43 = vpop.f32.mrb[34].mxu1  ;;  %v6275_v60 = vadd.f32 %v3193_v39, %v7702_v16  ;;  %v6611_v38 = vld [vmem:[%s9115_s4 + $0x20] ss:$16 sps:$4 sm:$0xff]   ;;  %v6614_v39 = vld [vmem:[%s9115_s4 + $0x28] ss:$16 sps:$4 sm:$0xff]  }
 0x75f   : > { %v6005_v44 = vmul.f32 -1.442695, %v3200_v37  ;;  %v3204_v46 = vadd.f32 %v3152_v42, %v633_v35  ;;  %v3154_v57 = vpop.f32.mrb[27].mxu0  ;;  %v3197_v47 = vpop.f32.mrb[35].mxu1  ;;  %v6276_v51 = vadd.f32 %v3195_v43, %v7698_v10  ;;  %v6007_v52 = vmul.f32 -1.442695, %v6274_v59 }
 0x760   : > { %v6006_v48 = vmul.f32 -1.442695, %v3201_v41  ;;  %v3205_v58 = vadd.f32 %v3154_v57, %v635_v40  ;;  %v6277_v56 = vadd.f32 %v3197_v47, %v7702_v16  ;;  %v6613_v35 = vld [vmem:[%s9115_s4 + $0x24] ss:$16 sps:$4 sm:$0xff]   ;;  %v6616_v37 = vld [vmem:[%s9115_s4 + $0x2c] ss:$16 sps:$4 sm:$0xff]  }
 0x761   : > { %6901 = vpow2.f32 %v6005_v44  ;;  %v6008_v49 = vmul.f32 -1.442695, %v3204_v46  ;;  %v6010_v54 = vmul.f32 -1.442695, %v6276_v51  ;;  %v6619_v40 = vld [vmem:[%s9115_s4 + $0x44] ss:$16 sps:$4 sm:$0xff]  }
 0x762   : > { %v6009_v50 = vmul.f32 -1.442695, %v3205_v58  ;;  %6903 = vpow2.f32 %v6006_v48  ;;  %v6622_v41 = vld [vmem:[%s9115_s4 + $0x4c] ss:$16 sps:$4 sm:$0xff]   ;;  %v6617_v42 = vld [vmem:[%s9115_s4 + $0x40] ss:$16 sps:$4 sm:$0xff]  }
 0x763   : > { %6905 = vpow2.f32 %v6008_v49  ;;  %v6620_v43 = vld [vmem:[%s9115_s4 + $0x48] ss:$16 sps:$4 sm:$0xff]   ;;  %v6625_v44 = vld [vmem:[%s9115_s4 + $0x64] ss:$16 sps:$4 sm:$0xff]   ;;  %v6628_v46 = vld [vmem:[%s9115_s4 + $0x6c] ss:$16 sps:$4 sm:$0xff]  }
 0x764   : > { %6907 = vpow2.f32 %v6009_v50  ;;  %v6623_v57 = vld [vmem:[%s9115_s4 + $0x60] ss:$16 sps:$4 sm:$0xff]   ;;  %v6626_v47 = vld [vmem:[%s9115_s4 + $0x68] ss:$16 sps:$4 sm:$0xff]   ;;  %v6631_v48 = vld [vmem:[%s9115_s4 + $0x84] ss:$16 sps:$4 sm:$0xff]  }
 0x765   : > { %6909 = vtanh.f32 %v6275_v60  ;;  %v6634_v58 = vld [vmem:[%s9115_s4 + $0x8c] ss:$16 sps:$4 sm:$0xff]   ;;  %v6629_v49 = vld [vmem:[%s9115_s4 + $0x80] ss:$16 sps:$4 sm:$0xff]   ;;  %v6632_v50 = vld [vmem:[%s9115_s4 + $0x88] ss:$16 sps:$4 sm:$0xff]  }
 0x766   : > { %6911 = vpow2.f32 %v6007_v52  ;;  %v6637_v59 = vld [vmem:[%s9115_s4 + $0xa4] ss:$16 sps:$4 sm:$0xff]   ;;  %v6640_v51 = vld [vmem:[%s9115_s4 + $0xac] ss:$16 sps:$4 sm:$0xff]   ;;  %v6635_v60 = vld [vmem:[%s9115_s4 + $0xa0] ss:$16 sps:$4 sm:$0xff]  }
 0x767   : > { %6913 = vpow2.f32 %v6010_v54  ;;  %v6638_v52 = vld [vmem:[%s9115_s4 + $0xa8] ss:$16 sps:$4 sm:$0xff]   ;;  %v6643_v54 = vld [vmem:[%s9115_s4 + $0xc4] ss:$16 sps:$4 sm:$0xff]  }
 0x76b   : > { %v6902_v55 = vpop.eup %6901 }
 0x76c   : > { %v3226_v45 = vadd.f32 1.0, %v6902_v55  ;;  %v6904_v26 = vpop.eup %6903  ;;  %v6646_v55 = vld [vmem:[%s9115_s4 + $0xcc] ss:$16 sps:$4 sm:$0xff]  }
 0x76d   : > { %v6906_v36 = vpop.eup %6905  ;;  %v3227_v4 = vadd.f32 1.0, %v6904_v26  ;;  %v6649_v26 = vld [vmem:[%s9115_s4 + $0xe4] ss:$16 sps:$4 sm:$0xff]  }
 0x76e   : > { %6915 = vrcp.f32 %v3226_v45  ;;  %v3229_v8 = vadd.f32 1.0, %v6906_v36  ;;  %v6908_v20 = vpop.eup %6907  ;;  %v6644_v45 = vld [vmem:[%s9115_s4 + $0xc8] ss:$16 sps:$4 sm:$0xff]   ;;  %v6652_v36 = vld [vmem:[%s9115_s4 + $0xec] ss:$16 sps:$4 sm:$0xff]  }
 0x76f   : > { %6917 = vtanh.f32 %v6277_v56  ;;  %v3230_v7 = vadd.f32 1.0, %v6908_v20  ;;  %v6910_v27 = vpop.eup %6909  ;;  %v6641_v56 = vld [vmem:[%s9115_s4 + $0xc0] ss:$16 sps:$4 sm:$0xff]   ;;  %v8305_v20 = vld [vmem:[%s9116_s5 + $0x4] ss:$16 sps:$4 sm:$0xff]  }
 0x770   : > { %6919 = vrcp.f32 %v3227_v4  ;;  %v6912_v19 = vpop.eup %6911  ;;  %v6647_v4 = vld [vmem:[%s9115_s4 + $0xe0] ss:$16 sps:$4 sm:$0xff]  }
 0x771   : > { %6921 = vrcp.f32 %v3229_v8  ;;  %v6914_v1 = vpop.eup %6913  ;;  %v3228_v53 = vadd.f32 1.0, %v6912_v19  ;;  %v6650_v8 = vld [vmem:[%s9115_s4 + $0xe8] ss:$16 sps:$4 sm:$0xff]   ;;  %v8362_v19 = vld [vmem:[%s9116_s5 + $0x2c] ss:$16 sps:$4 sm:$0xff]  }
 0x772   : > { %6923 = vrcp.f32 %v3230_v7  ;;  %v3231_v0 = vadd.f32 1.0, %v6914_v1  ;;  %v8311_v7 = vld [vmem:[%s9116_s5] ss:$16 sps:$4 sm:$0xff]  }
 0x773   : > { %6925 = vrcp.f32 %v3228_v53  ;;  %v8367_v1 = vld [vmem:[%s9116_s5 + $0x20] ss:$16 sps:$4 sm:$0xff]   ;;  %v8402_v53 = vld [vmem:[%s9116_s5 + $0x48] ss:$16 sps:$4 sm:$0xff]  }
 0x778   : > { %v6916_v61 = vpop.eup %6915 }
 0x779   : > { %v6918_v21 = vpop.eup %6917  ;;  %v3248_v22 = vmul.f32 %v6916_v61, %v6910_v27  ;;  %v9141_v27 = vld [vmem:[#allocation9_spill] sm:$0xff] }
 0x77a   : > { %v6920_v17 = vpop.eup %6919  ;;  %v8372_v61 = vld [vmem:[%s9116_s5 + $0x28] ss:$16 sps:$4 sm:$0xff]  }
 0x77b   : > { %v6922_v14 = vpop.eup %6921  ;;  %v3246_v2 = vmul.f32 %v6920_v17, %v8137_v18  ;;  %v8391_v17 = vld [vmem:[%s9116_s5 + $0x64] ss:$16 sps:$4 sm:$0xff]  }
 0x77c   : > { %v3249_v23 = vmul.f32 %v6922_v14, %v6918_v21  ;;  %v6924_v3 = vpop.eup %6923  ;;  %v8381_v21 = vld [vmem:[%s9116_s5 + $0x44] ss:$16 sps:$4 sm:$0xff]   ;;  %v8396_v14 = vld [vmem:[%s9116_s5 + $0x4c] ss:$16 sps:$4 sm:$0xff]  }
 0x77d   : > { %v8199_v63 = vadd.f32 %v3248_v22, %v3246_v2  ;;  %v3247_v15 = vmul.f32 %v6924_v3, %v8141_v28  ;;  %v6926_v62 = vpop.eup %6925  ;;  %v6608_v28 = vld [vmem:[%s9115_s4 + $0x8] ss:$16 sps:$4 sm:$0xff]   ;;  %v8386_v22 = vld [vmem:[%s9116_s5 + $0x40] ss:$16 sps:$4 sm:$0xff]   ;;  %v8407_v2 = vld [vmem:[%s9116_s5 + $0x6c] ss:$16 sps:$4 sm:$0xff]  }
 0x77e   : > { %v8420_v3 = vld [vmem:[%s9116_s5 + $0x84] ss:$16 sps:$4 sm:$0xff]  }
 0x77f   : > { %6927 = vtanh.f32 %v8199_v63  ;;  %v8203_v24 = vadd.f32 %v3249_v23, %v3247_v15  ;;  %v8413_v23 = vld [vmem:[%s9116_s5 + $0x60] ss:$16 sps:$4 sm:$0xff]   ;;  %v8432_v15 = vld [vmem:[%s9116_s5 + $0x8c] ss:$16 sps:$4 sm:$0xff]  }
 0x780   : > { %6929 = vrcp.f32 %v3231_v0  ;;  %v8426_v0 = vld [vmem:[%s9116_s5 + $0x68] ss:$16 sps:$4 sm:$0xff]  }
 0x781   : > { %6931 = vtanh.f32 %v8203_v24 }
 0x789   : > { %v6928_v29 = vpop.eup %6927 }
 0x78a   : > { %v6930_v30 = vpop.eup %6929  ;;  %v3254_v18 = vmul.f32 %v6928_v29, %v6926_v62  ;;  %v8438_v62 = vld [vmem:[%s9116_s5 + $0x80] ss:$16 sps:$4 sm:$0xff]   ;;  %v8444_v29 = vld [vmem:[%s9116_s5 + $0xa4] ss:$16 sps:$4 sm:$0xff]  }
 0x78b   : > { %v6932_v31 = vpop.eup %6931 }
 0x78c   : > { %v3255_v32 = vmul.f32 %v6932_v31, %v6930_v30  ;;  %v8450_v30 = vld [vmem:[%s9116_s5 + $0x88] ss:$16 sps:$4 sm:$0xff]   ;;  %v8456_v31 = vld [vmem:[%s9116_s5 + $0xac] ss:$16 sps:$4 sm:$0xff]  }
 0x78e   : > { %v8212_v34 = vpack.c.bf16 %v3255_v32, %v3254_v18  ;;  %v8462_v18 = vld [vmem:[%s9116_s5 + $0xa0] ss:$16 sps:$4 sm:$0xff]   ;;  %v8468_v32 = vld [vmem:[%s9116_s5 + $0xc4] ss:$16 sps:$4 sm:$0xff]  }
 0x790   : > { %3495 = vmatmul.mubr.bf16.vlgmr.msra.gmra.mrb[28].mxu0 %v8212_v34  ;;  %3538 = vmatmul.mubr.bf16.vlgmr.msra.gmra.mrb[36].mxu1 %v8212_v34 }
 0x791   : > { %3830 = vmatpush1.bf16.msra.mxu0 %v6605_v33  ;;  %3943 = vmatpush1.bf16.msra.mxu1 %v6608_v28  ;;  %v8474_v33 = vld [vmem:[%s9116_s5 + $0xa8] ss:$16 sps:$4 sm:$0xff]   ;;  %v8481_v28 = vld [vmem:[%s9116_s5 + $0xc0] ss:$16 sps:$4 sm:$0xff]  }
 0x792   : > { %3831 = vmatprep.subr.bf16.mxu0 %v6613_v35  ;;  %3944 = vmatprep.subr.bf16.mxu1 %v6616_v37  ;;  %v8493_v35 = vld [vmem:[%s9116_s5 + $0xe4] ss:$16 sps:$4 sm:$0xff]   ;;  %v8498_v37 = vld [vmem:[%s9116_s5 + $0xc8] ss:$16 sps:$4 sm:$0xff]  }
 0x793   : > { %3861 = vmatprep.mubr.bf16.mxu0 %v9138_v5  ;;  %3974 = vmatprep.mubr.bf16.mxu1 %v9138_v5 }
 0x795   : > { %3832 = vmatpush1.bf16.msra.mxu0 %v6611_v38  ;;  %3945 = vmatpush1.bf16.msra.mxu1 %v6614_v39  ;;  %v8504_v38 = vld [vmem:[%s9116_s5 + $0xec] ss:$16 sps:$4 sm:$0xff]   ;;  %v8510_v39 = vld [vmem:[%s9116_s5 + $0xe0] ss:$16 sps:$4 sm:$0xff]  }
 0x796   : > { %3833 = vmatprep.subr.bf16.mxu0 %v6619_v40  ;;  %3946 = vmatprep.subr.bf16.mxu1 %v6622_v41  ;;  %v8517_v40 = vld [vmem:[%s9116_s5 + $0xe8] ss:$16 sps:$4 sm:$0xff]   ;;  %v9143_v41 = vld [vmem:[#allocation4_spill] sm:$0xff] }
 0x799   : > { %3834 = vmatpush1.bf16.msra.mxu0 %v6617_v42  ;;  %3947 = vmatpush1.bf16.msra.mxu1 %v6620_v43  ;;  %v639_v42 = vadd.f32 %v9143_v41, %v7684_v11  ;;  %v9144_v43 = vld [vmem:[#allocation5_spill] sm:$0xff] }
 0x79a   : > { %3835 = vmatprep.subr.bf16.mxu0 %v6625_v44  ;;  %3948 = vmatprep.subr.bf16.mxu1 %v6628_v46  ;;  %v641_v44 = vadd.f32 %v9144_v43, %v7688_v12 }
 0x79d   : > { %3836 = vmatpush1.bf16.msra.mxu0 %v6623_v57  ;;  %3949 = vmatpush1.bf16.msra.mxu1 %v6626_v47  ;;  %v9145_v47 = vld [vmem:[#allocation6_spill] sm:$0xff] }
 0x79e   : > { %3837 = vmatprep.subr.bf16.mxu0 %v6631_v48  ;;  %3950 = vmatprep.subr.bf16.mxu1 %v6634_v58  ;;  %v643_v48 = vadd.f32 %v9145_v47, %v7684_v11 }
 0x7a1   : > { %3838 = vmatpush1.bf16.msra.mxu0 %v6629_v49  ;;  %3951 = vmatpush1.bf16.msra.mxu1 %v6632_v50 }
 0x7a2   : > { %3839 = vmatprep.subr.bf16.mxu0 %v6637_v59  ;;  %3952 = vmatprep.subr.bf16.mxu1 %v6640_v51  ;;  %v9146_v59 = vld [vmem:[#allocation7_spill] sm:$0xff] }
 0x7a3   : > { %v645_v51 = vadd.f32 %v9146_v59, %v7688_v12 }
 0x7a5   : > { %3840 = vmatpush1.bf16.msra.mxu0 %v6635_v60  ;;  %3953 = vmatpush1.bf16.msra.mxu1 %v6638_v52 }
 0x7a6   : > { %3841 = vmatprep.subr.bf16.mxu0 %v6643_v54  ;;  %3954 = vmatprep.subr.bf16.mxu1 %v6646_v55 }
 0x7a9   : > { %3842 = vmatpush1.bf16.msra.mxu0 %v6641_v56  ;;  %3955 = vmatpush1.bf16.msra.mxu1 %v6644_v45 }
 0x7aa   : > { %3843 = vmatprep.subr.bf16.mxu0 %v6649_v26  ;;  %3956 = vmatprep.subr.bf16.mxu1 %v6652_v36 }
 0x7ad   : > { %3844 = vmatpush1.bf16.msra.mxu0 %v6647_v4  ;;  %3957 = vmatpush1.bf16.msra.mxu1 %v6650_v8 }
 0x7ae   : > { %4319 = vmatprep.subr.bf16.mxu0 %v8305_v20 }
 0x7b0   : > { %3862 = vmatmul.mubr.bf16.vlgmr.msra.gmra.mrb[32].mxu0 %v7714_v13  ;;  %3975 = vmatmul.mubr.bf16.vlgmr.msra.gmra.mrb[40].mxu1 %v7714_v13  ;;  %v9142_v13 = vld [vmem:[#allocation10_spill] sm:$0xff] }
 0x7b1   : > { %3871 = vmatprep.mubr.bf16.mxu0 %v9138_v5  ;;  %3984 = vmatprep.mubr.bf16.mxu1 %v9138_v5 }
 0x7b2   : > { %4320 = vmatpush1.bf16.msra.mxu0 %v8311_v7 }
 0x7b8   : > { %3872 = vmatmul.mubr.bf16.gmra.mrb[36].mxu0 %v7768_v9  ;;  %3985 = vmatmul.mubr.bf16.gmra.mrb[44].mxu1 %v7768_v9  ;;  %v8345_v9 = vld [vmem:[%s9116_s5 + $0xc] ss:$16 sps:$4 sm:$0xff]  }
 0x7b9   : > { %3881 = vmatprep.mubr.bf16.mxu0 %v9138_v5  ;;  %3994 = vmatprep.mubr.bf16.mxu1 %v9138_v5 }
 0x7ba   : > { %4362 = vmatprep.subr.bf16.mxu1 %v8345_v9 }
 0x7c0   : > { %3882 = vmatmul.mubr.bf16.gmra.mrb[40].mxu0 %v9141_v27  ;;  %3995 = vmatmul.mubr.bf16.gmra.mrb[48].mxu1 %v9141_v27 }
 0x7c1   : > { %3891 = vmatprep.mubr.bf16.mxu0 %v9138_v5  ;;  %4004 = vmatprep.mubr.bf16.mxu1 %v9138_v5 }
 0x7c8   : > { %3892 = vmatmul.mubr.bf16.gmra.mrb[44].mxu0 %v9142_v13  ;;  %4005 = vmatmul.mubr.bf16.gmra.mrb[52].mxu1 %v9142_v13 }
 0x7c9   : > { %3901 = vmatprep.mubr.bf16.mxu0 %v9138_v5  ;;  %4014 = vmatprep.mubr.bf16.mxu1 %v9138_v5 }
 0x7d0   : > { %3902 = vmatmul.mubr.bf16.gmra.mrb[48].mxu0 %v8090_v25  ;;  %4015 = vmatmul.mubr.bf16.gmra.mrb[56].mxu1 %v8090_v25  ;;  %v8350_v25 = vld [vmem:[%s9116_s5 + $0x8] ss:$16 sps:$4 sm:$0xff]  }
 0x7d1   : > { %3911 = vmatprep.mubr.bf16.mxu0 %v9138_v5  ;;  %4024 = vmatprep.mubr.bf16.mxu1 %v9138_v5 }
 0x7d2   : > { %4363 = vmatpush1.bf16.msra.mxu1 %v8350_v25 }
 0x7d3   : > { %4364 = vmatprep.subr.bf16.mxu1 %v8362_v19 }
 0x7d6   : > { %4365 = vmatpush1.bf16.msra.mxu1 %v8372_v61 }
 0x7d7   : > { %4366 = vmatprep.subr.bf16.mxu1 %v8396_v14 }
 0x7d8   : > { %3912 = vmatmul.mubr.bf16.gmra.mrb[52].mxu0 %v8144_v6  ;;  %4025 = vmatmul.mubr.bf16.gmra.mrb[60].mxu1 %v8144_v6  ;;  %v8357_v6 = vld [vmem:[%s9116_s5 + $0x24] ss:$16 sps:$4 sm:$0xff]  }
 0x7d9   : > { %3921 = vmatprep.mubr.bf16.mxu0 %v9138_v5  ;;  %4034 = vmatprep.mubr.bf16.mxu1 %v9138_v5 }
 0x7da   : > { %4321 = vmatprep.subr.bf16.mxu0 %v8357_v6  ;;  %4367 = vmatpush1.bf16.msra.mxu1 %v8402_v53 }
 0x7db   : > { %4322 = vmatpush1.bf16.msra.mxu0 %v8367_v1  ;;  %4368 = vmatprep.subr.bf16.mxu1 %v8407_v2 }
 0x7dc   : > { %4323 = vmatprep.subr.bf16.mxu0 %v8381_v21 }
 0x7de   : > { %4369 = vmatpush1.bf16.msra.mxu1 %v8426_v0 }
 0x7df   : > { %4324 = vmatpush1.bf16.msra.mxu0 %v8386_v22  ;;  %4370 = vmatprep.subr.bf16.mxu1 %v8432_v15 }
 0x7e0   : > { %3922 = vmatmul.mubr.bf16.gmra.mrb[56].mxu0 %v8212_v34  ;;  %4035 = vmatmul.mubr.bf16.gmra.mrb[64].mxu1 %v8212_v34  ;;  %v8486_v34 = vld [vmem:[%s9116_s5 + $0xcc] ss:$16 sps:$4 sm:$0xff]  }
 0x7e1   : > { %3931 = vmatprep.mubr.bf16.mxu0 %v9138_v5  ;;  %4044 = vmatprep.mubr.bf16.mxu1 %v9138_v5 }
 0x7e2   : > { %4325 = vmatprep.subr.bf16.mxu0 %v8391_v17  ;;  %4371 = vmatpush1.bf16.msra.mxu1 %v8450_v30 }
 0x7e3   : > { %4326 = vmatpush1.bf16.msra.mxu0 %v8413_v23  ;;  %4372 = vmatprep.subr.bf16.mxu1 %v8456_v31 }
 0x7e4   : > { %4327 = vmatprep.subr.bf16.mxu0 %v8420_v3 }
 0x7e6   : > { %4373 = vmatpush1.bf16.msra.mxu1 %v8474_v33 }
 0x7e7   : > { %4328 = vmatpush1.bf16.msra.mxu0 %v8438_v62  ;;  %4374 = vmatprep.subr.bf16.mxu1 %v8486_v34 }
 0x7e8   : > { %4329 = vmatprep.subr.bf16.mxu0 %v8444_v29 }
 0x7ea   : > { %4375 = vmatpush1.bf16.msra.mxu1 %v8498_v37 }
 0x7eb   : > { %4330 = vmatpush1.bf16.msra.mxu0 %v8462_v18  ;;  %4376 = vmatprep.subr.bf16.mxu1 %v8504_v38 }
 0x7ec   : > { %4331 = vmatprep.subr.bf16.mxu0 %v8468_v32 }
 0x7ee   : > { %4377 = vmatpush1.bf16.msra.mxu1 %v8517_v40 }
 0x7ef   : > { %4332 = vmatpush1.bf16.msra.mxu0 %v8481_v28  ;;  %4513 = vmatprep.subr.bf16.mxu1 %v8345_v9 }
 0x7f0   : > { %4333 = vmatprep.subr.bf16.mxu0 %v8493_v35 }
 0x7f3   : > { %4334 = vmatpush1.bf16.msra.mxu0 %v8510_v39 }
 0x7f4   : > { %4470 = vmatprep.subr.bf16.mxu0 %v8305_v20 }
 0x863   : > { %v3496_v46 = vpop.f32.mrb[28].mxu0  ;;  %v3539_v57 = vpop.f32.mrb[36].mxu1 }
 0x864   : > { %v3548_v58 = vadd.f32 %v3496_v46, %v639_v42  ;;  %v3498_v49 = vpop.f32.mrb[29].mxu0  ;;  %v3541_v50 = vpop.f32.mrb[37].mxu1  ;;  %v6278_v11 = vadd.f32 %v3539_v57, %v7698_v10 }
 0x865   : > { %v3549_v60 = vadd.f32 %v3498_v49, %v641_v44  ;;  %v3500_v52 = vpop.f32.mrb[30].mxu0  ;;  %v3543_v54 = vpop.f32.mrb[38].mxu1  ;;  %v6279_v12 = vadd.f32 %v3541_v50, %v7702_v16 }
 0x866   : > { %v6043_v55 = vmul.f32 -1.442695, %v3548_v58  ;;  %v3552_v56 = vadd.f32 %v3500_v52, %v643_v48  ;;  %v3502_v45 = vpop.f32.mrb[31].mxu0  ;;  %v3545_v26 = vpop.f32.mrb[39].mxu1  ;;  %v6280_v13 = vadd.f32 %v3543_v54, %v7698_v10  ;;  %v6045_v41 = vmul.f32 -1.442695, %v6278_v11 }
 0x867   : > { %v6044_v36 = vmul.f32 -1.442695, %v3549_v60  ;;  %v3553_v4 = vadd.f32 %v3502_v45, %v645_v51  ;;  %v6281_v44 = vadd.f32 %v3545_v26, %v7702_v16 }
 0x868   : > { %6933 = vpow2.f32 %v6043_v55  ;;  %v6046_v8 = vmul.f32 -1.442695, %v3552_v56  ;;  %v6048_v42 = vmul.f32 -1.442695, %v6280_v13 }
 0x869   : > { %v6047_v27 = vmul.f32 -1.442695, %v3553_v4  ;;  %6935 = vpow2.f32 %v6044_v36 }
 0x86a   : > { %6937 = vpow2.f32 %v6046_v8 }
 0x86b   : > { %6939 = vpow2.f32 %v6047_v27 }
 0x86c   : > { %6941 = vtanh.f32 %v6279_v12 }
 0x86d   : > { %6943 = vpow2.f32 %v6045_v41 }
 0x86e   : > { %6945 = vpow2.f32 %v6048_v42 }
 0x872   : > { %v6934_v43 = vpop.eup %6933 }
 0x873   : > { %v3574_v46 = vadd.f32 1.0, %v6934_v43  ;;  %v6936_v47 = vpop.eup %6935 }
 0x874   : > { %v6938_v48 = vpop.eup %6937  ;;  %v3575_v58 = vadd.f32 1.0, %v6936_v47 }
 0x875   : > { %6947 = vrcp.f32 %v3574_v46  ;;  %v3577_v57 = vadd.f32 1.0, %v6938_v48  ;;  %v6940_v49 = vpop.eup %6939 }
 0x876   : > { %6949 = vtanh.f32 %v6281_v44  ;;  %v3578_v10 = vadd.f32 1.0, %v6940_v49  ;;  %v6942_v50 = vpop.eup %6941 }
 0x877   : > { %6951 = vrcp.f32 %v3575_v58  ;;  %v6944_v59 = vpop.eup %6943 }
 0x878   : > { %6953 = vrcp.f32 %v3577_v57  ;;  %v6946_v51 = vpop.eup %6945  ;;  %v3576_v55 = vadd.f32 1.0, %v6944_v59 }
 0x879   : > { %6955 = vrcp.f32 %v3578_v10  ;;  %v3579_v8 = vadd.f32 1.0, %v6946_v51 }
 0x87a   : > { %6957 = vrcp.f32 %v3576_v55 }
 0x87f   : > { %v6948_v60 = vpop.eup %6947 }
 0x880   : > { %v6950_v52 = vpop.eup %6949  ;;  %v3596_v16 = vmul.f32 %v6948_v60, %v6942_v50 }
 0x881   : > { %v6952_v54 = vpop.eup %6951 }
 0x882   : > { %v6954_v56 = vpop.eup %6953  ;;  %v3594_v45 = vmul.f32 %v6952_v54, %v8199_v63  ;;  %v3647_v63 = vld [vmem:[%s9117_s6] sm:$0xf] }
 0x883   : > { %v3597_v26 = vmul.f32 %v6954_v56, %v6950_v52  ;;  %v6956_v36 = vpop.eup %6955 }
 0x884   : > { %v3598_v4 = vadd.f32 %v3596_v16, %v3594_v45  ;;  %v3595_v27 = vmul.f32 %v6956_v36, %v8203_v24  ;;  %v6958_v13 = vpop.eup %6957  ;;  %v9147_v24 = vld [vmem:[#allocation8_spill] sm:$0xff] }
 0x885   : > { %v9148_v47 = vsub.s32 0, %v9147_v24  ;;  %v9149_v58 = vsub.s32 1, %v9147_v24 }
 0x886   : > { %6959 = vtanh.f32 %v3598_v4  ;;  %v3599_v11 = vadd.f32 %v3597_v26, %v3595_v27  ;;  %v9150_v26 = vsub.s32 2, %v9147_v24 }
 0x887   : > { %6961 = vrcp.f32 %v3579_v8  ;;  %v8581_v48 = vrot.slane %v3647_v63, %v9148_v47  ;;  %v8585_v57 = vrot.slane %v3647_v63, %v9149_v58 }
 0x888   : > { %6963 = vtanh.f32 %v3599_v11  ;;  %v8592_v36 = vrot.slane %v3647_v63, %v9150_v26 }
 0x890   : > { %v6960_v12 = vpop.eup %6959 }
 0x891   : > { %v3602_v41 = vmul.f32 %v6960_v12, %v6958_v13  ;;  %v6962_v42 = vpop.eup %6961  ;;  %v9151_v13 = vsub.s32 3, %v9147_v24 }
 0x892   : > { %v6964_v43 = vpop.eup %6963 }
 0x893   : > { %v3603_v44 = vmul.f32 %v6964_v43, %v6962_v42  ;;  %v8597_v12 = vrot.slane %v3647_v63, %v9151_v13 }
 0x895   : > { %v3604_v46 = vpack.c.bf16 %v3603_v44, %v3602_v41 }
 0x897   : > { %3932 = vmatmul.mubr.bf16.gmra.mrb[60].mxu0 %v3604_v46  ;;  %4045 = vmatmul.mubr.bf16.gmra.mrb[68].mxu1 %v3604_v46 }
 0x898   : > { %4351 = vmatprep.mubr.bf16.mxu0 %v9138_v5  ;;  %4394 = vmatprep.mubr.bf16.mxu1 %v9138_v5 }
 0x89f   : > { %4352 = vmatmul.mubr.bf16.vlgmr.msra.gmra.mrb[32].mxu0 %v9138_v5  ;;  %4395 = vmatmul.mubr.bf16.vlgmr.msra.gmra.mrb[40].mxu1 %v9138_v5 }
 0x8a0   : > { %4471 = vmatpush1.bf16.msra.mxu0 %v8311_v7  ;;  %4514 = vmatpush1.bf16.msra.mxu1 %v8350_v25 }
 0x8a1   : > { %4472 = vmatprep.subr.bf16.mxu0 %v8357_v6  ;;  %4515 = vmatprep.subr.bf16.mxu1 %v8362_v19 }
 0x8a2   : > { %4502 = vmatprep.mubr.bf16.mxu0 %v9138_v5  ;;  %4545 = vmatprep.mubr.bf16.mxu1 %v9138_v5 }
 0x8a4   : > { %4473 = vmatpush1.bf16.msra.mxu0 %v8367_v1  ;;  %4516 = vmatpush1.bf16.msra.mxu1 %v8372_v61 }
 0x8a5   : > { %4474 = vmatprep.subr.bf16.mxu0 %v8381_v21  ;;  %4517 = vmatprep.subr.bf16.mxu1 %v8396_v14 }
 0x8a8   : > { %4475 = vmatpush1.bf16.msra.mxu0 %v8386_v22  ;;  %4518 = vmatpush1.bf16.msra.mxu1 %v8402_v53 }
 0x8a9   : > { %4476 = vmatprep.subr.bf16.mxu0 %v8391_v17  ;;  %4519 = vmatprep.subr.bf16.mxu1 %v8407_v2 }
 0x8ac   : > { %4477 = vmatpush1.bf16.msra.mxu0 %v8413_v23  ;;  %4520 = vmatpush1.bf16.msra.mxu1 %v8426_v0 }
 0x8ad   : > { %4478 = vmatprep.subr.bf16.mxu0 %v8420_v3  ;;  %4521 = vmatprep.subr.bf16.mxu1 %v8432_v15 }
 0x8b0   : > { %4479 = vmatpush1.bf16.msra.mxu0 %v8438_v62  ;;  %4522 = vmatpush1.bf16.msra.mxu1 %v8450_v30 }
 0x8b1   : > { %4480 = vmatprep.subr.bf16.mxu0 %v8444_v29  ;;  %4523 = vmatprep.subr.bf16.mxu1 %v8456_v31 }
 0x8b4   : > { %4481 = vmatpush1.bf16.msra.mxu0 %v8462_v18  ;;  %4524 = vmatpush1.bf16.msra.mxu1 %v8474_v33 }
 0x8b5   : > { %4482 = vmatprep.subr.bf16.mxu0 %v8468_v32  ;;  %4525 = vmatprep.subr.bf16.mxu1 %v8486_v34 }
 0x8b8   : > { %4483 = vmatpush1.bf16.msra.mxu0 %v8481_v28  ;;  %4526 = vmatpush1.bf16.msra.mxu1 %v8498_v37 }
 0x8b9   : > { %4484 = vmatprep.subr.bf16.mxu0 %v8493_v35  ;;  %4527 = vmatprep.subr.bf16.mxu1 %v8504_v38 }
 0x8bc   : > { %4485 = vmatpush1.bf16.msra.mxu0 %v8510_v39  ;;  %4528 = vmatpush1.bf16.msra.mxu1 %v8517_v40 }
 0x8bd   : > { %4621 = vmatprep.subr.bf16.mxu0 %v8305_v20  ;;  %4664 = vmatprep.subr.bf16.mxu1 %v8345_v9 }
 0x972   : > { %v4353_v49 = vpop.f32.mrb[32].mxu0  ;;  %v4396_v10 = vpop.f32.mrb[40].mxu1 }
 0x973   : > { %v6282_v50 = vadd.f32 %v4353_v49, %v8581_v48  ;;  %v4355_v59 = vpop.f32.mrb[33].mxu0  ;;  %v4398_v51 = vpop.f32.mrb[41].mxu1  ;;  %v6314_v41 = vadd.f32 %v4396_v10, %v8592_v36 }
 0x974   : > { %v6283_v60 = vadd.f32 %v4355_v59, %v8585_v57  ;;  %v4357_v52 = vpop.f32.mrb[34].mxu0  ;;  %v4400_v16 = vpop.f32.mrb[42].mxu1  ;;  %v6315_v43 = vadd.f32 %v4398_v51, %v8597_v12 }
 0x975   : > { %v6113_v54 = vmul.f32 -1.442695, %v6282_v50  ;;  %v6284_v55 = vadd.f32 %v4357_v52, %v8581_v48  ;;  %v4359_v56 = vpop.f32.mrb[35].mxu0  ;;  %v4402_v45 = vpop.f32.mrb[43].mxu1  ;;  %v6316_v42 = vadd.f32 %v4400_v16, %v8592_v36  ;;  %v6115_v44 = vmul.f32 -1.442695, %v6314_v41 }
 0x976   : > { %v6114_v4 = vmul.f32 -1.442695, %v6283_v60  ;;  %v6285_v8 = vadd.f32 %v4359_v56, %v8585_v57  ;;  %v6317_v58 = vadd.f32 %v4402_v45, %v8597_v12 }
 0x977   : > { %6965 = vpow2.f32 %v6113_v54  ;;  %v6116_v27 = vmul.f32 -1.442695, %v6284_v55  ;;  %v6118_v46 = vmul.f32 -1.442695, %v6316_v42 }
 0x978   : > { %v6117_v11 = vmul.f32 -1.442695, %v6285_v8  ;;  %6967 = vpow2.f32 %v6114_v4 }
 0x979   : > { %6969 = vpow2.f32 %v6116_v27 }
 0x97a   : > { %6971 = vpow2.f32 %v6117_v11 }
 0x97b   : > { %6973 = vtanh.f32 %v6315_v43 }
 0x97c   : > { %6975 = vpow2.f32 %v6115_v44 }
 0x97d   : > { %6977 = vpow2.f32 %v6118_v46 }
 0x981   : > { %v6966_v47 = vpop.eup %6965 }
 0x982   : > { %v4431_v49 = vadd.f32 1.0, %v6966_v47  ;;  %v6968_v50 = vpop.eup %6967 }
 0x983   : > { %v6970_v63 = vpop.eup %6969  ;;  %v4432_v24 = vadd.f32 1.0, %v6968_v50 }
 0x984   : > { %6979 = vrcp.f32 %v4431_v49  ;;  %v4434_v10 = vadd.f32 1.0, %v6970_v63  ;;  %v6972_v59 = vpop.eup %6971 }
 0x985   : > { %6981 = vtanh.f32 %v6317_v58  ;;  %v4435_v60 = vadd.f32 1.0, %v6972_v59  ;;  %v6974_v51 = vpop.eup %6973 }
 0x986   : > { %6983 = vrcp.f32 %v4432_v24  ;;  %v6976_v52 = vpop.eup %6975 }
 0x987   : > { %6985 = vrcp.f32 %v4434_v10  ;;  %v6978_v16 = vpop.eup %6977  ;;  %v4433_v4 = vadd.f32 1.0, %v6976_v52 }
 0x988   : > { %6987 = vrcp.f32 %v4435_v60  ;;  %v4436_v41 = vadd.f32 1.0, %v6978_v16 }
 0x989   : > { %6989 = vrcp.f32 %v4433_v4 }
 0x98e   : > { %v6980_v54 = vpop.eup %6979 }
 0x98f   : > { %v6982_v55 = vpop.eup %6981  ;;  %v4453_v56 = vmul.f32 %v6980_v54, %v6974_v51 }
 0x990   : > { %v6984_v45 = vpop.eup %6983 }
 0x991   : > { %v6986_v26 = vpop.eup %6985  ;;  %v4451_v8 = vmul.f32 0.0, %v6984_v45 }
 0x992   : > { %v4454_v27 = vmul.f32 %v6986_v26, %v6982_v55  ;;  %v6988_v11 = vpop.eup %6987 }
 0x993   : > { %v8603_v13 = vadd.f32 %v4453_v56, %v4451_v8  ;;  %v4452_v42 = vmul.f32 0.0, %v6988_v11  ;;  %v6990_v44 = vpop.eup %6989 }
 0x995   : > { %6991 = vtanh.f32 %v8603_v13  ;;  %v8606_v43 = vadd.f32 %v4454_v27, %v4452_v42 }
 0x996   : > { %6993 = vrcp.f32 %v4436_v41 }
 0x997   : > { %6995 = vtanh.f32 %v8606_v43 }
 0x99f   : > { %v6992_v46 = vpop.eup %6991 }
 0x9a0   : > { %v6994_v47 = vpop.eup %6993  ;;  %v4459_v49 = vmul.f32 %v6992_v46, %v6990_v44 }
 0x9a1   : > { %v6996_v58 = vpop.eup %6995 }
 0x9a2   : > { %v4460_v50 = vmul.f32 %v6996_v58, %v6994_v47 }
 0x9a4   : > { %v4469_v63 = vpack.c.bf16 %v4460_v50, %v4459_v49 }
 0x9a6   : > { %4503 = vmatmul.mubr.bf16.vlgmr.msra.gmra.mrb[36].mxu0 %v4469_v63  ;;  %4546 = vmatmul.mubr.bf16.vlgmr.msra.gmra.mrb[44].mxu1 %v4469_v63 }
 0x9a7   : > { %4622 = vmatpush1.bf16.msra.mxu0 %v8311_v7  ;;  %4665 = vmatpush1.bf16.msra.mxu1 %v8350_v25 }
 0x9a8   : > { %4623 = vmatprep.subr.bf16.mxu0 %v8357_v6  ;;  %4666 = vmatprep.subr.bf16.mxu1 %v8362_v19 }
 0x9a9   : > { %4653 = vmatprep.mubr.bf16.mxu0 %v9138_v5  ;;  %4696 = vmatprep.mubr.bf16.mxu1 %v9138_v5 }
 0x9ab   : > { %4624 = vmatpush1.bf16.msra.mxu0 %v8367_v1  ;;  %4667 = vmatpush1.bf16.msra.mxu1 %v8372_v61 }
 0x9ac   : > { %4625 = vmatprep.subr.bf16.mxu0 %v8381_v21  ;;  %4668 = vmatprep.subr.bf16.mxu1 %v8396_v14 }
 0x9af   : > { %4626 = vmatpush1.bf16.msra.mxu0 %v8386_v22  ;;  %4669 = vmatpush1.bf16.msra.mxu1 %v8402_v53 }
 0x9b0   : > { %4627 = vmatprep.subr.bf16.mxu0 %v8391_v17  ;;  %4670 = vmatprep.subr.bf16.mxu1 %v8407_v2 }
 0x9b3   : > { %4628 = vmatpush1.bf16.msra.mxu0 %v8413_v23  ;;  %4671 = vmatpush1.bf16.msra.mxu1 %v8426_v0 }
 0x9b4   : > { %4629 = vmatprep.subr.bf16.mxu0 %v8420_v3  ;;  %4672 = vmatprep.subr.bf16.mxu1 %v8432_v15 }
 0x9b7   : > { %4630 = vmatpush1.bf16.msra.mxu0 %v8438_v62  ;;  %4673 = vmatpush1.bf16.msra.mxu1 %v8450_v30 }
 0x9b8   : > { %4631 = vmatprep.subr.bf16.mxu0 %v8444_v29  ;;  %4674 = vmatprep.subr.bf16.mxu1 %v8456_v31 }
 0x9bb   : > { %4632 = vmatpush1.bf16.msra.mxu0 %v8462_v18  ;;  %4675 = vmatpush1.bf16.msra.mxu1 %v8474_v33 }
 0x9bc   : > { %4633 = vmatprep.subr.bf16.mxu0 %v8468_v32  ;;  %4676 = vmatprep.subr.bf16.mxu1 %v8486_v34 }
 0x9bf   : > { %4634 = vmatpush1.bf16.msra.mxu0 %v8481_v28  ;;  %4677 = vmatpush1.bf16.msra.mxu1 %v8498_v37 }
 0x9c0   : > { %4635 = vmatprep.subr.bf16.mxu0 %v8493_v35  ;;  %4678 = vmatprep.subr.bf16.mxu1 %v8504_v38 }
 0x9c3   : > { %4636 = vmatpush1.bf16.msra.mxu0 %v8510_v39  ;;  %4679 = vmatpush1.bf16.msra.mxu1 %v8517_v40 }
 0x9c4   : > { %4772 = vmatprep.subr.bf16.mxu0 %v8305_v20  ;;  %4815 = vmatprep.subr.bf16.mxu1 %v8345_v9 }
 0xa79   : > { %v4504_v24 = vpop.f32.mrb[36].mxu0  ;;  %v4547_v10 = vpop.f32.mrb[44].mxu1 }
 0xa7a   : > { %v6286_v59 = vadd.f32 %v4504_v24, %v8581_v48  ;;  %v4506_v60 = vpop.f32.mrb[37].mxu0  ;;  %v4549_v51 = vpop.f32.mrb[45].mxu1  ;;  %v6318_v41 = vadd.f32 %v4547_v10, %v8592_v36 }
 0xa7b   : > { %v6287_v52 = vadd.f32 %v4506_v60, %v8585_v57  ;;  %v4508_v16 = vpop.f32.mrb[38].mxu0  ;;  %v4551_v54 = vpop.f32.mrb[46].mxu1  ;;  %v6319_v44 = vadd.f32 %v4549_v51, %v8597_v12 }
 0xa7c   : > { %v6119_v55 = vmul.f32 -1.442695, %v6286_v59  ;;  %v6288_v56 = vadd.f32 %v4508_v16, %v8581_v48  ;;  %v4510_v45 = vpop.f32.mrb[39].mxu0  ;;  %v4553_v26 = vpop.f32.mrb[47].mxu1  ;;  %v6320_v42 = vadd.f32 %v4551_v54, %v8592_v36  ;;  %v6121_v46 = vmul.f32 -1.442695, %v6318_v41 }
 0xa7d   : > { %v6120_v4 = vmul.f32 -1.442695, %v6287_v52  ;;  %v6289_v8 = vadd.f32 %v4510_v45, %v8585_v57  ;;  %v6321_v49 = vadd.f32 %v4553_v26, %v8597_v12 }
 0xa7e   : > { %6997 = vpow2.f32 %v6119_v55  ;;  %v6122_v27 = vmul.f32 -1.442695, %v6288_v56  ;;  %v6124_v47 = vmul.f32 -1.442695, %v6320_v42 }
 0xa7f   : > { %v6123_v11 = vmul.f32 -1.442695, %v6289_v8  ;;  %6999 = vpow2.f32 %v6120_v4 }
 0xa80   : > { %7001 = vpow2.f32 %v6122_v27 }
 0xa81   : > { %7003 = vpow2.f32 %v6123_v11 }
 0xa82   : > { %7005 = vtanh.f32 %v6319_v44 }
 0xa83   : > { %7007 = vpow2.f32 %v6121_v46 }
 0xa84   : > { %7009 = vpow2.f32 %v6124_v47 }
 0xa88   : > { %v6998_v58 = vpop.eup %6997 }
 0xa89   : > { %v4582_v50 = vadd.f32 1.0, %v6998_v58  ;;  %v7000_v63 = vpop.eup %6999 }
 0xa8a   : > { %v7002_v24 = vpop.eup %7001  ;;  %v4583_v59 = vadd.f32 1.0, %v7000_v63 }
 0xa8b   : > { %7011 = vrcp.f32 %v4582_v50  ;;  %v4585_v10 = vadd.f32 1.0, %v7002_v24  ;;  %v7004_v60 = vpop.eup %7003 }
 0xa8c   : > { %7013 = vtanh.f32 %v6321_v49  ;;  %v4586_v52 = vadd.f32 1.0, %v7004_v60  ;;  %v7006_v51 = vpop.eup %7005 }
 0xa8d   : > { %7015 = vrcp.f32 %v4583_v59  ;;  %v7008_v16 = vpop.eup %7007 }
 0xa8e   : > { %7017 = vrcp.f32 %v4585_v10  ;;  %v7010_v54 = vpop.eup %7009  ;;  %v4584_v8 = vadd.f32 1.0, %v7008_v16 }
 0xa8f   : > { %7019 = vrcp.f32 %v4586_v52  ;;  %v4587_v44 = vadd.f32 1.0, %v7010_v54 }
 0xa90   : > { %7021 = vrcp.f32 %v4584_v8 }
 0xa95   : > { %v7012_v55 = vpop.eup %7011 }
 0xa96   : > { %v7014_v56 = vpop.eup %7013  ;;  %v4604_v45 = vmul.f32 %v7012_v55, %v7006_v51 }
 0xa97   : > { %v7016_v26 = vpop.eup %7015 }
 0xa98   : > { %v7018_v4 = vpop.eup %7017  ;;  %v4602_v27 = vmul.f32 %v7016_v26, %v8603_v13 }
 0xa99   : > { %v4605_v11 = vmul.f32 %v7018_v4, %v7014_v56  ;;  %v7020_v41 = vpop.eup %7019 }
 0xa9a   : > { %v8652_v42 = vadd.f32 %v4604_v45, %v4602_v27  ;;  %v4603_v46 = vmul.f32 %v7020_v41, %v8606_v43  ;;  %v7022_v58 = vpop.eup %7021 }
 0xa9c   : > { %7023 = vtanh.f32 %v8652_v42  ;;  %v8656_v47 = vadd.f32 %v4605_v11, %v4603_v46 }
 0xa9d   : > { %7025 = vrcp.f32 %v4587_v44 }
 0xa9e   : > { %7027 = vtanh.f32 %v8656_v47 }
 0xaa6   : > { %v7024_v49 = vpop.eup %7023 }
 0xaa7   : > { %v7026_v50 = vpop.eup %7025  ;;  %v4610_v13 = vmul.f32 %v7024_v49, %v7022_v58 }
 0xaa8   : > { %v7028_v63 = vpop.eup %7027 }
 0xaa9   : > { %v4611_v24 = vmul.f32 %v7028_v63, %v7026_v50 }
 0xaab   : > { %v4620_v59 = vpack.c.bf16 %v4611_v24, %v4610_v13 }
 0xaad   : > { %4654 = vmatmul.mubr.bf16.vlgmr.msra.gmra.mrb[40].mxu0 %v4620_v59  ;;  %4697 = vmatmul.mubr.bf16.vlgmr.msra.gmra.mrb[48].mxu1 %v4620_v59 }
 0xaae   : > { %4773 = vmatpush1.bf16.msra.mxu0 %v8311_v7  ;;  %4816 = vmatpush1.bf16.msra.mxu1 %v8350_v25 }
 0xaaf   : > { %4774 = vmatprep.subr.bf16.mxu0 %v8357_v6  ;;  %4817 = vmatprep.subr.bf16.mxu1 %v8362_v19 }
 0xab0   : > { %4804 = vmatprep.mubr.bf16.mxu0 %v9138_v5  ;;  %4847 = vmatprep.mubr.bf16.mxu1 %v9138_v5 }
 0xab2   : > { %4775 = vmatpush1.bf16.msra.mxu0 %v8367_v1  ;;  %4818 = vmatpush1.bf16.msra.mxu1 %v8372_v61 }
 0xab3   : > { %4776 = vmatprep.subr.bf16.mxu0 %v8381_v21  ;;  %4819 = vmatprep.subr.bf16.mxu1 %v8396_v14 }
 0xab6   : > { %4777 = vmatpush1.bf16.msra.mxu0 %v8386_v22  ;;  %4820 = vmatpush1.bf16.msra.mxu1 %v8402_v53 }
 0xab7   : > { %4778 = vmatprep.subr.bf16.mxu0 %v8391_v17  ;;  %4821 = vmatprep.subr.bf16.mxu1 %v8407_v2 }
 0xaba   : > { %4779 = vmatpush1.bf16.msra.mxu0 %v8413_v23  ;;  %4822 = vmatpush1.bf16.msra.mxu1 %v8426_v0 }
 0xabb   : > { %4780 = vmatprep.subr.bf16.mxu0 %v8420_v3  ;;  %4823 = vmatprep.subr.bf16.mxu1 %v8432_v15 }
 0xabe   : > { %4781 = vmatpush1.bf16.msra.mxu0 %v8438_v62  ;;  %4824 = vmatpush1.bf16.msra.mxu1 %v8450_v30 }
 0xabf   : > { %4782 = vmatprep.subr.bf16.mxu0 %v8444_v29  ;;  %4825 = vmatprep.subr.bf16.mxu1 %v8456_v31 }
 0xac2   : > { %4783 = vmatpush1.bf16.msra.mxu0 %v8462_v18  ;;  %4826 = vmatpush1.bf16.msra.mxu1 %v8474_v33 }
 0xac3   : > { %4784 = vmatprep.subr.bf16.mxu0 %v8468_v32  ;;  %4827 = vmatprep.subr.bf16.mxu1 %v8486_v34 }
 0xac6   : > { %4785 = vmatpush1.bf16.msra.mxu0 %v8481_v28  ;;  %4828 = vmatpush1.bf16.msra.mxu1 %v8498_v37 }
 0xac7   : > { %4786 = vmatprep.subr.bf16.mxu0 %v8493_v35  ;;  %4829 = vmatprep.subr.bf16.mxu1 %v8504_v38 }
 0xaca   : > { %4787 = vmatpush1.bf16.msra.mxu0 %v8510_v39  ;;  %4830 = vmatpush1.bf16.msra.mxu1 %v8517_v40 }
 0xacb   : > { %4923 = vmatprep.subr.bf16.mxu0 %v8305_v20  ;;  %4966 = vmatprep.subr.bf16.mxu1 %v8345_v9 }
 0xb80   : > { %v4655_v43 = vpop.f32.mrb[40].mxu0  ;;  %v4698_v10 = vpop.f32.mrb[48].mxu1 }
 0xb81   : > { %v6290_v60 = vadd.f32 %v4655_v43, %v8581_v48  ;;  %v4657_v52 = vpop.f32.mrb[41].mxu0  ;;  %v4700_v51 = vpop.f32.mrb[49].mxu1  ;;  %v6322_v41 = vadd.f32 %v4698_v10, %v8592_v36 }
 0xb82   : > { %v6291_v16 = vadd.f32 %v4657_v52, %v8585_v57  ;;  %v4659_v54 = vpop.f32.mrb[42].mxu0  ;;  %v4702_v55 = vpop.f32.mrb[50].mxu1  ;;  %v6323_v46 = vadd.f32 %v4700_v51, %v8597_v12 }
 0xb83   : > { %v6125_v56 = vmul.f32 -1.442695, %v6290_v60  ;;  %v6292_v45 = vadd.f32 %v4659_v54, %v8581_v48  ;;  %v4661_v26 = vpop.f32.mrb[43].mxu0  ;;  %v4704_v4 = vpop.f32.mrb[51].mxu1  ;;  %v6324_v44 = vadd.f32 %v4702_v55, %v8592_v36  ;;  %v6127_v58 = vmul.f32 -1.442695, %v6322_v41 }
 0xb84   : > { %v6126_v8 = vmul.f32 -1.442695, %v6291_v16  ;;  %v6293_v20 = vadd.f32 %v4661_v26, %v8585_v57  ;;  %v6325_v63 = vadd.f32 %v4704_v4, %v8597_v12 }
 0xb85   : > { %7029 = vpow2.f32 %v6125_v56  ;;  %v6128_v27 = vmul.f32 -1.442695, %v6292_v45  ;;  %v6130_v49 = vmul.f32 -1.442695, %v6324_v44 }
 0xb86   : > { %v6129_v11 = vmul.f32 -1.442695, %v6293_v20  ;;  %7031 = vpow2.f32 %v6126_v8 }
 0xb87   : > { %7033 = vpow2.f32 %v6128_v27 }
 0xb88   : > { %7035 = vpow2.f32 %v6129_v11 }
 0xb89   : > { %7037 = vtanh.f32 %v6323_v46 }
 0xb8a   : > { %7039 = vpow2.f32 %v6127_v58 }
 0xb8b   : > { %7041 = vpow2.f32 %v6130_v49 }
 0xb8f   : > { %v7030_v50 = vpop.eup %7029 }
 0xb90   : > { %v4733_v13 = vadd.f32 1.0, %v7030_v50  ;;  %v7032_v24 = vpop.eup %7031 }
 0xb91   : > { %v7034_v59 = vpop.eup %7033  ;;  %v4734_v43 = vadd.f32 1.0, %v7032_v24 }
 0xb92   : > { %7043 = vrcp.f32 %v4733_v13  ;;  %v4736_v10 = vadd.f32 1.0, %v7034_v59  ;;  %v7036_v60 = vpop.eup %7035 }
 0xb93   : > { %7045 = vtanh.f32 %v6325_v63  ;;  %v4737_v52 = vadd.f32 1.0, %v7036_v60  ;;  %v7038_v51 = vpop.eup %7037 }
 0xb94   : > { %7047 = vrcp.f32 %v4734_v43  ;;  %v7040_v16 = vpop.eup %7039 }
 0xb95   : > { %7049 = vrcp.f32 %v4736_v10  ;;  %v7042_v54 = vpop.eup %7041  ;;  %v4735_v8 = vadd.f32 1.0, %v7040_v16 }
 0xb96   : > { %7051 = vrcp.f32 %v4737_v52  ;;  %v4738_v44 = vadd.f32 1.0, %v7042_v54 }
 0xb97   : > { %7053 = vrcp.f32 %v4735_v8 }
 0xb9c   : > { %v7044_v55 = vpop.eup %7043 }
 0xb9d   : > { %v7046_v56 = vpop.eup %7045  ;;  %v4755_v45 = vmul.f32 %v7044_v55, %v7038_v51 }
 0xb9e   : > { %v7048_v26 = vpop.eup %7047 }
 0xb9f   : > { %v7050_v4 = vpop.eup %7049  ;;  %v4753_v20 = vmul.f32 %v7048_v26, %v8652_v42 }
 0xba0   : > { %v4756_v27 = vmul.f32 %v7050_v4, %v7046_v56  ;;  %v7052_v11 = vpop.eup %7051 }
 0xba1   : > { %v8702_v41 = vadd.f32 %v4755_v45, %v4753_v20  ;;  %v4754_v46 = vmul.f32 %v7052_v11, %v8656_v47  ;;  %v7054_v49 = vpop.eup %7053 }
 0xba3   : > { %7055 = vtanh.f32 %v8702_v41  ;;  %v8706_v58 = vadd.f32 %v4756_v27, %v4754_v46 }
 0xba4   : > { %7057 = vrcp.f32 %v4738_v44 }
 0xba5   : > { %7059 = vtanh.f32 %v8706_v58 }
 0xbad   : > { %v7056_v50 = vpop.eup %7055 }
 0xbae   : > { %v7058_v63 = vpop.eup %7057  ;;  %v4761_v42 = vmul.f32 %v7056_v50, %v7054_v49 }
 0xbaf   : > { %v7060_v13 = vpop.eup %7059 }
 0xbb0   : > { %v4762_v24 = vmul.f32 %v7060_v13, %v7058_v63  ;;  %v8773_v13 = vld [vmem:[%s9116_s5 + $0x8] ss:$16 sps:$4 sm:$0xff]  }
 0xbb2   : > { %v4771_v59 = vpack.c.bf16 %v4762_v24, %v4761_v42  ;;  %v8779_v42 = vld [vmem:[%s9116_s5 + $0x24] ss:$16 sps:$4 sm:$0xff]   ;;  %v8785_v24 = vld [vmem:[%s9116_s5 + $0x2c] ss:$16 sps:$4 sm:$0xff]  }
 0xbb4   : > { %4805 = vmatmul.mubr.bf16.vlgmr.msra.gmra.mrb[44].mxu0 %v4771_v59  ;;  %4848 = vmatmul.mubr.bf16.vlgmr.msra.gmra.mrb[52].mxu1 %v4771_v59  ;;  %v8793_v59 = vld [vmem:[%s9116_s5 + $0x20] ss:$16 sps:$4 sm:$0xff]  }
 0xbb5   : > { %4924 = vmatpush1.bf16.msra.mxu0 %v8311_v7  ;;  %4967 = vmatpush1.bf16.msra.mxu1 %v8350_v25  ;;  %v8744_v7 = vld [vmem:[%s9116_s5 + $0x4] ss:$16 sps:$4 sm:$0xff]  }
 0xbb6   : > { %4925 = vmatprep.subr.bf16.mxu0 %v8357_v6  ;;  %4968 = vmatprep.subr.bf16.mxu1 %v8362_v19 }
 0xbb7   : > { %4955 = vmatprep.mubr.bf16.mxu0 %v9138_v5  ;;  %4998 = vmatprep.mubr.bf16.mxu1 %v9138_v5 }
 0xbb9   : > { %4926 = vmatpush1.bf16.msra.mxu0 %v8367_v1  ;;  %4969 = vmatpush1.bf16.msra.mxu1 %v8372_v61 }
 0xbba   : > { %4927 = vmatprep.subr.bf16.mxu0 %v8381_v21  ;;  %4970 = vmatprep.subr.bf16.mxu1 %v8396_v14 }
 0xbbd   : > { %4928 = vmatpush1.bf16.msra.mxu0 %v8386_v22  ;;  %4971 = vmatpush1.bf16.msra.mxu1 %v8402_v53 }
 0xbbe   : > { %4929 = vmatprep.subr.bf16.mxu0 %v8391_v17  ;;  %4972 = vmatprep.subr.bf16.mxu1 %v8407_v2 }
 0xbc1   : > { %4930 = vmatpush1.bf16.msra.mxu0 %v8413_v23  ;;  %4973 = vmatpush1.bf16.msra.mxu1 %v8426_v0 }
 0xbc2   : > { %4931 = vmatprep.subr.bf16.mxu0 %v8420_v3  ;;  %4974 = vmatprep.subr.bf16.mxu1 %v8432_v15 }
 0xbc5   : > { %4932 = vmatpush1.bf16.msra.mxu0 %v8438_v62  ;;  %4975 = vmatpush1.bf16.msra.mxu1 %v8450_v30 }
 0xbc6   : > { %4933 = vmatprep.subr.bf16.mxu0 %v8444_v29  ;;  %4976 = vmatprep.subr.bf16.mxu1 %v8456_v31 }
 0xbc9   : > { %4934 = vmatpush1.bf16.msra.mxu0 %v8462_v18  ;;  %4977 = vmatpush1.bf16.msra.mxu1 %v8474_v33 }
 0xbca   : > { %4935 = vmatprep.subr.bf16.mxu0 %v8468_v32  ;;  %4978 = vmatprep.subr.bf16.mxu1 %v8486_v34 }
 0xbcd   : > { %4936 = vmatpush1.bf16.msra.mxu0 %v8481_v28  ;;  %4979 = vmatpush1.bf16.msra.mxu1 %v8498_v37 }
 0xbce   : > { %4937 = vmatprep.subr.bf16.mxu0 %v8493_v35  ;;  %4980 = vmatprep.subr.bf16.mxu1 %v8504_v38 }
 0xbd1   : > { %4938 = vmatpush1.bf16.msra.mxu0 %v8510_v39  ;;  %4981 = vmatpush1.bf16.msra.mxu1 %v8517_v40 }
 0xbd2   : > { %5074 = vmatprep.subr.bf16.mxu0 %v8744_v7  ;;  %5117 = vmatprep.subr.bf16.mxu1 %v8345_v9 }
 0xc87   : > { %v4806_v25 = vpop.f32.mrb[44].mxu0  ;;  %v4849_v6 = vpop.f32.mrb[52].mxu1 }
 0xc88   : > { %v6294_v19 = vadd.f32 %v4806_v25, %v8581_v48  ;;  %v4808_v1 = vpop.f32.mrb[45].mxu0  ;;  %v4851_v61 = vpop.f32.mrb[53].mxu1  ;;  %v6326_v62 = vadd.f32 %v4849_v6, %v8592_v36  ;;  %v8799_v25 = vld [vmem:[%s9116_s5 + $0x28] ss:$16 sps:$4 sm:$0xff]   ;;  %v8805_v6 = vld [vmem:[%s9116_s5 + $0x44] ss:$16 sps:$4 sm:$0xff]  }
 0xc89   : > { %v6295_v21 = vadd.f32 %v4808_v1, %v8585_v57  ;;  %v4810_v22 = vpop.f32.mrb[46].mxu0  ;;  %v4853_v17 = vpop.f32.mrb[54].mxu1  ;;  %v6327_v30 = vadd.f32 %v4851_v61, %v8597_v12  ;;  %v8817_v1 = vld [vmem:[%s9116_s5 + $0x40] ss:$16 sps:$4 sm:$0xff]   ;;  %v8823_v61 = vld [vmem:[%s9116_s5 + $0x48] ss:$16 sps:$4 sm:$0xff]  }
 0xc8a   : > { %v6131_v14 = vmul.f32 -1.442695, %v6294_v19  ;;  %v6296_v53 = vadd.f32 %v4810_v22, %v8581_v48  ;;  %v4812_v2 = vpop.f32.mrb[47].mxu0  ;;  %v4855_v23 = vpop.f32.mrb[55].mxu1  ;;  %v6328_v29 = vadd.f32 %v4853_v17, %v8592_v36  ;;  %v6133_v31 = vmul.f32 -1.442695, %v6326_v62 }
 0xc8b   : > { %v6132_v3 = vmul.f32 -1.442695, %v6295_v21  ;;  %v6297_v0 = vadd.f32 %v4812_v2, %v8585_v57  ;;  %v6329_v33 = vadd.f32 %v4855_v23, %v8597_v12  ;;  %v8811_v19 = vld [vmem:[%s9116_s5 + $0x4c] ss:$16 sps:$4 sm:$0xff]   ;;  %v8829_v21 = vld [vmem:[%s9116_s5 + $0x64] ss:$16 sps:$4 sm:$0xff]  }
 0xc8c   : > { %7061 = vpow2.f32 %v6131_v14  ;;  %v6134_v9 = vmul.f32 -1.442695, %v6296_v53  ;;  %v6136_v18 = vmul.f32 -1.442695, %v6328_v29  ;;  %v8835_v22 = vld [vmem:[%s9116_s5 + $0x6c] ss:$16 sps:$4 sm:$0xff]  }
 0xc8d   : > { %v6135_v15 = vmul.f32 -1.442695, %v6297_v0  ;;  %7063 = vpow2.f32 %v6132_v3  ;;  %v8841_v17 = vld [vmem:[%s9116_s5 + $0x60] ss:$16 sps:$4 sm:$0xff]   ;;  %v8847_v14 = vld [vmem:[%s9116_s5 + $0x68] ss:$16 sps:$4 sm:$0xff]  }
 0xc8e   : > { %7065 = vpow2.f32 %v6134_v9  ;;  %v8853_v53 = vld [vmem:[%s9116_s5 + $0x84] ss:$16 sps:$4 sm:$0xff]   ;;  %v8859_v2 = vld [vmem:[%s9116_s5 + $0x8c] ss:$16 sps:$4 sm:$0xff]   ;;  %v8865_v23 = vld [vmem:[%s9116_s5 + $0x80] ss:$16 sps:$4 sm:$0xff]  }
 0xc8f   : > { %7067 = vpow2.f32 %v6135_v15  ;;  %v8871_v3 = vld [vmem:[%s9116_s5 + $0x88] ss:$16 sps:$4 sm:$0xff]   ;;  %v8877_v0 = vld [vmem:[%s9116_s5 + $0xa4] ss:$16 sps:$4 sm:$0xff]   ;;  %v8883_v9 = vld [vmem:[%s9116_s5 + $0xac] ss:$16 sps:$4 sm:$0xff]  }
 0xc90   : > { %7069 = vtanh.f32 %v6327_v30  ;;  %v8889_v15 = vld [vmem:[%s9116_s5 + $0xa0] ss:$16 sps:$4 sm:$0xff]   ;;  %v8895_v62 = vld [vmem:[%s9116_s5 + $0xa8] ss:$16 sps:$4 sm:$0xff]   ;;  %v8901_v29 = vld [vmem:[%s9116_s5 + $0xc4] ss:$16 sps:$4 sm:$0xff]  }
 0xc91   : > { %7071 = vpow2.f32 %v6133_v31  ;;  %v8907_v30 = vld [vmem:[%s9116_s5 + $0xcc] ss:$16 sps:$4 sm:$0xff]   ;;  %v8913_v31 = vld [vmem:[%s9116_s5 + $0xc0] ss:$16 sps:$4 sm:$0xff]  }
 0xc92   : > { %7073 = vpow2.f32 %v6136_v18  ;;  %v8919_v18 = vld [vmem:[%s9116_s5 + $0xc8] ss:$16 sps:$4 sm:$0xff]  }
 0xc96   : > { %v7062_v32 = vpop.eup %7061 }
 0xc97   : > { %v4884_v28 = vadd.f32 1.0, %v7062_v32  ;;  %v7064_v34 = vpop.eup %7063  ;;  %v8925_v32 = vld [vmem:[%s9116_s5 + $0xe4] ss:$16 sps:$4 sm:$0xff]  }
 0xc98   : > { %v7066_v35 = vpop.eup %7065  ;;  %v4885_v37 = vadd.f32 1.0, %v7064_v34  ;;  %v8943_v34 = vld [vmem:[%s9116_s5 + $0xe8] ss:$16 sps:$4 sm:$0xff]  }
 0xc99   : > { %7075 = vrcp.f32 %v4884_v28  ;;  %v4887_v38 = vadd.f32 1.0, %v7066_v35  ;;  %v7068_v39 = vpop.eup %7067  ;;  %v8937_v28 = vld [vmem:[%s9116_s5 + $0xe0] ss:$16 sps:$4 sm:$0xff]   ;;  %v8950_v35 = vld [vmem:[%s9116_s5 + $0xc] ss:$16 sps:$4 sm:$0xff]  }
 0xc9a   : > { %7077 = vtanh.f32 %v6329_v33  ;;  %v4888_v40 = vadd.f32 1.0, %v7068_v39  ;;  %v7070_v47 = vpop.eup %7069  ;;  %v8931_v33 = vld [vmem:[%s9116_s5 + $0xec] ss:$16 sps:$4 sm:$0xff]  }
 0xc9b   : > { %7079 = vrcp.f32 %v4885_v37  ;;  %v7072_v43 = vpop.eup %7071 }
 0xc9c   : > { %7081 = vrcp.f32 %v4887_v38  ;;  %v7074_v10 = vpop.eup %7073  ;;  %v4886_v55 = vadd.f32 1.0, %v7072_v43 }
 0xc9d   : > { %7083 = vrcp.f32 %v4888_v40  ;;  %v4889_v8 = vadd.f32 1.0, %v7074_v10 }
 0xc9e   : > { %7085 = vrcp.f32 %v4886_v55 }
 0xca3   : > { %v7076_v60 = vpop.eup %7075 }
 0xca4   : > { %v7078_v52 = vpop.eup %7077  ;;  %v4906_v51 = vmul.f32 %v7076_v60, %v7070_v47 }
 0xca5   : > { %v7080_v16 = vpop.eup %7079 }
 0xca6   : > { %v7082_v54 = vpop.eup %7081  ;;  %v4904_v56 = vmul.f32 %v7080_v16, %v8702_v41 }
 0xca7   : > { %v4907_v45 = vmul.f32 %v7082_v54, %v7078_v52  ;;  %v7084_v26 = vpop.eup %7083 }
 0xca8   : > { %v8757_v4 = vadd.f32 %v4906_v51, %v4904_v56  ;;  %v4905_v20 = vmul.f32 %v7084_v26, %v8706_v58  ;;  %v7086_v11 = vpop.eup %7085  ;;  %v8767_v58 = vld [vmem:[%s9116_s5] ss:$16 sps:$4 sm:$0xff]  }
 0xcaa   : > { %7087 = vtanh.f32 %v8757_v4  ;;  %v8761_v27 = vadd.f32 %v4907_v45, %v4905_v20 }
 0xcab   : > { %7089 = vrcp.f32 %v4889_v8 }
 0xcac   : > { %7091 = vtanh.f32 %v8761_v27 }
 0xcb4   : > { %v7088_v44 = vpop.eup %7087 }
 0xcb5   : > { %v7090_v46 = vpop.eup %7089  ;;  %v4912_v41 = vmul.f32 %v7088_v44, %v7086_v11 }
 0xcb6   : > { %v7092_v49 = vpop.eup %7091 }
 0xcb7   : > { %v4913_v50 = vmul.f32 %v7092_v49, %v7090_v46 }
 0xcb9   : > { %v4922_v63 = vpack.c.bf16 %v4913_v50, %v4912_v41 }
 0xcbb   : > { %4956 = vmatmul.mubr.bf16.vlgmr.msra.gmra.mrb[48].mxu0 %v4922_v63  ;;  %4999 = vmatmul.mubr.bf16.vlgmr.msra.gmra.mrb[56].mxu1 %v4922_v63 }
 0xcbc   : > { %5075 = vmatpush1.bf16.msra.mxu0 %v8767_v58  ;;  %5118 = vmatpush1.bf16.msra.mxu1 %v8773_v13 }
 0xcbd   : > { %5076 = vmatprep.subr.bf16.mxu0 %v8779_v42  ;;  %5119 = vmatprep.subr.bf16.mxu1 %v8785_v24 }
 0xcbe   : > { %5106 = vmatprep.mubr.bf16.mxu0 %v9138_v5  ;;  %5149 = vmatprep.mubr.bf16.mxu1 %v9138_v5 }
 0xcc0   : > { %5077 = vmatpush1.bf16.msra.mxu0 %v8793_v59  ;;  %5120 = vmatpush1.bf16.msra.mxu1 %v8799_v25 }
 0xcc1   : > { %5078 = vmatprep.subr.bf16.mxu0 %v8805_v6  ;;  %5121 = vmatprep.subr.bf16.mxu1 %v8811_v19 }
 0xcc4   : > { %5079 = vmatpush1.bf16.msra.mxu0 %v8817_v1  ;;  %5122 = vmatpush1.bf16.msra.mxu1 %v8823_v61 }
 0xcc5   : > { %5080 = vmatprep.subr.bf16.mxu0 %v8829_v21  ;;  %5123 = vmatprep.subr.bf16.mxu1 %v8835_v22 }
 0xcc8   : > { %5081 = vmatpush1.bf16.msra.mxu0 %v8841_v17  ;;  %5124 = vmatpush1.bf16.msra.mxu1 %v8847_v14 }
 0xcc9   : > { %5082 = vmatprep.subr.bf16.mxu0 %v8853_v53  ;;  %5125 = vmatprep.subr.bf16.mxu1 %v8859_v2 }
 0xccc   : > { %5083 = vmatpush1.bf16.msra.mxu0 %v8865_v23  ;;  %5126 = vmatpush1.bf16.msra.mxu1 %v8871_v3 }
 0xccd   : > { %5084 = vmatprep.subr.bf16.mxu0 %v8877_v0  ;;  %5127 = vmatprep.subr.bf16.mxu1 %v8883_v9 }
 0xcd0   : > { %5085 = vmatpush1.bf16.msra.mxu0 %v8889_v15  ;;  %5128 = vmatpush1.bf16.msra.mxu1 %v8895_v62 }
 0xcd1   : > { %5086 = vmatprep.subr.bf16.mxu0 %v8901_v29  ;;  %5129 = vmatprep.subr.bf16.mxu1 %v8907_v30 }
 0xcd4   : > { %5087 = vmatpush1.bf16.msra.mxu0 %v8913_v31  ;;  %5130 = vmatpush1.bf16.msra.mxu1 %v8919_v18 }
 0xcd5   : > { %5088 = vmatprep.subr.bf16.mxu0 %v8925_v32  ;;  %5131 = vmatprep.subr.bf16.mxu1 %v8931_v33 }
 0xcd8   : > { %5089 = vmatpush1.bf16.msra.mxu0 %v8937_v28  ;;  %5132 = vmatpush1.bf16.msra.mxu1 %v8943_v34 }
 0xcd9   : > { %5225 = vmatprep.subr.bf16.mxu0 %v8744_v7  ;;  %5268 = vmatprep.subr.bf16.mxu1 %v8950_v35 }
 0xd8e   : > { %v4957_v37 = vpop.f32.mrb[48].mxu0  ;;  %v5000_v38 = vpop.f32.mrb[56].mxu1 }
 0xd8f   : > { %v6298_v39 = vadd.f32 %v4957_v37, %v8581_v48  ;;  %v4959_v40 = vpop.f32.mrb[49].mxu0  ;;  %v5002_v47 = vpop.f32.mrb[57].mxu1  ;;  %v6330_v8 = vadd.f32 %v5000_v38, %v8592_v36 }
 0xd90   : > { %v6299_v43 = vadd.f32 %v4959_v40, %v8585_v57  ;;  %v4961_v10 = vpop.f32.mrb[50].mxu0  ;;  %v5004_v60 = vpop.f32.mrb[58].mxu1  ;;  %v6331_v11 = vadd.f32 %v5002_v47, %v8597_v12 }
 0xd91   : > { %v6137_v52 = vmul.f32 -1.442695, %v6298_v39  ;;  %v6300_v51 = vadd.f32 %v4961_v10, %v8581_v48  ;;  %v4963_v16 = vpop.f32.mrb[51].mxu0  ;;  %v5006_v54 = vpop.f32.mrb[59].mxu1  ;;  %v6332_v20 = vadd.f32 %v5004_v60, %v8592_v36  ;;  %v6139_v44 = vmul.f32 -1.442695, %v6330_v8 }
 0xd92   : > { %v6138_v55 = vmul.f32 -1.442695, %v6299_v43  ;;  %v6301_v56 = vadd.f32 %v4963_v16, %v8585_v57  ;;  %v6333_v41 = vadd.f32 %v5006_v54, %v8597_v12 }
 0xd93   : > { %7093 = vpow2.f32 %v6137_v52  ;;  %v6140_v45 = vmul.f32 -1.442695, %v6300_v51  ;;  %v6142_v46 = vmul.f32 -1.442695, %v6332_v20 }
 0xd94   : > { %v6141_v26 = vmul.f32 -1.442695, %v6301_v56  ;;  %7095 = vpow2.f32 %v6138_v55 }
 0xd95   : > { %7097 = vpow2.f32 %v6140_v45 }
 0xd96   : > { %7099 = vpow2.f32 %v6141_v26 }
 0xd97   : > { %7101 = vtanh.f32 %v6331_v11 }
 0xd98   : > { %7103 = vpow2.f32 %v6139_v44 }
 0xd99   : > { %7105 = vpow2.f32 %v6142_v46 }
 0xd9d   : > { %v7094_v49 = vpop.eup %7093 }
 0xd9e   : > { %v5035_v50 = vadd.f32 1.0, %v7094_v49  ;;  %v7096_v63 = vpop.eup %7095 }
 0xd9f   : > { %v7098_v37 = vpop.eup %7097  ;;  %v5036_v39 = vadd.f32 1.0, %v7096_v63 }
 0xda0   : > { %7107 = vrcp.f32 %v5035_v50  ;;  %v5038_v38 = vadd.f32 1.0, %v7098_v37  ;;  %v7100_v40 = vpop.eup %7099 }
 0xda1   : > { %7109 = vtanh.f32 %v6333_v41  ;;  %v5039_v43 = vadd.f32 1.0, %v7100_v40  ;;  %v7102_v47 = vpop.eup %7101 }
 0xda2   : > { %7111 = vrcp.f32 %v5036_v39  ;;  %v7104_v10 = vpop.eup %7103 }
 0xda3   : > { %7113 = vrcp.f32 %v5038_v38  ;;  %v7106_v60 = vpop.eup %7105  ;;  %v5037_v56 = vadd.f32 1.0, %v7104_v10 }
 0xda4   : > { %7115 = vrcp.f32 %v5039_v43  ;;  %v5040_v11 = vadd.f32 1.0, %v7106_v60 }
 0xda5   : > { %7117 = vrcp.f32 %v5037_v56 }
 0xdaa   : > { %v7108_v52 = vpop.eup %7107 }
 0xdab   : > { %v7110_v51 = vpop.eup %7109  ;;  %v5057_v16 = vmul.f32 %v7108_v52, %v7102_v47 }
 0xdac   : > { %v7112_v54 = vpop.eup %7111 }
 0xdad   : > { %v7114_v55 = vpop.eup %7113  ;;  %v5055_v45 = vmul.f32 %v7112_v54, %v8757_v4 }
 0xdae   : > { %v5058_v26 = vmul.f32 %v7114_v55, %v7110_v51  ;;  %v7116_v8 = vpop.eup %7115 }
 0xdaf   : > { %v8962_v20 = vadd.f32 %v5057_v16, %v5055_v45  ;;  %v5056_v44 = vmul.f32 %v7116_v8, %v8761_v27  ;;  %v7118_v49 = vpop.eup %7117 }
 0xdb1   : > { %7119 = vtanh.f32 %v8962_v20  ;;  %v8966_v46 = vadd.f32 %v5058_v26, %v5056_v44 }
 0xdb2   : > { %7121 = vrcp.f32 %v5040_v11 }
 0xdb3   : > { %7123 = vtanh.f32 %v8966_v46 }
 0xdbb   : > { %v7120_v41 = vpop.eup %7119 }
 0xdbc   : > { %v7122_v50 = vpop.eup %7121  ;;  %v5063_v4 = vmul.f32 %v7120_v41, %v7118_v49 }
 0xdbd   : > { %v7124_v63 = vpop.eup %7123 }
 0xdbe   : > { %v5064_v37 = vmul.f32 %v7124_v63, %v7122_v50 }
 0xdc0   : > { %v5073_v39 = vpack.c.bf16 %v5064_v37, %v5063_v4 }
 0xdc2   : > { %5107 = vmatmul.mubr.bf16.vlgmr.msra.gmra.mrb[52].mxu0 %v5073_v39  ;;  %5150 = vmatmul.mubr.bf16.vlgmr.msra.gmra.mrb[60].mxu1 %v5073_v39 }
 0xdc3   : > { %5226 = vmatpush1.bf16.msra.mxu0 %v8767_v58  ;;  %5269 = vmatpush1.bf16.msra.mxu1 %v8773_v13 }
 0xdc4   : > { %5227 = vmatprep.subr.bf16.mxu0 %v8779_v42  ;;  %5270 = vmatprep.subr.bf16.mxu1 %v8785_v24 }
 0xdc5   : > { %5257 = vmatprep.mubr.bf16.mxu0 %v9138_v5  ;;  %5300 = vmatprep.mubr.bf16.mxu1 %v9138_v5 }
 0xdc7   : > { %5228 = vmatpush1.bf16.msra.mxu0 %v8793_v59  ;;  %5271 = vmatpush1.bf16.msra.mxu1 %v8799_v25 }
 0xdc8   : > { %5229 = vmatprep.subr.bf16.mxu0 %v8805_v6  ;;  %5272 = vmatprep.subr.bf16.mxu1 %v8811_v19 }
 0xdcb   : > { %5230 = vmatpush1.bf16.msra.mxu0 %v8817_v1  ;;  %5273 = vmatpush1.bf16.msra.mxu1 %v8823_v61 }
 0xdcc   : > { %5231 = vmatprep.subr.bf16.mxu0 %v8829_v21  ;;  %5274 = vmatprep.subr.bf16.mxu1 %v8835_v22 }
 0xdcf   : > { %5232 = vmatpush1.bf16.msra.mxu0 %v8841_v17  ;;  %5275 = vmatpush1.bf16.msra.mxu1 %v8847_v14 }
 0xdd0   : > { %5233 = vmatprep.subr.bf16.mxu0 %v8853_v53  ;;  %5276 = vmatprep.subr.bf16.mxu1 %v8859_v2 }
 0xdd3   : > { %5234 = vmatpush1.bf16.msra.mxu0 %v8865_v23  ;;  %5277 = vmatpush1.bf16.msra.mxu1 %v8871_v3 }
 0xdd4   : > { %5235 = vmatprep.subr.bf16.mxu0 %v8877_v0  ;;  %5278 = vmatprep.subr.bf16.mxu1 %v8883_v9 }
 0xdd7   : > { %5236 = vmatpush1.bf16.msra.mxu0 %v8889_v15  ;;  %5279 = vmatpush1.bf16.msra.mxu1 %v8895_v62 }
 0xdd8   : > { %5237 = vmatprep.subr.bf16.mxu0 %v8901_v29  ;;  %5280 = vmatprep.subr.bf16.mxu1 %v8907_v30 }
 0xddb   : > { %5238 = vmatpush1.bf16.msra.mxu0 %v8913_v31  ;;  %5281 = vmatpush1.bf16.msra.mxu1 %v8919_v18 }
 0xddc   : > { %5239 = vmatprep.subr.bf16.mxu0 %v8925_v32  ;;  %5282 = vmatprep.subr.bf16.mxu1 %v8931_v33 }
 0xddf   : > { %5240 = vmatpush1.bf16.msra.mxu0 %v8937_v28  ;;  %5283 = vmatpush1.bf16.msra.mxu1 %v8943_v34 }
 0xde0   : > { %5376 = vmatprep.subr.bf16.mxu0 %v8744_v7  ;;  %5419 = vmatprep.subr.bf16.mxu1 %v8950_v35 }
 0xe95   : > { %v5108_v27 = vpop.f32.mrb[52].mxu0  ;;  %v5151_v38 = vpop.f32.mrb[60].mxu1 }
 0xe96   : > { %v6302_v40 = vadd.f32 %v5108_v27, %v8581_v48  ;;  %v5110_v43 = vpop.f32.mrb[53].mxu0  ;;  %v5153_v47 = vpop.f32.mrb[61].mxu1  ;;  %v6334_v26 = vadd.f32 %v5151_v38, %v8592_v36 }
 0xe97   : > { %v6303_v10 = vadd.f32 %v5110_v43, %v8585_v57  ;;  %v5112_v60 = vpop.f32.mrb[54].mxu0  ;;  %v5155_v52 = vpop.f32.mrb[62].mxu1  ;;  %v6335_v11 = vadd.f32 %v5153_v47, %v8597_v12 }
 0xe98   : > { %v6143_v51 = vmul.f32 -1.442695, %v6302_v40  ;;  %v6304_v16 = vadd.f32 %v5112_v60, %v8581_v48  ;;  %v5114_v54 = vpop.f32.mrb[55].mxu0  ;;  %v5157_v55 = vpop.f32.mrb[63].mxu1  ;;  %v6336_v8 = vadd.f32 %v5155_v52, %v8592_v36  ;;  %v6145_v44 = vmul.f32 -1.442695, %v6334_v26 }
 0xe99   : > { %v6144_v56 = vmul.f32 -1.442695, %v6303_v10  ;;  %v6305_v7 = vadd.f32 %v5114_v54, %v8585_v57  ;;  %v6337_v50 = vadd.f32 %v5157_v55, %v8597_v12 }
 0xe9a   : > { %7125 = vpow2.f32 %v6143_v51  ;;  %v6146_v35 = vmul.f32 -1.442695, %v6304_v16  ;;  %v6148_v49 = vmul.f32 -1.442695, %v6336_v8 }
 0xe9b   : > { %v6147_v45 = vmul.f32 -1.442695, %v6305_v7  ;;  %7127 = vpow2.f32 %v6144_v56 }
 0xe9c   : > { %7129 = vpow2.f32 %v6146_v35 }
 0xe9d   : > { %7131 = vpow2.f32 %v6147_v45 }
 0xe9e   : > { %7133 = vtanh.f32 %v6335_v11 }
 0xe9f   : > { %7135 = vpow2.f32 %v6145_v44 }
 0xea0   : > { %7137 = vpow2.f32 %v6148_v49 }
 0xea4   : > { %v7126_v41 = vpop.eup %7125 }
 0xea5   : > { %v5186_v63 = vadd.f32 1.0, %v7126_v41  ;;  %v7128_v4 = vpop.eup %7127 }
 0xea6   : > { %v7130_v37 = vpop.eup %7129  ;;  %v5187_v39 = vadd.f32 1.0, %v7128_v4 }
 0xea7   : > { %7139 = vrcp.f32 %v5186_v63  ;;  %v5189_v27 = vadd.f32 1.0, %v7130_v37  ;;  %v7132_v38 = vpop.eup %7131 }
 0xea8   : > { %7141 = vtanh.f32 %v6337_v50  ;;  %v5190_v40 = vadd.f32 1.0, %v7132_v38  ;;  %v7134_v43 = vpop.eup %7133 }
 0xea9   : > { %7143 = vrcp.f32 %v5187_v39  ;;  %v7136_v47 = vpop.eup %7135 }
 0xeaa   : > { %7145 = vrcp.f32 %v5189_v27  ;;  %v7138_v10 = vpop.eup %7137  ;;  %v5188_v55 = vadd.f32 1.0, %v7136_v47 }
 0xeab   : > { %7147 = vrcp.f32 %v5190_v40  ;;  %v5191_v26 = vadd.f32 1.0, %v7138_v10 }
 0xeac   : > { %7149 = vrcp.f32 %v5188_v55 }
 0xeb1   : > { %v7140_v60 = vpop.eup %7139 }
 0xeb2   : > { %v7142_v52 = vpop.eup %7141  ;;  %v5208_v51 = vmul.f32 %v7140_v60, %v7134_v43 }
 0xeb3   : > { %v7144_v16 = vpop.eup %7143 }
 0xeb4   : > { %v7146_v54 = vpop.eup %7145  ;;  %v5206_v56 = vmul.f32 %v7144_v16, %v8962_v20 }
 0xeb5   : > { %v5209_v7 = vmul.f32 %v7146_v54, %v7142_v52  ;;  %v7148_v35 = vpop.eup %7147 }
 0xeb6   : > { %v9012_v45 = vadd.f32 %v5208_v51, %v5206_v56  ;;  %v5207_v8 = vmul.f32 %v7148_v35, %v8966_v46  ;;  %v7150_v44 = vpop.eup %7149 }
 0xeb8   : > { %7151 = vtanh.f32 %v9012_v45  ;;  %v9016_v11 = vadd.f32 %v5209_v7, %v5207_v8 }
 0xeb9   : > { %7153 = vrcp.f32 %v5191_v26 }
 0xeba   : > { %7155 = vtanh.f32 %v9016_v11 }
 0xec2   : > { %v7152_v49 = vpop.eup %7151 }
 0xec3   : > { %v7154_v41 = vpop.eup %7153  ;;  %v5214_v20 = vmul.f32 %v7152_v49, %v7150_v44  ;;  %v7262_v49 = vmov 0.0  }
 0xec4   : > { %v7156_v50 = vpop.eup %7155 }
 0xec5   : > { %v5215_v63 = vmul.f32 %v7156_v50, %v7154_v41  ;;  %v6702_v41 = vld [vmem:[%s9118_s7 + $0x8] sm:$0xff]   ;;  %v6703_v50 = vld [vmem:[%s9118_s7 + $0x10] sm:$0xff]  }
 0xec7   : > { %v5224_v4 = vpack.c.bf16 %v5215_v63, %v5214_v20  ;;  %v6704_v20 = vld [vmem:[%s9118_s7 + $0x18] sm:$0xff]   ;;  %v6705_v63 = vld [vmem:[%s9118_s7 + $0x20] sm:$0xff]  }
 0xec9   : > { %5258 = vmatmul.mubr.bf16.vlgmr.msra.gmra.mrb[56].mxu0 %v5224_v4  ;;  %5301 = vmatmul.mubr.bf16.vlgmr.msra.gmra.mrb[64].mxu1 %v5224_v4  ;;  %v6706_v4 = vld [vmem:[%s9118_s7 + $0x28] sm:$0xff]  }
 0xeca   : > { %5377 = vmatpush1.bf16.msra.mxu0 %v8767_v58  ;;  %5420 = vmatpush1.bf16.msra.mxu1 %v8773_v13 }
 0xecb   : > { %5378 = vmatprep.subr.bf16.mxu0 %v8779_v42  ;;  %5421 = vmatprep.subr.bf16.mxu1 %v8785_v24 }
 0xecc   : > { %5408 = vmatprep.mubr.bf16.mxu0 %v9138_v5  ;;  %5451 = vmatprep.mubr.bf16.mxu1 %v9138_v5 }
 0xece   : > { %5379 = vmatpush1.bf16.msra.mxu0 %v8793_v59  ;;  %5422 = vmatpush1.bf16.msra.mxu1 %v8799_v25 }
 0xecf   : > { %5380 = vmatprep.subr.bf16.mxu0 %v8805_v6  ;;  %5423 = vmatprep.subr.bf16.mxu1 %v8811_v19 }
 0xed2   : > { %5381 = vmatpush1.bf16.msra.mxu0 %v8817_v1  ;;  %5424 = vmatpush1.bf16.msra.mxu1 %v8823_v61 }
 0xed3   : > { %5382 = vmatprep.subr.bf16.mxu0 %v8829_v21  ;;  %5425 = vmatprep.subr.bf16.mxu1 %v8835_v22 }
 0xed6   : > { %5383 = vmatpush1.bf16.msra.mxu0 %v8841_v17  ;;  %5426 = vmatpush1.bf16.msra.mxu1 %v8847_v14 }
 0xed7   : > { %5384 = vmatprep.subr.bf16.mxu0 %v8853_v53  ;;  %5427 = vmatprep.subr.bf16.mxu1 %v8859_v2 }
 0xeda   : > { %5385 = vmatpush1.bf16.msra.mxu0 %v8865_v23  ;;  %5428 = vmatpush1.bf16.msra.mxu1 %v8871_v3 }
 0xedb   : > { %5386 = vmatprep.subr.bf16.mxu0 %v8877_v0  ;;  %5429 = vmatprep.subr.bf16.mxu1 %v8883_v9 }
 0xede   : > { %5387 = vmatpush1.bf16.msra.mxu0 %v8889_v15  ;;  %5430 = vmatpush1.bf16.msra.mxu1 %v8895_v62 }
 0xedf   : > { %5388 = vmatprep.subr.bf16.mxu0 %v8901_v29  ;;  %5431 = vmatprep.subr.bf16.mxu1 %v8907_v30 }
 0xee2   : > { %5389 = vmatpush1.bf16.msra.mxu0 %v8913_v31  ;;  %5432 = vmatpush1.bf16.msra.mxu1 %v8919_v18 }
 0xee3   : > { %5390 = vmatprep.subr.bf16.mxu0 %v8925_v32  ;;  %5433 = vmatprep.subr.bf16.mxu1 %v8931_v33 }
 0xee6   : > { %5391 = vmatpush1.bf16.msra.mxu0 %v8937_v28  ;;  %5434 = vmatpush1.bf16.msra.mxu1 %v8943_v34 }
 0xee7   : > { %6182 = vmatprep.subr.bf16.mxu0 %v7262_v49 }
 0xf9c   : > { %v5259_v5 = vpop.f32.mrb[56].mxu0  ;;  %v5302_v58 = vpop.f32.mrb[64].mxu1 }
 0xf9d   : > { %v6306_v13 = vadd.f32 %v5259_v5, %v8581_v48  ;;  %v5261_v42 = vpop.f32.mrb[57].mxu0  ;;  %v5304_v24 = vpop.f32.mrb[65].mxu1  ;;  %v6338_v2 = vadd.f32 %v5302_v58, %v8592_v36  ;;  %v6707_v5 = vld [vmem:[%s9118_s7 + $0x30] sm:$0xff]   ;;  %v6708_v58 = vld [vmem:[%s9118_s7 + $0x38] sm:$0xff]  }
 0xf9e   : > { %v6307_v59 = vadd.f32 %v5261_v42, %v8585_v57  ;;  %v5263_v25 = vpop.f32.mrb[58].mxu0  ;;  %v5306_v6 = vpop.f32.mrb[66].mxu1  ;;  %v6339_v3 = vadd.f32 %v5304_v24, %v8597_v12 }
 0xf9f   : > { %v6149_v19 = vmul.f32 -1.442695, %v6306_v13  ;;  %v6308_v1 = vadd.f32 %v5263_v25, %v8581_v48  ;;  %v5265_v61 = vpop.f32.mrb[59].mxu0  ;;  %v5308_v21 = vpop.f32.mrb[67].mxu1  ;;  %v6340_v23 = vadd.f32 %v5306_v6, %v8592_v36  ;;  %v6151_v0 = vmul.f32 -1.442695, %v6338_v2 }
 0xfa0   : > { %v6150_v22 = vmul.f32 -1.442695, %v6307_v59  ;;  %v6309_v17 = vadd.f32 %v5265_v61, %v8585_v57  ;;  %v6341_v62 = vadd.f32 %v5308_v21, %v8597_v12 }
 0xfa1   : > { %7157 = vpow2.f32 %v6149_v19  ;;  %v6152_v14 = vmul.f32 -1.442695, %v6308_v1  ;;  %v6154_v9 = vmul.f32 -1.442695, %v6340_v23 }
 0xfa2   : > { %v6153_v53 = vmul.f32 -1.442695, %v6309_v17  ;;  %7159 = vpow2.f32 %v6150_v22 }
 0xfa3   : > { %7161 = vpow2.f32 %v6152_v14 }
 0xfa4   : > { %7163 = vpow2.f32 %v6153_v53 }
 0xfa5   : > { %7165 = vtanh.f32 %v6339_v3 }
 0xfa6   : > { %7167 = vpow2.f32 %v6151_v0 }
 0xfa7   : > { %7169 = vpow2.f32 %v6154_v9 }
 0xfab   : > { %v7158_v15 = vpop.eup %7157 }
 0xfac   : > { %v5337_v29 = vadd.f32 1.0, %v7158_v15  ;;  %v7160_v30 = vpop.eup %7159 }
 0xfad   : > { %v7162_v31 = vpop.eup %7161  ;;  %v5338_v18 = vadd.f32 1.0, %v7160_v30 }
 0xfae   : > { %7171 = vrcp.f32 %v5337_v29  ;;  %v5340_v32 = vadd.f32 1.0, %v7162_v31  ;;  %v7164_v33 = vpop.eup %7163 }
 0xfaf   : > { %7173 = vtanh.f32 %v6341_v62  ;;  %v5341_v28 = vadd.f32 1.0, %v7164_v33  ;;  %v7166_v34 = vpop.eup %7165 }
 0xfb0   : > { %7175 = vrcp.f32 %v5338_v18  ;;  %v7168_v46 = vpop.eup %7167 }
 0xfb1   : > { %7177 = vrcp.f32 %v5340_v32  ;;  %v7170_v37 = vpop.eup %7169  ;;  %v5339_v47 = vadd.f32 1.0, %v7168_v46 }
 0xfb2   : > { %7179 = vrcp.f32 %v5341_v28  ;;  %v5342_v16 = vadd.f32 1.0, %v7170_v37 }
 0xfb3   : > { %7181 = vrcp.f32 %v5339_v47 }
 0xfb8   : > { %v7172_v39 = vpop.eup %7171 }
 0xfb9   : > { %v7174_v27 = vpop.eup %7173  ;;  %v5359_v38 = vmul.f32 %v7172_v39, %v7166_v34 }
 0xfba   : > { %v7176_v40 = vpop.eup %7175 }
 0xfbb   : > { %v7178_v43 = vpop.eup %7177  ;;  %v5357_v10 = vmul.f32 %v7176_v40, %v9012_v45 }
 0xfbc   : > { %v5360_v60 = vmul.f32 %v7178_v43, %v7174_v27  ;;  %v7180_v52 = vpop.eup %7179 }
 0xfbd   : > { %v9060_v51 = vadd.f32 %v5359_v38, %v5357_v10  ;;  %v5358_v54 = vmul.f32 %v7180_v52, %v9016_v11  ;;  %v7182_v56 = vpop.eup %7181  ;;  %v6701_v11 = vld [vmem:[%s9118_s7] sm:$0xff]  }
 0xfbf   : > { %7183 = vtanh.f32 %v9060_v51  ;;  %v9064_v55 = vadd.f32 %v5360_v60, %v5358_v54 }
 0xfc0   : > { %7185 = vrcp.f32 %v5342_v16 }
 0xfc1   : > { %7187 = vtanh.f32 %v9064_v55 }
 0xfc9   : > { %v7184_v7 = vpop.eup %7183 }
 0xfca   : > { %v7186_v35 = vpop.eup %7185  ;;  %v5365_v45 = vmul.f32 %v7184_v7, %v7182_v56 }
 0xfcb   : > { %v7188_v26 = vpop.eup %7187 }
 0xfcc   : > { %v5366_v8 = vmul.f32 %v7188_v26, %v7186_v35 }
 0xfce   : > { %v5375_v44 = vpack.c.bf16 %v5366_v8, %v5365_v45 }
 0xfd0   : > { %5409 = vmatmul.mubr.bf16.vlgmr.msra.gmra.mrb[60].mxu0 %v5375_v44  ;;  %5452 = vmatmul.mubr.bf16.vlgmr.msra.gmra.mrb[68].mxu1 %v5375_v44 }
 0xfd1   : > { %6183 = vmatpush3.bf16.msra.mxu0 %v6701_v11  ;;  %6198 = vmatprep.mubr.msk.bf16.mxu0 %vm7263_vm1, %v7262_v49 }
 0xfd2   : > { %6184 = vmatprep.subr.bf16.mxu0 %v7262_v49 }
 0xfd5   : > { %6185 = vmatpush3.bf16.msra.mxu0 %v6702_v41 }
 0xfd6   : > { %6186 = vmatprep.subr.bf16.mxu0 %v7262_v49 }
 0xfd9   : > { %6187 = vmatpush3.bf16.msra.mxu0 %v6703_v50 }
 0xfda   : > { %6188 = vmatprep.subr.bf16.mxu0 %v7262_v49 }
 0xfdd   : > { %6189 = vmatpush3.bf16.msra.mxu0 %v6704_v20 }
 0xfde   : > { %6190 = vmatprep.subr.bf16.mxu0 %v7262_v49 }
 0xfe1   : > { %6191 = vmatpush3.bf16.msra.mxu0 %v6705_v63 }
 0xfe2   : > { %6192 = vmatprep.subr.bf16.mxu0 %v7262_v49 }
 0xfe5   : > { %6193 = vmatpush3.bf16.msra.mxu0 %v6706_v4 }
 0xfe6   : > { %6194 = vmatprep.subr.bf16.mxu0 %v7262_v49 }
 0xfe9   : > { %6195 = vmatpush3.bf16.msra.mxu0 %v6707_v5 }
 0xfea   : > { %6196 = vmatprep.subr.bf16.mxu0 %v7262_v49 }
 0xfed   : > { %6197 = vmatpush3.bf16.msra.mxu0 %v6708_v58 }
0x10a3   : > { %v5410_v13 = vpop.f32.mrb[60].mxu0  ;;  %v5453_v42 = vpop.f32.mrb[68].mxu1 }
0x10a4   : > { %v6310_v24 = vadd.f32 %v5410_v13, %v8581_v48  ;;  %v5412_v59 = vpop.f32.mrb[61].mxu0  ;;  %v5455_v25 = vpop.f32.mrb[69].mxu1  ;;  %v6342_v3 = vadd.f32 %v5453_v42, %v8592_v36 }
0x10a5   : > { %v6311_v6 = vadd.f32 %v5412_v59, %v8585_v57  ;;  %v5414_v19 = vpop.f32.mrb[62].mxu0  ;;  %v5457_v1 = vpop.f32.mrb[70].mxu1  ;;  %v6343_v9 = vadd.f32 %v5455_v25, %v8597_v12 }
0x10a6   : > { %v6155_v61 = vmul.f32 -1.442695, %v6310_v24  ;;  %v6312_v21 = vadd.f32 %v5414_v19, %v8581_v48  ;;  %v5416_v22 = vpop.f32.mrb[63].mxu0  ;;  %v5459_v17 = vpop.f32.mrb[71].mxu1  ;;  %v6344_v0 = vadd.f32 %v5457_v1, %v8592_v36  ;;  %v6157_v15 = vmul.f32 -1.442695, %v6342_v3 }
0x10a7   : > { %v6156_v14 = vmul.f32 -1.442695, %v6311_v6  ;;  %v6313_v53 = vadd.f32 %v5416_v22, %v8585_v57  ;;  %v6345_v29 = vadd.f32 %v5459_v17, %v8597_v12 }
0x10a8   : > { %7189 = vpow2.f32 %v6155_v61  ;;  %v6158_v2 = vmul.f32 -1.442695, %v6312_v21  ;;  %v6160_v62 = vmul.f32 -1.442695, %v6344_v0 }
0x10a9   : > { %v6159_v23 = vmul.f32 -1.442695, %v6313_v53  ;;  %7191 = vpow2.f32 %v6156_v14 }
0x10aa   : > { %7193 = vpow2.f32 %v6158_v2 }
0x10ab   : > { %7195 = vpow2.f32 %v6159_v23 }
0x10ac   : > { %7197 = vtanh.f32 %v6343_v9 }
0x10ad   : > { %7199 = vpow2.f32 %v6157_v15 }
0x10ae   : > { %7201 = vpow2.f32 %v6160_v62 }
0x10b2   : > { %v7190_v48 = vpop.eup %7189 }
0x10b3   : > { %v5488_v30 = vadd.f32 1.0, %v7190_v48  ;;  %v7192_v57 = vpop.eup %7191 }
0x10b4   : > { %v7194_v31 = vpop.eup %7193  ;;  %v5489_v18 = vadd.f32 1.0, %v7192_v57 }
0x10b5   : > { %7203 = vrcp.f32 %v5488_v30  ;;  %v5491_v32 = vadd.f32 1.0, %v7194_v31  ;;  %v7196_v33 = vpop.eup %7195 }
0x10b6   : > { %7205 = vtanh.f32 %v6345_v29  ;;  %v5492_v36 = vadd.f32 1.0, %v7196_v33  ;;  %v7198_v28 = vpop.eup %7197 }
0x10b7   : > { %7207 = vrcp.f32 %v5489_v18  ;;  %v7200_v34 = vpop.eup %7199 }
0x10b8   : > { %7209 = vrcp.f32 %v5491_v32  ;;  %v7202_v46 = vpop.eup %7201  ;;  %v5490_v38 = vadd.f32 1.0, %v7200_v34 }
0x10b9   : > { %7211 = vrcp.f32 %v5492_v36  ;;  %v5493_v52 = vadd.f32 1.0, %v7202_v46 }
0x10ba   : > { %7213 = vrcp.f32 %v5490_v38 }
0x10bf   : > { %v7204_v37 = vpop.eup %7203 }
0x10c0   : > { %v7206_v39 = vpop.eup %7205  ;;  %v5510_v12 = vmul.f32 %v7204_v37, %v7198_v28 }
0x10c1   : > { %v7208_v27 = vpop.eup %7207 }
0x10c2   : > { %v7210_v40 = vpop.eup %7209  ;;  %v5508_v43 = vmul.f32 %v7208_v27, %v9060_v51  ;;  %v6161_v51 = vld [vmem:[%s9119_s8] ss:$0 sm:$0xff] }
0x10c3   : > { %v5511_v47 = vmul.f32 %v7210_v40, %v7206_v39  ;;  %v7212_v10 = vpop.eup %7211 }
0x10c4   : > { %v5512_v60 = vadd.f32 %v5510_v12, %v5508_v43  ;;  %v5509_v16 = vmul.f32 %v7212_v10, %v9064_v55  ;;  %v7214_v56 = vpop.eup %7213 }
0x10c6   : > { %7215 = vtanh.f32 %v5512_v60  ;;  %v5513_v54 = vadd.f32 %v5511_v47, %v5509_v16 }
0x10c7   : > { %7217 = vrcp.f32 %v5493_v52 }
0x10c8   : > { %7219 = vtanh.f32 %v5513_v54 }
0x10d0   : > { %v7216_v7 = vpop.eup %7215 }
0x10d1   : > { %v5516_v35 = vmul.f32 %v7216_v7, %v7214_v56  ;;  %v7218_v26 = vpop.eup %7217 }
0x10d2   : > { %v7220_v45 = vpop.eup %7219 }
0x10d3   : > { %v5517_v8 = vmul.f32 %v7220_v45, %v7218_v26 }
0x10d5   : > { %v5518_v44 = vpack.c.bf16 %v5517_v8, %v5516_v35 }
0x10d7   : > { %6199 = vmatmul.mubr.bf16.vlgmr.msra.gmra.mrb[64].mxu0 %v5518_v44 }
0x11aa   : > { %v5624_v55 = vpop.f32.mrb[64].mxu0 }
0x11ab   : > { %v5625_v11 = vadd.f32 %v6161_v51, %v5624_v55  ;;  %v6200_v49 = vpop.f32.mrb[65].mxu0 }
0x11ac   : > { %v5627_v41 = vpop.f32.mrb[66].mxu0 }
0x11ad   : > { %5631 = vst [vmem:[%s332_s18] sm:$0xff] %v5625_v11  ;;  %v5628_v50 = vadd.f32 %v6161_v51, %v5627_v41  ;;  %v6201_v20 = vpop.f32.mrb[67].mxu0 }
0x11af   : > { %5632 = vst [vmem:[%s332_s18 + $0x8] sm:$0xff] %v5628_v50 }
0x11b0 PF: > { %s19_s30 = sadd.s32 1, %s7259_s30  }
0x11b1   : > { %p16_p5 = scmp.ge.s32.totalorder %s19_s30, 4  }
0x11b3   :  { %18 = sbr.rel (!%p16_p5) target bundleno = 1 (0x1), region = 101 }

</bundles_post_ra>
